<compile_context>
chip_gen: v7x
topology: tpu7x:2x2x1
jax: 0.10.0
libtpu: 0.0.40
codegen_flags: <defaults>
</compile_context>

<pallas_src>
import jax
import jax.numpy as jnp
from jax import lax
from jax.experimental import pallas as pl
from jax.experimental.pallas import tpu as pltpu


def _slot_decoder_kernel(
    slot_ref, h0_ref, enc_ref, ids_ref, maskb_ref,
    embed_ref, wih_ref, whh_ref, bfold_ref, bhhn_ref,
    wgen_ref, bgen_ref, wgate_ref, bgate_ref,
    point_ref, gate_ref,
    w_scr, h_scr, onehot_scr,
):
    k = pl.program_id(1)               # decode step (inner "arbitrary" axis)
    Bt, T, H = enc_ref.shape           # batch tile of the encoder output
    J = slot_ref.shape[0]
    V = embed_ref.shape[0]
    R = Bt * J                         # rows fed to the batch-independent matmuls

    # ---- per-B-tile init (k == 0): decode state + loop-invariant ids one-hot ----
    @pl.when(k == 0)
    def _init():
        slot_e = slot_ref[...]                                          # (J, H) f32
        # row order (b, j) == torch's slot_e.repeat(B,1) / repeat_interleave(J)
        w_scr[...] = jnp.tile(slot_e, (Bt, 1))                          # (R, H)
        h_scr[...] = jnp.broadcast_to(h0_ref[...], (Bt, J, H)).reshape(R, H)
        # scatter_add == matmul with a one-hot; built once per B-tile, bf16 for MXU
        ids = ids_ref[...]                                              # (Bt, T, 1) i32
        iota_v = lax.broadcasted_iota(jnp.int32, (Bt, T, V), 2)
        onehot_scr[...] = (ids == iota_v).astype(jnp.bfloat16)

    w = w_scr[...]                     # (R, H) f32  decoder input (pre-GRU)
    h = h_scr[...]                     # (R, H) f32  GRU hidden
    enc = enc_ref[...]                 # (Bt, T, H) bf16
    embed_w = embed_ref[...]           # (V, H) bf16
    w_b = w.astype(jnp.bfloat16)
    h_b = h.astype(jnp.bfloat16)

    # ---- GRU cell, single step (PyTorch gate order r, z, n); r/z biases pre-folded
    gi = jnp.dot(w_b, wih_ref[...], preferred_element_type=jnp.float32) + bfold_ref[...]
    gh = jnp.dot(h_b, whh_ref[...], preferred_element_type=jnp.float32)
    r = jax.nn.sigmoid(gi[:, 0:H] + gh[:, 0:H])
    z = jax.nn.sigmoid(gi[:, H:2 * H] + gh[:, H:2 * H])
    n = jnp.tanh(gi[:, 2 * H:3 * H] + r * (gh[:, 2 * H:3 * H] + bhhn_ref[...]))
    h_new = (1.0 - z) * n + z * h                                       # (R, H) f32
    hn_b = h_new.astype(jnp.bfloat16)

    # ---- attention over encoder history (per-batch, additive -1e9 mask bias) ----
    # NOTE: fully-padded rows get a uniform softmax (same as masked_fill to -1e9).
    attn_e = lax.dot_general(hn_b.reshape(Bt, J, H), enc,
                             (((2,), (2,)), ((0,), (0,))),
                             preferred_element_type=jnp.float32)        # (Bt, J, T)
    attn_hist = jax.nn.softmax(attn_e + maskb_ref[...], axis=-1)        # f32
    ah_b = attn_hist.astype(jnp.bfloat16)

    # ---- vocab attention: all R rows in one MXU matmul, contracting on H ----
    attn_v = lax.dot_general(hn_b, embed_w, (((1,), (1,)), ((), ())),
                             preferred_element_type=jnp.float32)        # (R, V)
    attn_vocab = jax.nn.softmax(attn_v, axis=-1)

    # ---- context vector ----
    context = lax.dot_general(ah_b, enc, (((2,), (1,)), ((0,), (0,))),
                              preferred_element_type=jnp.float32).reshape(R, H)

    # ---- p_gen on the VPU (torch cat order here is [w, hidden_new, context]) ----
    wgen = wgen_ref[...]
    logit = (jnp.sum(w * wgen[:, 0:H], axis=-1, keepdims=True)
             + jnp.sum(h_new * wgen[:, H:2 * H], axis=-1, keepdims=True)
             + jnp.sum(context * wgen[:, 2 * H:3 * H], axis=-1, keepdims=True)
             + bgen_ref[...])
    p_gen = jax.nn.sigmoid(logit)                                       # (R, 1)

    # ---- copy distribution: scatter_add == batched matmul with the hoisted one-hot
    p_ctx = lax.dot_general(ah_b, onehot_scr[...], (((2,), (1,)), ((0,), (0,))),
                            preferred_element_type=jnp.float32).reshape(R, V)

    p_final = p_gen * attn_vocab + (1.0 - p_gen) * p_ctx                # (R, V) f32

    # ---- greedy argmax (first-max tie-break, kept in f32) -> next-step embedding
    iota_rv = lax.broadcasted_iota(jnp.int32, (R, V), 1)
    max_val = jnp.max(p_final, axis=-1, keepdims=True)
    w_idx = jnp.min(jnp.where(p_final == max_val, iota_rv, V),
                    axis=-1, keepdims=True)                             # (R, 1)
    # TODO(synk): at production vocab sizes replace this one-hot matmul with a
    # per-row DMA gather from an HBM-resident embedding table.
    onehot_w = (iota_rv == w_idx).astype(jnp.bfloat16)                  # (R, V)
    w_next = jnp.dot(onehot_w, embed_w, preferred_element_type=jnp.float32)

    # ---- stream this step's point block; carry state in scratch ----
    point_ref[...] = p_final.reshape(Bt, 1, J, V)
    w_scr[...] = w_next
    h_scr[...] = h_new

    # ---- slot-gate head, once per B-tile from the k == 0 context ----
    @pl.when(k == 0)
    def _gate():
        ng = gate_ref.shape[2]
        gate_ref[...] = (jnp.dot(context, wgate_ref[...],
                                 preferred_element_type=jnp.float32)
                         + bgate_ref[...]).reshape(Bt, J, ng)


def _pick_b_tile(batch_size, n_slots, target_rows=256):
    # Largest divisor of B with b_tile*J <= target_rows: fills the 256-wide MXU on
    # v6e/v7x (and >=128 on v5e) while keeping several grid steps to pipeline.
    best = 1
    for d in range(1, batch_size + 1):
        if batch_size % d == 0 and d * n_slots <= target_rows:
            best = d
    return best


def _vmem_limit_bytes():
    # ~75% of physical VMEM: ~96 MiB on v5e/v6e, ~48 MiB on v7x.
    try:
        cap = pltpu.get_tpu_info().vmem_capacity_bytes
        return max((int(cap) * 3) // 4, 32 * 1024 * 1024)
    except Exception:
        return 64 * 1024 * 1024


def slot_generator_forward(params, slot_idx, input_ids, encoder_output,
                           hidden, input_masks, max_len, torch_layout=True):
    embed = params["embed"]                                             # (V, H) f32
    B, T, H = encoder_output.shape
    V = embed.shape[0]
    J = slot_idx.shape[0]
    n_gate = params["w_gate_w"].shape[0]
    assert max_len >= 1

    b_tile = _pick_b_tile(B, J)
    rows = b_tile * J
    num_bt = B // b_tile

    # slot embedding (sum over slot-name tokens) -- trivial lookup kept in glue
    slot_e = jnp.take(embed, slot_idx, axis=0).sum(axis=1)              # (J, H) f32

    # bf16 MXU operands; activations / softmax / gates stay f32 (v5e-friendly)
    bf = jnp.bfloat16
    enc_bf = encoder_output.astype(bf)                                  # (B, T, H)
    embed_bf = embed.astype(bf)                                         # (V, H)
    wih_bf = params["gru_w_ih"].T.astype(bf)                            # (H, 3H)
    whh_bf = params["gru_w_hh"].T.astype(bf)                            # (H, 3H)

    # pre-fold the r/z GRU biases (bih+bhh); bhh_n stays separate (multiplied by r)
    bih, bhh = params["gru_b_ih"], params["gru_b_hh"]
    b_fold = jnp.concatenate([bih[:2 * H] + bhh[:2 * H], bih[2 * H:]])[None, :]
    bhh_n = bhh[2 * H:][None, :]

    # NOTE: no J-fold repeat_interleave -- per-B-tile BlockSpecs re-read originals.
    hidden0 = hidden[0][:, None, :]                                     # (B, 1, H)
    ids3 = input_ids.astype(jnp.int32)[:, :, None]                      # (B, T, 1)
    mask_bias = ((input_masks != 1).astype(jnp.float32)
                 * jnp.float32(-1.0e9))[:, None, :]                     # (B, 1, T)

    kernel_inputs = [
        slot_e, hidden0, enc_bf, ids3, mask_bias,
        embed_bf, wih_bf, whh_bf, b_fold, bhh_n,
        params["w_gen_w"], params["w_gen_b"][None, :],
        params["w_gate_w"].T, params["w_gate_b"][None, :],
    ]

    out_shapes = (
        jax.ShapeDtypeStruct((B, max_len, J, V), jnp.float32),   # point (batch-major)
        jax.ShapeDtypeStruct((B, J, n_gate), jnp.float32),       # gate
    )

    def run(single_buffer_invariants):
        def rep_spec(shape):
            nd = len(shape)
            kw = {}
            if single_buffer_invariants:
                kw["pipeline_mode"] = pl.Buffered(1)   # grid-invariant: no double buffer
            return pl.BlockSpec(shape, lambda bt, k, nd=nd: (0,) * nd, **kw)

        in_specs = [
            rep_spec((J, H)),                                            # slot_e
            pl.BlockSpec((b_tile, 1, H), lambda bt, k: (bt, 0, 0)),      # hidden0
            pl.BlockSpec((b_tile, T, H), lambda bt, k: (bt, 0, 0)),      # encoder out
            pl.BlockSpec((b_tile, T, 1), lambda bt, k: (bt, 0, 0)),      # input ids
            pl.BlockSpec((b_tile, 1, T), lambda bt, k: (bt, 0, 0)),      # mask bias
            rep_spec((V, H)),                                            # embedding
            rep_spec((H, 3 * H)), rep_spec((H, 3 * H)),                  # wih, whh
            rep_spec((1, 3 * H)), rep_spec((1, H)),                      # b_fold, bhh_n
            rep_spec((1, 3 * H)), rep_spec((1, 1)),                      # wgen, bgen
            rep_spec((H, n_gate)), rep_spec((1, n_gate)),                # wgate, bgate
        ]
        out_specs = (
            pl.BlockSpec((b_tile, 1, J, V), lambda bt, k: (bt, k, 0, 0)),  # streamed
            pl.BlockSpec((b_tile, J, n_gate), lambda bt, k: (bt, 0, 0)),   # resident
        )
        return pl.pallas_call(
            _slot_decoder_kernel,
            out_shape=out_shapes,
            grid=(num_bt, max_len),
            in_specs=in_specs,
            out_specs=out_specs,
            scratch_shapes=[
                pltpu.VMEM((rows, H), jnp.float32),        # w (decoder input) carry
                pltpu.VMEM((rows, H), jnp.float32),        # h (GRU hidden) carry
                pltpu.VMEM((b_tile, T, V), jnp.bfloat16),  # per-B-tile ids one-hot
            ],
            compiler_params=pltpu.CompilerParams(
                dimension_semantics=("parallel", "arbitrary"),
                vmem_limit_bytes=_vmem_limit_bytes()),
        )(*kernel_inputs)

    try:
        point, gate = run(True)
    except Exception:
        # pl.Buffered(1) unsupported on this build -> default double buffering.
        point, gate = run(False)

    if torch_layout:
        # exact torch layout (B, J, max_len, V); pass torch_layout=False to consume
        # the kernel-native batch-major (B, max_len, J, V) and skip this relayout.
        point = jnp.swapaxes(point, 1, 2)
    return point, gate


def init_params(key, vocab_size, hidden_size, n_gate, pad_idx=0):
    ks = jax.random.split(key, 8)
    s = 0.05
    embed = jax.random.normal(ks[0], (vocab_size, hidden_size), jnp.float32) * s
    embed = embed.at[pad_idx].set(0.0)                                  # padding_idx row = 0
    return {
        "embed": embed,
        "gru_w_ih": jax.random.normal(ks[1], (3 * hidden_size, hidden_size), jnp.float32) * s,
        "gru_w_hh": jax.random.normal(ks[2], (3 * hidden_size, hidden_size), jnp.float32) * s,
        "gru_b_ih": jax.random.normal(ks[3], (3 * hidden_size,), jnp.float32) * s,
        "gru_b_hh": jax.random.normal(ks[4], (3 * hidden_size,), jnp.float32) * s,
        "w_gen_w": jax.random.normal(ks[5], (1, 3 * hidden_size), jnp.float32) * s,
        "w_gen_b": jnp.zeros((1,), jnp.float32),
        "w_gate_w": jax.random.normal(ks[6], (n_gate, hidden_size), jnp.float32) * s,
        "w_gate_b": jax.random.normal(ks[7], (n_gate,), jnp.float32) * s,
    }


if __name__ == "__main__":
    # small shapes consistent with the module
    B, T, H, V = 2, 8, 32, 128
    J, n_gate, max_len, pad_idx = 3, 4, 4, 0

    key = jax.random.PRNGKey(0)
    kp, k1, k2, k3 = jax.random.split(key, 4)
    params = init_params(kp, V, H, n_gate, pad_idx)

    # slot vocab indices (set_slot_idx): J slots, padded with pad_idx to equal length
    slot_idx = jnp.array([[5, 7, 0],
                          [9, 11, 13],
                          [3, 0, 0]], dtype=jnp.int32)                  # (J, 3)

    input_ids = jax.random.randint(k1, (B, T), 1, V, dtype=jnp.int32)   # (B, T)
    encoder_output = jax.random.normal(k2, (B, T, H), jnp.float32)      # (B, T, H)
    hidden = jax.random.normal(k3, (1, B, H), jnp.float32)              # (1, B, H)
    input_masks = jnp.array([[1, 1, 1, 1, 1, 1, 0, 0],
                             [1, 1, 1, 1, 1, 1, 1, 1]], dtype=jnp.int32)  # 1 = valid

    all_point, all_gate = slot_generator_forward(
        params, slot_idx, input_ids, encoder_output, hidden, input_masks, max_len)

    jax.block_until_ready((all_point, all_gate))
    assert all_point.shape == (B, J, max_len, V)
    assert all_gate.shape == (B, J, n_gate)
    assert bool(jnp.isfinite(all_point).all()) and bool(jnp.isfinite(all_gate).all())
    # p_final mixes two softmax distributions, so every (b, j, k) row sums to ~1
    assert bool(jnp.allclose(all_point.sum(-1), 1.0, atol=5e-2))
    print("KERNEL_OK")
</pallas_src>

<mosaic_0001>
module attributes {stable_mosaic.version = 11 : i64} {
  func.func @_slot_decoder_kernel(%arg0: i32, %arg1: i32, %arg2: memref<3x32xf32, #tpu.memory_space<vmem>>, %arg3: memref<2x1x32xf32, #tpu.memory_space<vmem>>, %arg4: memref<2x8x32xbf16, #tpu.memory_space<vmem>>, %arg5: memref<2x8x1xi32, #tpu.memory_space<vmem>>, %arg6: memref<2x1x8xf32, #tpu.memory_space<vmem>>, %arg7: memref<128x32xbf16, #tpu.memory_space<vmem>>, %arg8: memref<32x96xbf16, #tpu.memory_space<vmem>>, %arg9: memref<32x96xbf16, #tpu.memory_space<vmem>>, %arg10: memref<1x96xf32, #tpu.memory_space<vmem>>, %arg11: memref<1x32xf32, #tpu.memory_space<vmem>>, %arg12: memref<1x96xf32, #tpu.memory_space<vmem>>, %arg13: memref<1x1xf32, #tpu.memory_space<vmem>>, %arg14: memref<32x4xf32, #tpu.memory_space<vmem>>, %arg15: memref<1x4xf32, #tpu.memory_space<vmem>>, %arg16: memref<2x1x3x128xf32, #tpu.memory_space<vmem>>, %arg17: memref<2x3x4xf32, #tpu.memory_space<vmem>>, %arg18: memref<6x32xf32, #tpu.memory_space<vmem>>, %arg19: memref<6x32xf32, #tpu.memory_space<vmem>>, %arg20: memref<2x8x128xbf16, #tpu.memory_space<vmem>>) attributes {dimension_semantics = [#tpu.dimension_semantics<parallel>, #tpu.dimension_semantics<arbitrary>], iteration_bounds = array<i64: 1, 4>, scalar_prefetch = 0 : i64, scratch_operands = 3 : i64, tpu.core_type = #tpu.core_type<tc>, window_params = [{pipeline_mode = #tpu.pipeline_mode<synchronous>, transform_indices = @transform_0, window_bounds = array<i64: 3, 32>}, {transform_indices = @transform_1, window_bounds = array<i64: 2, 1, 32>}, {transform_indices = @transform_2, window_bounds = array<i64: 2, 8, 32>}, {transform_indices = @transform_3, window_bounds = array<i64: 2, 8, 1>}, {transform_indices = @transform_4, window_bounds = array<i64: 2, 1, 8>}, {pipeline_mode = #tpu.pipeline_mode<synchronous>, transform_indices = @transform_5, window_bounds = array<i64: 128, 32>}, {pipeline_mode = #tpu.pipeline_mode<synchronous>, transform_indices = @transform_6, window_bounds = array<i64: 32, 96>}, {pipeline_mode = #tpu.pipeline_mode<synchronous>, transform_indices = @transform_7, window_bounds = array<i64: 32, 96>}, {pipeline_mode = #tpu.pipeline_mode<synchronous>, transform_indices = @transform_8, window_bounds = array<i64: 1, 96>}, {pipeline_mode = #tpu.pipeline_mode<synchronous>, transform_indices = @transform_9, window_bounds = array<i64: 1, 32>}, {pipeline_mode = #tpu.pipeline_mode<synchronous>, transform_indices = @transform_10, window_bounds = array<i64: 1, 96>}, {pipeline_mode = #tpu.pipeline_mode<synchronous>, transform_indices = @transform_11, window_bounds = array<i64: 1, 1>}, {pipeline_mode = #tpu.pipeline_mode<synchronous>, transform_indices = @transform_12, window_bounds = array<i64: 32, 4>}, {pipeline_mode = #tpu.pipeline_mode<synchronous>, transform_indices = @transform_13, window_bounds = array<i64: 1, 4>}, {transform_indices = @transform_14, window_bounds = array<i64: 2, 1, 3, 128>}, {transform_indices = @transform_15, window_bounds = array<i64: 2, 3, 4>}]} {
    %c0_i32 = arith.constant 0 : i32
    %0 = arith.cmpi eq, %arg1, %c0_i32 : i32
    %1 = arith.extui %0 : i1 to i32
    %c0_i32_0 = arith.constant 0 : i32
    %2 = arith.cmpi ne, %1, %c0_i32_0 : i32
    scf.if %2 {
      %c0_59 = arith.constant 0 : index
      %c0_60 = arith.constant 0 : index
      %135 = vector.load %arg2[%c0_59, %c0_60] : memref<3x32xf32, #tpu.memory_space<vmem>>, vector<3x32xf32>
      %136 = tpu.concatenate %135, %135 in 0 : vector<3x32xf32>, vector<3x32xf32> -> vector<6x32xf32>
      %c0_61 = arith.constant 0 : index
      %c0_62 = arith.constant 0 : index
      %137 = vector.load %arg18[%c0_61, %c0_62] : memref<6x32xf32, #tpu.memory_space<vmem>>, vector<6x32xf32>
      tpu.vector_store %arg18[%c0_61, %c0_62], %136 {strides = array<i32>} : memref<6x32xf32, #tpu.memory_space<vmem>>, vector<6x32xf32>,
      %c0_63 = arith.constant 0 : index
      %c0_64 = arith.constant 0 : index
      %c0_65 = arith.constant 0 : index
      %138 = vector.load %arg3[%c0_63, %c0_64, %c0_65] : memref<2x1x32xf32, #tpu.memory_space<vmem>>, vector<2x1x32xf32>
      %139 = vector.shape_cast %138 : vector<2x1x32xf32> to vector<2x1x32xf32>
      %140 = vector.broadcast %139 : vector<2x1x32xf32> to vector<2x3x32xf32>
      %141 = vector.shape_cast %140 : vector<2x3x32xf32> to vector<6x32xf32>
      %c0_66 = arith.constant 0 : index
      %c0_67 = arith.constant 0 : index
      %142 = vector.load %arg19[%c0_66, %c0_67] : memref<6x32xf32, #tpu.memory_space<vmem>>, vector<6x32xf32>
      tpu.vector_store %arg19[%c0_66, %c0_67], %141 {strides = array<i32>} : memref<6x32xf32, #tpu.memory_space<vmem>>, vector<6x32xf32>,
      %c0_68 = arith.constant 0 : index
      %c0_69 = arith.constant 0 : index
      %c0_70 = arith.constant 0 : index
      %143 = vector.load %arg5[%c0_68, %c0_69, %c0_70] : memref<2x8x1xi32, #tpu.memory_space<vmem>>, vector<2x8x1xi32>
      %144 = tpu.iota {dimensions = array<i32: 2>} : vector<2x8x128xi32>
      %145 = vector.broadcast %143 : vector<2x8x1xi32> to vector<2x8x128xi32>
      %146 = arith.cmpi eq, %145, %144 : vector<2x8x128xi32>
      %147 = arith.extui %146 : vector<2x8x128xi1> to vector<2x8x128xi32>
      %148 = arith.sitofp %147 : vector<2x8x128xi32> to vector<2x8x128xf32>
      %149 = arith.truncf %148 : vector<2x8x128xf32> to vector<2x8x128xbf16>
      %c0_71 = arith.constant 0 : index
      %c0_72 = arith.constant 0 : index
      %c0_73 = arith.constant 0 : index
      %150 = vector.load %arg20[%c0_71, %c0_72, %c0_73] : memref<2x8x128xbf16, #tpu.memory_space<vmem>>, vector<2x8x128xbf16>
      tpu.vector_store %arg20[%c0_71, %c0_72, %c0_73], %149 {strides = array<i32>} : memref<2x8x128xbf16, #tpu.memory_space<vmem>>, vector<2x8x128xbf16>,
    } else {
    }
    %c0 = arith.constant 0 : index
    %c0_1 = arith.constant 0 : index
    %3 = vector.load %arg18[%c0, %c0_1] : memref<6x32xf32, #tpu.memory_space<vmem>>, vector<6x32xf32>
    %c0_2 = arith.constant 0 : index
    %c0_3 = arith.constant 0 : index
    %4 = vector.load %arg19[%c0_2, %c0_3] : memref<6x32xf32, #tpu.memory_space<vmem>>, vector<6x32xf32>
    %c0_4 = arith.constant 0 : index
    %c0_5 = arith.constant 0 : index
    %c0_6 = arith.constant 0 : index
    %5 = vector.load %arg4[%c0_4, %c0_5, %c0_6] : memref<2x8x32xbf16, #tpu.memory_space<vmem>>, vector<2x8x32xbf16>
    %c0_7 = arith.constant 0 : index
    %c0_8 = arith.constant 0 : index
    %6 = vector.load %arg7[%c0_7, %c0_8] : memref<128x32xbf16, #tpu.memory_space<vmem>>, vector<128x32xbf16>
    %7 = arith.truncf %3 : vector<6x32xf32> to vector<6x32xbf16>
    %8 = arith.truncf %4 : vector<6x32xf32> to vector<6x32xbf16>
    %c0_9 = arith.constant 0 : index
    %c0_10 = arith.constant 0 : index
    %9 = vector.load %arg8[%c0_9, %c0_10] : memref<32x96xbf16, #tpu.memory_space<vmem>>, vector<32x96xbf16>
    %cst = arith.constant dense<0.000000e+00> : vector<6x96xf32>
    %10 = tpu.matmul %7, %9, %cst {dimension_numbers = #tpu.dot_dimension_numbers<[1], [0], [0], [1], [0, 0, 1, 1], [], []>} : vector<6x32xbf16>, vector<32x96xbf16>, vector<6x96xf32> -> vector<6x96xf32>
    %c0_11 = arith.constant 0 : index
    %c0_12 = arith.constant 0 : index
    %11 = vector.load %arg10[%c0_11, %c0_12] : memref<1x96xf32, #tpu.memory_space<vmem>>, vector<1x96xf32>
    %12 = vector.broadcast %11 : vector<1x96xf32> to vector<6x96xf32>
    %13 = arith.addf %10, %12 : vector<6x96xf32>
    %c0_13 = arith.constant 0 : index
    %c0_14 = arith.constant 0 : index
    %14 = vector.load %arg9[%c0_13, %c0_14] : memref<32x96xbf16, #tpu.memory_space<vmem>>, vector<32x96xbf16>
    %cst_15 = arith.constant dense<0.000000e+00> : vector<6x96xf32>
    %15 = tpu.matmul %8, %14, %cst_15 {dimension_numbers = #tpu.dot_dimension_numbers<[1], [0], [0], [1], [0, 0, 1, 1], [], []>} : vector<6x32xbf16>, vector<32x96xbf16>, vector<6x96xf32> -> vector<6x96xf32>
    %16 = vector.extract_strided_slice %13 {offsets = [0, 0], sizes = [6, 32], strides = [1, 1]} : vector<6x96xf32> to vector<6x32xf32>
    %17 = vector.extract_strided_slice %15 {offsets = [0, 0], sizes = [6, 32], strides = [1, 1]} : vector<6x96xf32> to vector<6x32xf32>
    %18 = arith.addf %16, %17 : vector<6x32xf32>
    %19 = arith.negf %18 : vector<6x32xf32>
    %20 = math.exp %19 : vector<6x32xf32>
    %cst_16 = arith.constant 1.000000e+00 : f32
    %21 = vector.broadcast %cst_16 : f32 to vector<6x32xf32>
    %22 = arith.addf %21, %20 : vector<6x32xf32>
    %23 = arith.divf %21, %22 : vector<6x32xf32>
    %24 = vector.extract_strided_slice %13 {offsets = [0, 32], sizes = [6, 32], strides = [1, 1]} : vector<6x96xf32> to vector<6x32xf32>
    %25 = vector.extract_strided_slice %15 {offsets = [0, 32], sizes = [6, 32], strides = [1, 1]} : vector<6x96xf32> to vector<6x32xf32>
    %26 = arith.addf %24, %25 : vector<6x32xf32>
    %27 = arith.negf %26 : vector<6x32xf32>
    %28 = math.exp %27 : vector<6x32xf32>
    %cst_17 = arith.constant 1.000000e+00 : f32
    %29 = vector.broadcast %cst_17 : f32 to vector<6x32xf32>
    %30 = arith.addf %29, %28 : vector<6x32xf32>
    %31 = arith.divf %29, %30 : vector<6x32xf32>
    %32 = vector.extract_strided_slice %13 {offsets = [0, 64], sizes = [6, 32], strides = [1, 1]} : vector<6x96xf32> to vector<6x32xf32>
    %33 = vector.extract_strided_slice %15 {offsets = [0, 64], sizes = [6, 32], strides = [1, 1]} : vector<6x96xf32> to vector<6x32xf32>
    %c0_18 = arith.constant 0 : index
    %c0_19 = arith.constant 0 : index
    %34 = vector.load %arg11[%c0_18, %c0_19] : memref<1x32xf32, #tpu.memory_space<vmem>>, vector<1x32xf32>
    %35 = vector.broadcast %34 : vector<1x32xf32> to vector<6x32xf32>
    %36 = arith.addf %33, %35 : vector<6x32xf32>
    %37 = arith.mulf %23, %36 : vector<6x32xf32>
    %38 = arith.addf %32, %37 : vector<6x32xf32>
    %39 = math.tanh %38 : vector<6x32xf32>
    %cst_20 = arith.constant 1.000000e+00 : f32
    %40 = vector.broadcast %cst_20 : f32 to vector<6x32xf32>
    %41 = arith.subf %40, %31 : vector<6x32xf32>
    %42 = arith.mulf %41, %39 : vector<6x32xf32>
    %43 = arith.mulf %31, %4 : vector<6x32xf32>
    %44 = arith.addf %42, %43 : vector<6x32xf32>
    %45 = arith.truncf %44 : vector<6x32xf32> to vector<6x32xbf16>
    %46 = vector.shape_cast %45 : vector<6x32xbf16> to vector<2x3x32xbf16>
    %cst_21 = arith.constant dense<0.000000e+00> : vector<2x3x8xf32>
    %47 = tpu.matmul %46, %5, %cst_21 {dimension_numbers = #tpu.dot_dimension_numbers<[2], [2], [1], [1], [0, 0, 0, 1, 1, 1], [0], [0]>} : vector<2x3x32xbf16>, vector<2x8x32xbf16>, vector<2x3x8xf32> -> vector<2x3x8xf32>
    %c0_22 = arith.constant 0 : index
    %c0_23 = arith.constant 0 : index
    %c0_24 = arith.constant 0 : index
    %48 = vector.load %arg6[%c0_22, %c0_23, %c0_24] : memref<2x1x8xf32, #tpu.memory_space<vmem>>, vector<2x1x8xf32>
    %49 = vector.broadcast %48 : vector<2x1x8xf32> to vector<2x3x8xf32>
    %50 = arith.addf %47, %49 : vector<2x3x8xf32>
    %cst_25 = arith.constant dense<0xFF800000> : vector<2x3xf32>
    %51 = vector.multi_reduction <maximumf>, %50, %cst_25 [2] : vector<2x3x8xf32> to vector<2x3xf32>
    %cst_26 = arith.constant 0xFF800000 : f32
    %52 = vector.broadcast %cst_26 : f32 to vector<2x3xf32>
    %53 = arith.maximumf %52, %51 : vector<2x3xf32>
    %54 = vector.shape_cast %53 : vector<2x3xf32> to vector<2x3x1xf32>
    %55 = vector.broadcast %54 : vector<2x3x1xf32> to vector<2x3x8xf32>
    %56 = arith.subf %50, %55 : vector<2x3x8xf32>
    %57 = math.exp %56 : vector<2x3x8xf32>
    %cst_27 = arith.constant dense<0.000000e+00> : vector<2x3xf32>
    %58 = vector.multi_reduction <add>, %57, %cst_27 [2] : vector<2x3x8xf32> to vector<2x3xf32>
    %59 = vector.shape_cast %58 : vector<2x3xf32> to vector<2x3x1xf32>
    %60 = vector.broadcast %59 : vector<2x3x1xf32> to vector<2x3x8xf32>
    %61 = arith.divf %57, %60 : vector<2x3x8xf32>
    %62 = arith.truncf %61 : vector<2x3x8xf32> to vector<2x3x8xbf16>
    %cst_28 = arith.constant dense<0.000000e+00> : vector<6x128xf32>
    %63 = tpu.matmul %45, %6, %cst_28 {dimension_numbers = #tpu.dot_dimension_numbers<[1], [1], [0], [0], [0, 0, 1, 0], [], []>} : vector<6x32xbf16>, vector<128x32xbf16>, vector<6x128xf32> -> vector<6x128xf32>
    %cst_29 = arith.constant dense<0xFF800000> : vector<6xf32>
    %64 = vector.multi_reduction <maximumf>, %63, %cst_29 [1] : vector<6x128xf32> to vector<6xf32>
    %cst_30 = arith.constant 0xFF800000 : f32
    %65 = vector.broadcast %cst_30 : f32 to vector<6xf32>
    %66 = arith.maximumf %65, %64 : vector<6xf32>
    %67 = vector.shape_cast %66 : vector<6xf32> to vector<6x1xf32>
    %68 = vector.broadcast %67 : vector<6x1xf32> to vector<6x128xf32>
    %69 = arith.subf %63, %68 : vector<6x128xf32>
    %70 = math.exp %69 : vector<6x128xf32>
    %cst_31 = arith.constant dense<0.000000e+00> : vector<6xf32>
    %71 = vector.multi_reduction <add>, %70, %cst_31 [1] : vector<6x128xf32> to vector<6xf32>
    %72 = vector.shape_cast %71 : vector<6xf32> to vector<6x1xf32>
    %73 = vector.broadcast %72 : vector<6x1xf32> to vector<6x128xf32>
    %74 = arith.divf %70, %73 : vector<6x128xf32>
    %cst_32 = arith.constant dense<0.000000e+00> : vector<2x3x32xf32>
    %75 = tpu.matmul %62, %5, %cst_32 {dimension_numbers = #tpu.dot_dimension_numbers<[2], [1], [1], [2], [0, 0, 0, 1, 1, 2], [0], [0]>} : vector<2x3x8xbf16>, vector<2x8x32xbf16>, vector<2x3x32xf32> -> vector<2x3x32xf32>
    %76 = vector.shape_cast %75 : vector<2x3x32xf32> to vector<6x32xf32>
    %c0_33 = arith.constant 0 : index
    %c0_34 = arith.constant 0 : index
    %77 = vector.load %arg12[%c0_33, %c0_34] : memref<1x96xf32, #tpu.memory_space<vmem>>, vector<1x96xf32>
    %78 = vector.extract_strided_slice %77 {offsets = [0, 0], sizes = [1, 32], strides = [1, 1]} : vector<1x96xf32> to vector<1x32xf32>
    %79 = vector.broadcast %78 : vector<1x32xf32> to vector<6x32xf32>
    %80 = arith.mulf %3, %79 : vector<6x32xf32>
    %cst_35 = arith.constant dense<0.000000e+00> : vector<6xf32>
    %81 = vector.multi_reduction <add>, %80, %cst_35 [1] : vector<6x32xf32> to vector<6xf32>
    %82 = vector.shape_cast %81 : vector<6xf32> to vector<6x1xf32>
    %83 = vector.extract_strided_slice %77 {offsets = [0, 32], sizes = [1, 32], strides = [1, 1]} : vector<1x96xf32> to vector<1x32xf32>
    %84 = vector.broadcast %83 : vector<1x32xf32> to vector<6x32xf32>
    %85 = arith.mulf %44, %84 : vector<6x32xf32>
    %cst_36 = arith.constant dense<0.000000e+00> : vector<6xf32>
    %86 = vector.multi_reduction <add>, %85, %cst_36 [1] : vector<6x32xf32> to vector<6xf32>
    %87 = vector.shape_cast %86 : vector<6xf32> to vector<6x1xf32>
    %88 = arith.addf %82, %87 : vector<6x1xf32>
    %89 = vector.extract_strided_slice %77 {offsets = [0, 64], sizes = [1, 32], strides = [1, 1]} : vector<1x96xf32> to vector<1x32xf32>
    %90 = vector.broadcast %89 : vector<1x32xf32> to vector<6x32xf32>
    %91 = arith.mulf %76, %90 : vector<6x32xf32>
    %cst_37 = arith.constant dense<0.000000e+00> : vector<6xf32>
    %92 = vector.multi_reduction <add>, %91, %cst_37 [1] : vector<6x32xf32> to vector<6xf32>
    %93 = vector.shape_cast %92 : vector<6xf32> to vector<6x1xf32>
    %94 = arith.addf %88, %93 : vector<6x1xf32>
    %c0_38 = arith.constant 0 : index
    %c0_39 = arith.constant 0 : index
    %95 = vector.load %arg13[%c0_38, %c0_39] : memref<1x1xf32, #tpu.memory_space<vmem>>, vector<1x1xf32>
    %96 = vector.broadcast %95 : vector<1x1xf32> to vector<6x1xf32>
    %97 = arith.addf %94, %96 : vector<6x1xf32>
    %98 = arith.negf %97 : vector<6x1xf32>
    %99 = math.exp %98 : vector<6x1xf32>
    %cst_40 = arith.constant 1.000000e+00 : f32
    %100 = vector.broadcast %cst_40 : f32 to vector<6x1xf32>
    %101 = arith.addf %100, %99 : vector<6x1xf32>
    %102 = arith.divf %100, %101 : vector<6x1xf32>
    %c0_41 = arith.constant 0 : index
    %c0_42 = arith.constant 0 : index
    %c0_43 = arith.constant 0 : index
    %103 = vector.load %arg20[%c0_41, %c0_42, %c0_43] : memref<2x8x128xbf16, #tpu.memory_space<vmem>>, vector<2x8x128xbf16>
    %cst_44 = arith.constant dense<0.000000e+00> : vector<2x3x128xf32>
    %104 = tpu.matmul %62, %103, %cst_44 {dimension_numbers = #tpu.dot_dimension_numbers<[2], [1], [1], [2], [0, 0, 0, 1, 1, 2], [0], [0]>} : vector<2x3x8xbf16>, vector<2x8x128xbf16>, vector<2x3x128xf32> -> vector<2x3x128xf32>
    %105 = vector.shape_cast %104 : vector<2x3x128xf32> to vector<6x128xf32>
    %106 = vector.broadcast %102 : vector<6x1xf32> to vector<6x128xf32>
    %107 = arith.mulf %106, %74 : vector<6x128xf32>
    %cst_45 = arith.constant 1.000000e+00 : f32
    %108 = vector.broadcast %cst_45 : f32 to vector<6x1xf32>
    %109 = arith.subf %108, %102 : vector<6x1xf32>
    %110 = vector.broadcast %109 : vector<6x1xf32> to vector<6x128xf32>
    %111 = arith.mulf %110, %105 : vector<6x128xf32>
    %112 = arith.addf %107, %111 : vector<6x128xf32>
    %113 = tpu.iota {dimensions = array<i32: 1>} : vector<6x128xi32>
    %cst_46 = arith.constant dense<0xFF800000> : vector<6xf32>
    %114 = vector.multi_reduction <maximumf>, %112, %cst_46 [1] : vector<6x128xf32> to vector<6xf32>
    %115 = vector.shape_cast %114 : vector<6xf32> to vector<6x1xf32>
    %116 = vector.broadcast %115 : vector<6x1xf32> to vector<6x128xf32>
    %117 = arith.cmpf oeq, %112, %116 : vector<6x128xf32>
    %c128_i32 = arith.constant 128 : i32
    %118 = vector.broadcast %c128_i32 : i32 to vector<6x128xi32>
    %119 = arith.select %117, %113, %118 : vector<6x128xi1>, vector<6x128xi32>
    %cst_47 = arith.constant dense<2147483647> : vector<6xi32>
    %120 = vector.multi_reduction <minsi>, %119, %cst_47 [1] : vector<6x128xi32> to vector<6xi32>
    %121 = vector.shape_cast %120 : vector<6xi32> to vector<6x1xi32>
    %122 = vector.broadcast %121 : vector<6x1xi32> to vector<6x128xi32>
    %123 = arith.cmpi eq, %113, %122 : vector<6x128xi32>
    %124 = arith.extui %123 : vector<6x128xi1> to vector<6x128xi32>
    %125 = arith.sitofp %124 : vector<6x128xi32> to vector<6x128xf32>
    %126 = arith.truncf %125 : vector<6x128xf32> to vector<6x128xbf16>
    %cst_48 = arith.constant dense<0.000000e+00> : vector<6x32xf32>
    %127 = tpu.matmul %126, %6, %cst_48 {dimension_numbers = #tpu.dot_dimension_numbers<[1], [0], [0], [1], [0, 0, 1, 1], [], []>} : vector<6x128xbf16>, vector<128x32xbf16>, vector<6x32xf32> -> vector<6x32xf32>
    %128 = vector.shape_cast %112 : vector<6x128xf32> to vector<2x1x3x128xf32>
    %c0_49 = arith.constant 0 : index
    %c0_50 = arith.constant 0 : index
    %c0_51 = arith.constant 0 : index
    %c0_52 = arith.constant 0 : index
    %129 = vector.load %arg16[%c0_49, %c0_50, %c0_51, %c0_52] : memref<2x1x3x128xf32, #tpu.memory_space<vmem>>, vector<2x1x3x128xf32>
    tpu.vector_store %arg16[%c0_49, %c0_50, %c0_51, %c0_52], %128 {strides = array<i32>} : memref<2x1x3x128xf32, #tpu.memory_space<vmem>>, vector<2x1x3x128xf32>,
    %c0_53 = arith.constant 0 : index
    %c0_54 = arith.constant 0 : index
    %130 = vector.load %arg18[%c0_53, %c0_54] : memref<6x32xf32, #tpu.memory_space<vmem>>, vector<6x32xf32>
    tpu.vector_store %arg18[%c0_53, %c0_54], %127 {strides = array<i32>} : memref<6x32xf32, #tpu.memory_space<vmem>>, vector<6x32xf32>,
    %c0_55 = arith.constant 0 : index
    %c0_56 = arith.constant 0 : index
    %131 = vector.load %arg19[%c0_55, %c0_56] : memref<6x32xf32, #tpu.memory_space<vmem>>, vector<6x32xf32>
    tpu.vector_store %arg19[%c0_55, %c0_56], %44 {strides = array<i32>} : memref<6x32xf32, #tpu.memory_space<vmem>>, vector<6x32xf32>,
    %c0_i32_57 = arith.constant 0 : i32
    %132 = arith.cmpi eq, %arg1, %c0_i32_57 : i32
    %133 = arith.extui %132 : i1 to i32
    %c0_i32_58 = arith.constant 0 : i32
    %134 = arith.cmpi ne, %133, %c0_i32_58 : i32
    scf.if %134 {
      %c0_59 = arith.constant 0 : index
      %c0_60 = arith.constant 0 : index
      %135 = vector.load %arg14[%c0_59, %c0_60] : memref<32x4xf32, #tpu.memory_space<vmem>>, vector<32x4xf32>
      %cst_61 = arith.constant dense<0.000000e+00> : vector<6x4xf32>
      %136 = tpu.matmul %76, %135, %cst_61 {dimension_numbers = #tpu.dot_dimension_numbers<[1], [0], [0], [1], [0, 0, 1, 1], [], []>} : vector<6x32xf32>, vector<32x4xf32>, vector<6x4xf32> -> vector<6x4xf32>
      %c0_62 = arith.constant 0 : index
      %c0_63 = arith.constant 0 : index
      %137 = vector.load %arg15[%c0_62, %c0_63] : memref<1x4xf32, #tpu.memory_space<vmem>>, vector<1x4xf32>
      %138 = vector.broadcast %137 : vector<1x4xf32> to vector<6x4xf32>
      %139 = arith.addf %136, %138 : vector<6x4xf32>
      %140 = vector.shape_cast %139 : vector<6x4xf32> to vector<2x3x4xf32>
      %c0_64 = arith.constant 0 : index
      %c0_65 = arith.constant 0 : index
      %c0_66 = arith.constant 0 : index
      %141 = vector.load %arg17[%c0_64, %c0_65, %c0_66] : memref<2x3x4xf32, #tpu.memory_space<vmem>>, vector<2x3x4xf32>
      tpu.vector_store %arg17[%c0_64, %c0_65, %c0_66], %140 {strides = array<i32>} : memref<2x3x4xf32, #tpu.memory_space<vmem>>, vector<2x3x4xf32>,
    } else {
    }
    return
  }
  func.func @transform_0(%arg0: i32, %arg1: i32) -> (i32, i32) {
    %c0_i32 = arith.constant 0 : i32
    %c0_i32_0 = arith.constant 0 : i32
    %c0_i32_1 = arith.constant 0 : i32
    return %c0_i32, %c0_i32_0 : i32, i32
  }
  func.func @transform_1(%arg0: i32, %arg1: i32) -> (i32, i32, i32) {
    %c0_i32 = arith.constant 0 : i32
    %c0_i32_0 = arith.constant 0 : i32
    %c0_i32_1 = arith.constant 0 : i32
    return %arg0, %c0_i32, %c0_i32_0 : i32, i32, i32
  }
  func.func @transform_2(%arg0: i32, %arg1: i32) -> (i32, i32, i32) {
    %c0_i32 = arith.constant 0 : i32
    %c0_i32_0 = arith.constant 0 : i32
    %c0_i32_1 = arith.constant 0 : i32
    return %arg0, %c0_i32, %c0_i32_0 : i32, i32, i32
  }
  func.func @transform_3(%arg0: i32, %arg1: i32) -> (i32, i32, i32) {
    %c0_i32 = arith.constant 0 : i32
    %c0_i32_0 = arith.constant 0 : i32
    %c0_i32_1 = arith.constant 0 : i32
    return %arg0, %c0_i32, %c0_i32_0 : i32, i32, i32
  }
  func.func @transform_4(%arg0: i32, %arg1: i32) -> (i32, i32, i32) {
    %c0_i32 = arith.constant 0 : i32
    %c0_i32_0 = arith.constant 0 : i32
    %c0_i32_1 = arith.constant 0 : i32
    return %arg0, %c0_i32, %c0_i32_0 : i32, i32, i32
  }
  func.func @transform_5(%arg0: i32, %arg1: i32) -> (i32, i32) {
    %c0_i32 = arith.constant 0 : i32
    %c0_i32_0 = arith.constant 0 : i32
    %c0_i32_1 = arith.constant 0 : i32
    return %c0_i32, %c0_i32_0 : i32, i32
  }
  func.func @transform_6(%arg0: i32, %arg1: i32) -> (i32, i32) {
    %c0_i32 = arith.constant 0 : i32
    %c0_i32_0 = arith.constant 0 : i32
    %c0_i32_1 = arith.constant 0 : i32
    return %c0_i32, %c0_i32_0 : i32, i32
  }
  func.func @transform_7(%arg0: i32, %arg1: i32) -> (i32, i32) {
    %c0_i32 = arith.constant 0 : i32
    %c0_i32_0 = arith.constant 0 : i32
    %c0_i32_1 = arith.constant 0 : i32
    return %c0_i32, %c0_i32_0 : i32, i32
  }
  func.func @transform_8(%arg0: i32, %arg1: i32) -> (i32, i32) {
    %c0_i32 = arith.constant 0 : i32
    %c0_i32_0 = arith.constant 0 : i32
    %c0_i32_1 = arith.constant 0 : i32
    return %c0_i32, %c0_i32_0 : i32, i32
  }
  func.func @transform_9(%arg0: i32, %arg1: i32) -> (i32, i32) {
    %c0_i32 = arith.constant 0 : i32
    %c0_i32_0 = arith.constant 0 : i32
    %c0_i32_1 = arith.constant 0 : i32
    return %c0_i32, %c0_i32_0 : i32, i32
  }
  func.func @transform_10(%arg0: i32, %arg1: i32) -> (i32, i32) {
    %c0_i32 = arith.constant 0 : i32
    %c0_i32_0 = arith.constant 0 : i32
    %c0_i32_1 = arith.constant 0 : i32
    return %c0_i32, %c0_i32_0 : i32, i32
  }
  func.func @transform_11(%arg0: i32, %arg1: i32) -> (i32, i32) {
    %c0_i32 = arith.constant 0 : i32
    %c0_i32_0 = arith.constant 0 : i32
    %c0_i32_1 = arith.constant 0 : i32
    return %c0_i32, %c0_i32_0 : i32, i32
  }
  func.func @transform_12(%arg0: i32, %arg1: i32) -> (i32, i32) {
    %c0_i32 = arith.constant 0 : i32
    %c0_i32_0 = arith.constant 0 : i32
    %c0_i32_1 = arith.constant 0 : i32
    return %c0_i32, %c0_i32_0 : i32, i32
  }
  func.func @transform_13(%arg0: i32, %arg1: i32) -> (i32, i32) {
    %c0_i32 = arith.constant 0 : i32
    %c0_i32_0 = arith.constant 0 : i32
    %c0_i32_1 = arith.constant 0 : i32
    return %c0_i32, %c0_i32_0 : i32, i32
  }
  func.func @transform_14(%arg0: i32, %arg1: i32) -> (i32, i32, i32, i32) {
    %c0_i32 = arith.constant 0 : i32
    %c0_i32_0 = arith.constant 0 : i32
    %c0_i32_1 = arith.constant 0 : i32
    return %arg0, %arg1, %c0_i32, %c0_i32_0 : i32, i32, i32, i32
  }
  func.func @transform_15(%arg0: i32, %arg1: i32) -> (i32, i32, i32) {
    %c0_i32 = arith.constant 0 : i32
    %c0_i32_0 = arith.constant 0 : i32
    %c0_i32_1 = arith.constant 0 : i32
    return %arg0, %c0_i32, %c0_i32_0 : i32, i32, i32
  }
}

module attributes {stable_mosaic.version = 11 : i64} {
  func.func @_slot_decoder_kernel(%arg0: i32, %arg1: i32, %arg2: memref<3x32xf32, #tpu.memory_space<vmem>>, %arg3: memref<2x1x32xf32, #tpu.memory_space<vmem>>, %arg4: memref<2x8x32xbf16, #tpu.memory_space<vmem>>, %arg5: memref<2x8x1xi32, #tpu.memory_space<vmem>>, %arg6: memref<2x1x8xf32, #tpu.memory_space<vmem>>, %arg7: memref<128x32xbf16, #tpu.memory_space<vmem>>, %arg8: memref<32x96xbf16, #tpu.memory_space<vmem>>, %arg9: memref<32x96xbf16, #tpu.memory_space<vmem>>, %arg10: memref<1x96xf32, #tpu.memory_space<vmem>>, %arg11: memref<1x32xf32, #tpu.memory_space<vmem>>, %arg12: memref<1x96xf32, #tpu.memory_space<vmem>>, %arg13: memref<1x1xf32, #tpu.memory_space<vmem>>, %arg14: memref<32x4xf32, #tpu.memory_space<vmem>>, %arg15: memref<1x4xf32, #tpu.memory_space<vmem>>, %arg16: memref<2x1x3x128xf32, #tpu.memory_space<vmem>>, %arg17: memref<2x3x4xf32, #tpu.memory_space<vmem>>, %arg18: memref<6x32xf32, #tpu.memory_space<vmem>>, %arg19: memref<6x32xf32, #tpu.memory_space<vmem>>, %arg20: memref<2x8x128xbf16, #tpu.memory_space<vmem>>) attributes {dimension_semantics = [#tpu.dimension_semantics<parallel>, #tpu.dimension_semantics<arbitrary>], iteration_bounds = array<i64: 1, 4>, scalar_prefetch = 0 : i64, scratch_operands = 3 : i64, tpu.core_type = #tpu.core_type<tc>, window_params = [{pipeline_mode = #tpu.pipeline_mode<synchronous>, transform_indices = @transform_0, window_bounds = array<i64: 3, 32>}, {transform_indices = @transform_1, window_bounds = array<i64: 2, 1, 32>}, {transform_indices = @transform_2, window_bounds = array<i64: 2, 8, 32>}, {transform_indices = @transform_3, window_bounds = array<i64: 2, 8, 1>}, {transform_indices = @transform_4, window_bounds = array<i64: 2, 1, 8>}, {pipeline_mode = #tpu.pipeline_mode<synchronous>, transform_indices = @transform_5, window_bounds = array<i64: 128, 32>}, {pipeline_mode = #tpu.pipeline_mode<synchronous>, transform_indices = @transform_6, window_bounds = array<i64: 32, 96>}, {pipeline_mode = #tpu.pipeline_mode<synchronous>, transform_indices = @transform_7, window_bounds = array<i64: 32, 96>}, {pipeline_mode = #tpu.pipeline_mode<synchronous>, transform_indices = @transform_8, window_bounds = array<i64: 1, 96>}, {pipeline_mode = #tpu.pipeline_mode<synchronous>, transform_indices = @transform_9, window_bounds = array<i64: 1, 32>}, {pipeline_mode = #tpu.pipeline_mode<synchronous>, transform_indices = @transform_10, window_bounds = array<i64: 1, 96>}, {pipeline_mode = #tpu.pipeline_mode<synchronous>, transform_indices = @transform_11, window_bounds = array<i64: 1, 1>}, {pipeline_mode = #tpu.pipeline_mode<synchronous>, transform_indices = @transform_12, window_bounds = array<i64: 32, 4>}, {pipeline_mode = #tpu.pipeline_mode<synchronous>, transform_indices = @transform_13, window_bounds = array<i64: 1, 4>}, {transform_indices = @transform_14, window_bounds = array<i64: 2, 1, 3, 128>}, {transform_indices = @transform_15, window_bounds = array<i64: 2, 3, 4>}]} {
    %c0_i32 = arith.constant 0 : i32
    %0 = arith.cmpi eq, %arg1, %c0_i32 : i32
    %1 = arith.extui %0 : i1 to i32
    %c0_i32_0 = arith.constant 0 : i32
    %2 = arith.cmpi ne, %1, %c0_i32_0 : i32
    scf.if %2 {
      %c0_59 = arith.constant 0 : index
      %c0_60 = arith.constant 0 : index
      %135 = vector.load %arg2[%c0_59, %c0_60] : memref<3x32xf32, #tpu.memory_space<vmem>>, vector<3x32xf32>
      %136 = tpu.concatenate %135, %135 in 0 : vector<3x32xf32>, vector<3x32xf32> -> vector<6x32xf32>
      %c0_61 = arith.constant 0 : index
      %c0_62 = arith.constant 0 : index
      %137 = vector.load %arg18[%c0_61, %c0_62] : memref<6x32xf32, #tpu.memory_space<vmem>>, vector<6x32xf32>
      tpu.vector_store %arg18[%c0_61, %c0_62], %136 {strides = array<i32>} : memref<6x32xf32, #tpu.memory_space<vmem>>, vector<6x32xf32>,
      %c0_63 = arith.constant 0 : index
      %c0_64 = arith.constant 0 : index
      %c0_65 = arith.constant 0 : index
      %138 = vector.load %arg3[%c0_63, %c0_64, %c0_65] : memref<2x1x32xf32, #tpu.memory_space<vmem>>, vector<2x1x32xf32>
      %139 = vector.shape_cast %138 : vector<2x1x32xf32> to vector<2x1x32xf32>
      %140 = vector.broadcast %139 : vector<2x1x32xf32> to vector<2x3x32xf32>
      %141 = vector.shape_cast %140 : vector<2x3x32xf32> to vector<6x32xf32>
      %c0_66 = arith.constant 0 : index
      %c0_67 = arith.constant 0 : index
      %142 = vector.load %arg19[%c0_66, %c0_67] : memref<6x32xf32, #tpu.memory_space<vmem>>, vector<6x32xf32>
      tpu.vector_store %arg19[%c0_66, %c0_67], %141 {strides = array<i32>} : memref<6x32xf32, #tpu.memory_space<vmem>>, vector<6x32xf32>,
      %c0_68 = arith.constant 0 : index
      %c0_69 = arith.constant 0 : index
      %c0_70 = arith.constant 0 : index
      %143 = vector.load %arg5[%c0_68, %c0_69, %c0_70] : memref<2x8x1xi32, #tpu.memory_space<vmem>>, vector<2x8x1xi32>
      %144 = tpu.iota {dimensions = array<i32: 2>} : vector<2x8x128xi32>
      %145 = vector.broadcast %143 : vector<2x8x1xi32> to vector<2x8x128xi32>
      %146 = arith.cmpi eq, %145, %144 : vector<2x8x128xi32>
      %147 = arith.extui %146 : vector<2x8x128xi1> to vector<2x8x128xi32>
      %148 = arith.sitofp %147 : vector<2x8x128xi32> to vector<2x8x128xf32>
      %149 = arith.truncf %148 : vector<2x8x128xf32> to vector<2x8x128xbf16>
      %c0_71 = arith.constant 0 : index
      %c0_72 = arith.constant 0 : index
      %c0_73 = arith.constant 0 : index
      %150 = vector.load %arg20[%c0_71, %c0_72, %c0_73] : memref<2x8x128xbf16, #tpu.memory_space<vmem>>, vector<2x8x128xbf16>
      tpu.vector_store %arg20[%c0_71, %c0_72, %c0_73], %149 {strides = array<i32>} : memref<2x8x128xbf16, #tpu.memory_space<vmem>>, vector<2x8x128xbf16>,
    } else {
    }
    %c0 = arith.constant 0 : index
    %c0_1 = arith.constant 0 : index
    %3 = vector.load %arg18[%c0, %c0_1] : memref<6x32xf32, #tpu.memory_space<vmem>>, vector<6x32xf32>
    %c0_2 = arith.constant 0 : index
    %c0_3 = arith.constant 0 : index
    %4 = vector.load %arg19[%c0_2, %c0_3] : memref<6x32xf32, #tpu.memory_space<vmem>>, vector<6x32xf32>
    %c0_4 = arith.constant 0 : index
    %c0_5 = arith.constant 0 : index
    %c0_6 = arith.constant 0 : index
    %5 = vector.load %arg4[%c0_4, %c0_5, %c0_6] : memref<2x8x32xbf16, #tpu.memory_space<vmem>>, vector<2x8x32xbf16>
    %c0_7 = arith.constant 0 : index
    %c0_8 = arith.constant 0 : index
    %6 = vector.load %arg7[%c0_7, %c0_8] : memref<128x32xbf16, #tpu.memory_space<vmem>>, vector<128x32xbf16>
    %7 = arith.truncf %3 : vector<6x32xf32> to vector<6x32xbf16>
    %8 = arith.truncf %4 : vector<6x32xf32> to vector<6x32xbf16>
    %c0_9 = arith.constant 0 : index
    %c0_10 = arith.constant 0 : index
    %9 = vector.load %arg8[%c0_9, %c0_10] : memref<32x96xbf16, #tpu.memory_space<vmem>>, vector<32x96xbf16>
    %cst = arith.constant dense<0.000000e+00> : vector<6x96xf32>
    %10 = tpu.matmul %7, %9, %cst {dimension_numbers = #tpu.dot_dimension_numbers<[1], [0], [0], [1], [0, 0, 1, 1], [], []>} : vector<6x32xbf16>, vector<32x96xbf16>, vector<6x96xf32> -> vector<6x96xf32>
    %c0_11 = arith.constant 0 : index
    %c0_12 = arith.constant 0 : index
    %11 = vector.load %arg10[%c0_11, %c0_12] : memref<1x96xf32, #tpu.memory_space<vmem>>, vector<1x96xf32>
    %12 = vector.broadcast %11 : vector<1x96xf32> to vector<6x96xf32>
    %13 = arith.addf %10, %12 : vector<6x96xf32>
    %c0_13 = arith.constant 0 : index
    %c0_14 = arith.constant 0 : index
    %14 = vector.load %arg9[%c0_13, %c0_14] : memref<32x96xbf16, #tpu.memory_space<vmem>>, vector<32x96xbf16>
    %cst_15 = arith.constant dense<0.000000e+00> : vector<6x96xf32>
    %15 = tpu.matmul %8, %14, %cst_15 {dimension_numbers = #tpu.dot_dimension_numbers<[1], [0], [0], [1], [0, 0, 1, 1], [], []>} : vector<6x32xbf16>, vector<32x96xbf16>, vector<6x96xf32> -> vector<6x96xf32>
    %16 = vector.extract_strided_slice %13 {offsets = [0, 0], sizes = [6, 32], strides = [1, 1]} : vector<6x96xf32> to vector<6x32xf32>
    %17 = vector.extract_strided_slice %15 {offsets = [0, 0], sizes = [6, 32], strides = [1, 1]} : vector<6x96xf32> to vector<6x32xf32>
    %18 = arith.addf %16, %17 : vector<6x32xf32>
    %19 = arith.negf %18 : vector<6x32xf32>
    %20 = math.exp %19 : vector<6x32xf32>
    %cst_16 = arith.constant 1.000000e+00 : f32
    %21 = vector.broadcast %cst_16 : f32 to vector<6x32xf32>
    %22 = arith.addf %21, %20 : vector<6x32xf32>
    %23 = arith.divf %21, %22 : vector<6x32xf32>
    %24 = vector.extract_strided_slice %13 {offsets = [0, 32], sizes = [6, 32], strides = [1, 1]} : vector<6x96xf32> to vector<6x32xf32>
    %25 = vector.extract_strided_slice %15 {offsets = [0, 32], sizes = [6, 32], strides = [1, 1]} : vector<6x96xf32> to vector<6x32xf32>
    %26 = arith.addf %24, %25 : vector<6x32xf32>
    %27 = arith.negf %26 : vector<6x32xf32>
    %28 = math.exp %27 : vector<6x32xf32>
    %cst_17 = arith.constant 1.000000e+00 : f32
    %29 = vector.broadcast %cst_17 : f32 to vector<6x32xf32>
    %30 = arith.addf %29, %28 : vector<6x32xf32>
    %31 = arith.divf %29, %30 : vector<6x32xf32>
    %32 = vector.extract_strided_slice %13 {offsets = [0, 64], sizes = [6, 32], strides = [1, 1]} : vector<6x96xf32> to vector<6x32xf32>
    %33 = vector.extract_strided_slice %15 {offsets = [0, 64], sizes = [6, 32], strides = [1, 1]} : vector<6x96xf32> to vector<6x32xf32>
    %c0_18 = arith.constant 0 : index
    %c0_19 = arith.constant 0 : index
    %34 = vector.load %arg11[%c0_18, %c0_19] : memref<1x32xf32, #tpu.memory_space<vmem>>, vector<1x32xf32>
    %35 = vector.broadcast %34 : vector<1x32xf32> to vector<6x32xf32>
    %36 = arith.addf %33, %35 : vector<6x32xf32>
    %37 = arith.mulf %23, %36 : vector<6x32xf32>
    %38 = arith.addf %32, %37 : vector<6x32xf32>
    %39 = math.tanh %38 : vector<6x32xf32>
    %cst_20 = arith.constant 1.000000e+00 : f32
    %40 = vector.broadcast %cst_20 : f32 to vector<6x32xf32>
    %41 = arith.subf %40, %31 : vector<6x32xf32>
    %42 = arith.mulf %41, %39 : vector<6x32xf32>
    %43 = arith.mulf %31, %4 : vector<6x32xf32>
    %44 = arith.addf %42, %43 : vector<6x32xf32>
    %45 = arith.truncf %44 : vector<6x32xf32> to vector<6x32xbf16>
    %46 = vector.shape_cast %45 : vector<6x32xbf16> to vector<2x3x32xbf16>
    %cst_21 = arith.constant dense<0.000000e+00> : vector<2x3x8xf32>
    %47 = tpu.matmul %46, %5, %cst_21 {dimension_numbers = #tpu.dot_dimension_numbers<[2], [2], [1], [1], [0, 0, 0, 1, 1, 1], [0], [0]>} : vector<2x3x32xbf16>, vector<2x8x32xbf16>, vector<2x3x8xf32> -> vector<2x3x8xf32>
    %c0_22 = arith.constant 0 : index
    %c0_23 = arith.constant 0 : index
    %c0_24 = arith.constant 0 : index
    %48 = vector.load %arg6[%c0_22, %c0_23, %c0_24] : memref<2x1x8xf32, #tpu.memory_space<vmem>>, vector<2x1x8xf32>
    %49 = vector.broadcast %48 : vector<2x1x8xf32> to vector<2x3x8xf32>
    %50 = arith.addf %47, %49 : vector<2x3x8xf32>
    %cst_25 = arith.constant dense<0xFF800000> : vector<2x3xf32>
    %51 = vector.multi_reduction <maximumf>, %50, %cst_25 [2] : vector<2x3x8xf32> to vector<2x3xf32>
    %cst_26 = arith.constant 0xFF800000 : f32
    %52 = vector.broadcast %cst_26 : f32 to vector<2x3xf32>
    %53 = arith.maximumf %52, %51 : vector<2x3xf32>
    %54 = vector.shape_cast %53 : vector<2x3xf32> to vector<2x3x1xf32>
    %55 = vector.broadcast %54 : vector<2x3x1xf32> to vector<2x3x8xf32>
    %56 = arith.subf %50, %55 : vector<2x3x8xf32>
    %57 = math.exp %56 : vector<2x3x8xf32>
    %cst_27 = arith.constant dense<0.000000e+00> : vector<2x3xf32>
    %58 = vector.multi_reduction <add>, %57, %cst_27 [2] : vector<2x3x8xf32> to vector<2x3xf32>
    %59 = vector.shape_cast %58 : vector<2x3xf32> to vector<2x3x1xf32>
    %60 = vector.broadcast %59 : vector<2x3x1xf32> to vector<2x3x8xf32>
    %61 = arith.divf %57, %60 : vector<2x3x8xf32>
    %62 = arith.truncf %61 : vector<2x3x8xf32> to vector<2x3x8xbf16>
    %cst_28 = arith.constant dense<0.000000e+00> : vector<6x128xf32>
    %63 = tpu.matmul %45, %6, %cst_28 {dimension_numbers = #tpu.dot_dimension_numbers<[1], [1], [0], [0], [0, 0, 1, 0], [], []>} : vector<6x32xbf16>, vector<128x32xbf16>, vector<6x128xf32> -> vector<6x128xf32>
    %cst_29 = arith.constant dense<0xFF800000> : vector<6xf32>
    %64 = vector.multi_reduction <maximumf>, %63, %cst_29 [1] : vector<6x128xf32> to vector<6xf32>
    %cst_30 = arith.constant 0xFF800000 : f32
    %65 = vector.broadcast %cst_30 : f32 to vector<6xf32>
    %66 = arith.maximumf %65, %64 : vector<6xf32>
    %67 = vector.shape_cast %66 : vector<6xf32> to vector<6x1xf32>
    %68 = vector.broadcast %67 : vector<6x1xf32> to vector<6x128xf32>
    %69 = arith.subf %63, %68 : vector<6x128xf32>
    %70 = math.exp %69 : vector<6x128xf32>
    %cst_31 = arith.constant dense<0.000000e+00> : vector<6xf32>
    %71 = vector.multi_reduction <add>, %70, %cst_31 [1] : vector<6x128xf32> to vector<6xf32>
    %72 = vector.shape_cast %71 : vector<6xf32> to vector<6x1xf32>
    %73 = vector.broadcast %72 : vector<6x1xf32> to vector<6x128xf32>
    %74 = arith.divf %70, %73 : vector<6x128xf32>
    %cst_32 = arith.constant dense<0.000000e+00> : vector<2x3x32xf32>
    %75 = tpu.matmul %62, %5, %cst_32 {dimension_numbers = #tpu.dot_dimension_numbers<[2], [1], [1], [2], [0, 0, 0, 1, 1, 2], [0], [0]>} : vector<2x3x8xbf16>, vector<2x8x32xbf16>, vector<2x3x32xf32> -> vector<2x3x32xf32>
    %76 = vector.shape_cast %75 : vector<2x3x32xf32> to vector<6x32xf32>
    %c0_33 = arith.constant 0 : index
    %c0_34 = arith.constant 0 : index
    %77 = vector.load %arg12[%c0_33, %c0_34] : memref<1x96xf32, #tpu.memory_space<vmem>>, vector<1x96xf32>
    %78 = vector.extract_strided_slice %77 {offsets = [0, 0], sizes = [1, 32], strides = [1, 1]} : vector<1x96xf32> to vector<1x32xf32>
    %79 = vector.broadcast %78 : vector<1x32xf32> to vector<6x32xf32>
    %80 = arith.mulf %3, %79 : vector<6x32xf32>
    %cst_35 = arith.constant dense<0.000000e+00> : vector<6xf32>
    %81 = vector.multi_reduction <add>, %80, %cst_35 [1] : vector<6x32xf32> to vector<6xf32>
    %82 = vector.shape_cast %81 : vector<6xf32> to vector<6x1xf32>
    %83 = vector.extract_strided_slice %77 {offsets = [0, 32], sizes = [1, 32], strides = [1, 1]} : vector<1x96xf32> to vector<1x32xf32>
    %84 = vector.broadcast %83 : vector<1x32xf32> to vector<6x32xf32>
    %85 = arith.mulf %44, %84 : vector<6x32xf32>
    %cst_36 = arith.constant dense<0.000000e+00> : vector<6xf32>
    %86 = vector.multi_reduction <add>, %85, %cst_36 [1] : vector<6x32xf32> to vector<6xf32>
    %87 = vector.shape_cast %86 : vector<6xf32> to vector<6x1xf32>
    %88 = arith.addf %82, %87 : vector<6x1xf32>
    %89 = vector.extract_strided_slice %77 {offsets = [0, 64], sizes = [1, 32], strides = [1, 1]} : vector<1x96xf32> to vector<1x32xf32>
    %90 = vector.broadcast %89 : vector<1x32xf32> to vector<6x32xf32>
    %91 = arith.mulf %76, %90 : vector<6x32xf32>
    %cst_37 = arith.constant dense<0.000000e+00> : vector<6xf32>
    %92 = vector.multi_reduction <add>, %91, %cst_37 [1] : vector<6x32xf32> to vector<6xf32>
    %93 = vector.shape_cast %92 : vector<6xf32> to vector<6x1xf32>
    %94 = arith.addf %88, %93 : vector<6x1xf32>
    %c0_38 = arith.constant 0 : index
    %c0_39 = arith.constant 0 : index
    %95 = vector.load %arg13[%c0_38, %c0_39] : memref<1x1xf32, #tpu.memory_space<vmem>>, vector<1x1xf32>
    %96 = vector.broadcast %95 : vector<1x1xf32> to vector<6x1xf32>
    %97 = arith.addf %94, %96 : vector<6x1xf32>
    %98 = arith.negf %97 : vector<6x1xf32>
    %99 = math.exp %98 : vector<6x1xf32>
    %cst_40 = arith.constant 1.000000e+00 : f32
    %100 = vector.broadcast %cst_40 : f32 to vector<6x1xf32>
    %101 = arith.addf %100, %99 : vector<6x1xf32>
    %102 = arith.divf %100, %101 : vector<6x1xf32>
    %c0_41 = arith.constant 0 : index
    %c0_42 = arith.constant 0 : index
    %c0_43 = arith.constant 0 : index
    %103 = vector.load %arg20[%c0_41, %c0_42, %c0_43] : memref<2x8x128xbf16, #tpu.memory_space<vmem>>, vector<2x8x128xbf16>
    %cst_44 = arith.constant dense<0.000000e+00> : vector<2x3x128xf32>
    %104 = tpu.matmul %62, %103, %cst_44 {dimension_numbers = #tpu.dot_dimension_numbers<[2], [1], [1], [2], [0, 0, 0, 1, 1, 2], [0], [0]>} : vector<2x3x8xbf16>, vector<2x8x128xbf16>, vector<2x3x128xf32> -> vector<2x3x128xf32>
    %105 = vector.shape_cast %104 : vector<2x3x128xf32> to vector<6x128xf32>
    %106 = vector.broadcast %102 : vector<6x1xf32> to vector<6x128xf32>
    %107 = arith.mulf %106, %74 : vector<6x128xf32>
    %cst_45 = arith.constant 1.000000e+00 : f32
    %108 = vector.broadcast %cst_45 : f32 to vector<6x1xf32>
    %109 = arith.subf %108, %102 : vector<6x1xf32>
    %110 = vector.broadcast %109 : vector<6x1xf32> to vector<6x128xf32>
    %111 = arith.mulf %110, %105 : vector<6x128xf32>
    %112 = arith.addf %107, %111 : vector<6x128xf32>
    %113 = tpu.iota {dimensions = array<i32: 1>} : vector<6x128xi32>
    %cst_46 = arith.constant dense<0xFF800000> : vector<6xf32>
    %114 = vector.multi_reduction <maximumf>, %112, %cst_46 [1] : vector<6x128xf32> to vector<6xf32>
    %115 = vector.shape_cast %114 : vector<6xf32> to vector<6x1xf32>
    %116 = vector.broadcast %115 : vector<6x1xf32> to vector<6x128xf32>
    %117 = arith.cmpf oeq, %112, %116 : vector<6x128xf32>
    %c128_i32 = arith.constant 128 : i32
    %118 = vector.broadcast %c128_i32 : i32 to vector<6x128xi32>
    %119 = arith.select %117, %113, %118 : vector<6x128xi1>, vector<6x128xi32>
    %cst_47 = arith.constant dense<2147483647> : vector<6xi32>
    %120 = vector.multi_reduction <minsi>, %119, %cst_47 [1] : vector<6x128xi32> to vector<6xi32>
    %121 = vector.shape_cast %120 : vector<6xi32> to vector<6x1xi32>
    %122 = vector.broadcast %121 : vector<6x1xi32> to vector<6x128xi32>
    %123 = arith.cmpi eq, %113, %122 : vector<6x128xi32>
    %124 = arith.extui %123 : vector<6x128xi1> to vector<6x128xi32>
    %125 = arith.sitofp %124 : vector<6x128xi32> to vector<6x128xf32>
    %126 = arith.truncf %125 : vector<6x128xf32> to vector<6x128xbf16>
    %cst_48 = arith.constant dense<0.000000e+00> : vector<6x32xf32>
    %127 = tpu.matmul %126, %6, %cst_48 {dimension_numbers = #tpu.dot_dimension_numbers<[1], [0], [0], [1], [0, 0, 1, 1], [], []>} : vector<6x128xbf16>, vector<128x32xbf16>, vector<6x32xf32> -> vector<6x32xf32>
    %128 = vector.shape_cast %112 : vector<6x128xf32> to vector<2x1x3x128xf32>
    %c0_49 = arith.constant 0 : index
    %c0_50 = arith.constant 0 : index
    %c0_51 = arith.constant 0 : index
    %c0_52 = arith.constant 0 : index
    %129 = vector.load %arg16[%c0_49, %c0_50, %c0_51, %c0_52] : memref<2x1x3x128xf32, #tpu.memory_space<vmem>>, vector<2x1x3x128xf32>
    tpu.vector_store %arg16[%c0_49, %c0_50, %c0_51, %c0_52], %128 {strides = array<i32>} : memref<2x1x3x128xf32, #tpu.memory_space<vmem>>, vector<2x1x3x128xf32>,
    %c0_53 = arith.constant 0 : index
    %c0_54 = arith.constant 0 : index
    %130 = vector.load %arg18[%c0_53, %c0_54] : memref<6x32xf32, #tpu.memory_space<vmem>>, vector<6x32xf32>
    tpu.vector_store %arg18[%c0_53, %c0_54], %127 {strides = array<i32>} : memref<6x32xf32, #tpu.memory_space<vmem>>, vector<6x32xf32>,
    %c0_55 = arith.constant 0 : index
    %c0_56 = arith.constant 0 : index
    %131 = vector.load %arg19[%c0_55, %c0_56] : memref<6x32xf32, #tpu.memory_space<vmem>>, vector<6x32xf32>
    tpu.vector_store %arg19[%c0_55, %c0_56], %44 {strides = array<i32>} : memref<6x32xf32, #tpu.memory_space<vmem>>, vector<6x32xf32>,
    %c0_i32_57 = arith.constant 0 : i32
    %132 = arith.cmpi eq, %arg1, %c0_i32_57 : i32
    %133 = arith.extui %132 : i1 to i32
    %c0_i32_58 = arith.constant 0 : i32
    %134 = arith.cmpi ne, %133, %c0_i32_58 : i32
    scf.if %134 {
      %c0_59 = arith.constant 0 : index
      %c0_60 = arith.constant 0 : index
      %135 = vector.load %arg14[%c0_59, %c0_60] : memref<32x4xf32, #tpu.memory_space<vmem>>, vector<32x4xf32>
      %cst_61 = arith.constant dense<0.000000e+00> : vector<6x4xf32>
      %136 = tpu.matmul %76, %135, %cst_61 {dimension_numbers = #tpu.dot_dimension_numbers<[1], [0], [0], [1], [0, 0, 1, 1], [], []>} : vector<6x32xf32>, vector<32x4xf32>, vector<6x4xf32> -> vector<6x4xf32>
      %c0_62 = arith.constant 0 : index
      %c0_63 = arith.constant 0 : index
      %137 = vector.load %arg15[%c0_62, %c0_63] : memref<1x4xf32, #tpu.memory_space<vmem>>, vector<1x4xf32>
      %138 = vector.broadcast %137 : vector<1x4xf32> to vector<6x4xf32>
      %139 = arith.addf %136, %138 : vector<6x4xf32>
      %140 = vector.shape_cast %139 : vector<6x4xf32> to vector<2x3x4xf32>
      %c0_64 = arith.constant 0 : index
      %c0_65 = arith.constant 0 : index
      %c0_66 = arith.constant 0 : index
      %141 = vector.load %arg17[%c0_64, %c0_65, %c0_66] : memref<2x3x4xf32, #tpu.memory_space<vmem>>, vector<2x3x4xf32>
      tpu.vector_store %arg17[%c0_64, %c0_65, %c0_66], %140 {strides = array<i32>} : memref<2x3x4xf32, #tpu.memory_space<vmem>>, vector<2x3x4xf32>,
    } else {
    }
    return
  }
  func.func @transform_0(%arg0: i32, %arg1: i32) -> (i32, i32) {
    %c0_i32 = arith.constant 0 : i32
    %c0_i32_0 = arith.constant 0 : i32
    %c0_i32_1 = arith.constant 0 : i32
    return %c0_i32, %c0_i32_0 : i32, i32
  }
  func.func @transform_1(%arg0: i32, %arg1: i32) -> (i32, i32, i32) {
    %c0_i32 = arith.constant 0 : i32
    %c0_i32_0 = arith.constant 0 : i32
    %c0_i32_1 = arith.constant 0 : i32
    return %arg0, %c0_i32, %c0_i32_0 : i32, i32, i32
  }
  func.func @transform_2(%arg0: i32, %arg1: i32) -> (i32, i32, i32) {
    %c0_i32 = arith.constant 0 : i32
    %c0_i32_0 = arith.constant 0 : i32
    %c0_i32_1 = arith.constant 0 : i32
    return %arg0, %c0_i32, %c0_i32_0 : i32, i32, i32
  }
  func.func @transform_3(%arg0: i32, %arg1: i32) -> (i32, i32, i32) {
    %c0_i32 = arith.constant 0 : i32
    %c0_i32_0 = arith.constant 0 : i32
    %c0_i32_1 = arith.constant 0 : i32
    return %arg0, %c0_i32, %c0_i32_0 : i32, i32, i32
  }
  func.func @transform_4(%arg0: i32, %arg1: i32) -> (i32, i32, i32) {
    %c0_i32 = arith.constant 0 : i32
    %c0_i32_0 = arith.constant 0 : i32
    %c0_i32_1 = arith.constant 0 : i32
    return %arg0, %c0_i32, %c0_i32_0 : i32, i32, i32
  }
  func.func @transform_5(%arg0: i32, %arg1: i32) -> (i32, i32) {
    %c0_i32 = arith.constant 0 : i32
    %c0_i32_0 = arith.constant 0 : i32
    %c0_i32_1 = arith.constant 0 : i32
    return %c0_i32, %c0_i32_0 : i32, i32
  }
  func.func @transform_6(%arg0: i32, %arg1: i32) -> (i32, i32) {
    %c0_i32 = arith.constant 0 : i32
    %c0_i32_0 = arith.constant 0 : i32
    %c0_i32_1 = arith.constant 0 : i32
    return %c0_i32, %c0_i32_0 : i32, i32
  }
  func.func @transform_7(%arg0: i32, %arg1: i32) -> (i32, i32) {
    %c0_i32 = arith.constant 0 : i32
    %c0_i32_0 = arith.constant 0 : i32
    %c0_i32_1 = arith.constant 0 : i32
    return %c0_i32, %c0_i32_0 : i32, i32
  }
  func.func @transform_8(%arg0: i32, %arg1: i32) -> (i32, i32) {
    %c0_i32 = arith.constant 0 : i32
    %c0_i32_0 = arith.constant 0 : i32
    %c0_i32_1 = arith.constant 0 : i32
    return %c0_i32, %c0_i32_0 : i32, i32
  }
  func.func @transform_9(%arg0: i32, %arg1: i32) -> (i32, i32) {
    %c0_i32 = arith.constant 0 : i32
    %c0_i32_0 = arith.constant 0 : i32
    %c0_i32_1 = arith.constant 0 : i32
    return %c0_i32, %c0_i32_0 : i32, i32
  }
  func.func @transform_10(%arg0: i32, %arg1: i32) -> (i32, i32) {
    %c0_i32 = arith.constant 0 : i32
    %c0_i32_0 = arith.constant 0 : i32
    %c0_i32_1 = arith.constant 0 : i32
    return %c0_i32, %c0_i32_0 : i32, i32
  }
  func.func @transform_11(%arg0: i32, %arg1: i32) -> (i32, i32) {
    %c0_i32 = arith.constant 0 : i32
    %c0_i32_0 = arith.constant 0 : i32
    %c0_i32_1 = arith.constant 0 : i32
    return %c0_i32, %c0_i32_0 : i32, i32
  }
  func.func @transform_12(%arg0: i32, %arg1: i32) -> (i32, i32) {
    %c0_i32 = arith.constant 0 : i32
    %c0_i32_0 = arith.constant 0 : i32
    %c0_i32_1 = arith.constant 0 : i32
    return %c0_i32, %c0_i32_0 : i32, i32
  }
  func.func @transform_13(%arg0: i32, %arg1: i32) -> (i32, i32) {
    %c0_i32 = arith.constant 0 : i32
    %c0_i32_0 = arith.constant 0 : i32
    %c0_i32_1 = arith.constant 0 : i32
    return %c0_i32, %c0_i32_0 : i32, i32
  }
  func.func @transform_14(%arg0: i32, %arg1: i32) -> (i32, i32, i32, i32) {
    %c0_i32 = arith.constant 0 : i32
    %c0_i32_0 = arith.constant 0 : i32
    %c0_i32_1 = arith.constant 0 : i32
    return %arg0, %arg1, %c0_i32, %c0_i32_0 : i32, i32, i32, i32
  }
  func.func @transform_15(%arg0: i32, %arg1: i32) -> (i32, i32, i32) {
    %c0_i32 = arith.constant 0 : i32
    %c0_i32_0 = arith.constant 0 : i32
    %c0_i32_1 = arith.constant 0 : i32
    return %arg0, %c0_i32, %c0_i32_0 : i32, i32, i32
  }
}

</mosaic_0001>

<bundles_post_ra>
// kernel: tpu_custom_call.1
= control target key start
LH: loop header
LB: loop body
LE: loop exit
PB: predicated region body
PF: predicated region fallthrough
CT: control target
= control target key end

     0   :  { %s4326_s0 = inlined_call_operand.hbm [shape: f32[3,32], index: 0, kind: input, shape index: {}]   ;;  %s4327_s1 = inlined_call_operand.hbm [shape: f32[2,1,32], index: 1, kind: input, shape index: {}]   ;;  %s4328_s2 = inlined_call_operand.hbm [shape: bf16[2,8,32], index: 2, kind: input, shape index: {}]   ;;  %s4329_s3 = inlined_call_operand.hbm [shape: s32[2,8,1], index: 3, kind: input, shape index: {}]   ;;  %s4330_s4 = inlined_call_operand.hbm [shape: f32[2,1,8], index: 4, kind: input, shape index: {}]   ;;  %s4331_s5 = inlined_call_operand.hbm [shape: bf16[128,32], index: 5, kind: input, shape index: {}]   ;;  %s4332_s6 = inlined_call_operand.hbm [shape: bf16[32,96], index: 6, kind: input, shape index: {}]   ;;  %s4333_s7 = inlined_call_operand.hbm [shape: bf16[32,96], index: 7, kind: input, shape index: {}]   ;;  %s4334_s8 = inlined_call_operand.hbm [shape: f32[1,96], index: 8, kind: input, shape index: {}]   ;;  %s4335_s9 = inlined_call_operand.hbm [shape: f32[1,32], index: 9, kind: input, shape index: {}]   ;;  %s4336_s10 = inlined_call_operand.hbm [shape: f32[1,96], index: 10, kind: input, shape index: {}]   ;;  %s4337_s11 = inlined_call_operand.<no memory space> [shape: f32[1,1], index: 11, kind: input, shape index: {}]   ;;  %s4338_s12 = inlined_call_operand.hbm [shape: f32[32,4], index: 12, kind: input, shape index: {}]   ;;  %s4339_s13 = inlined_call_operand.hbm [shape: f32[1,4], index: 13, kind: input, shape index: {}]   ;;  %s4340_s14 = inlined_call_operand.hbm [shape: f32[2,4,3,128], index: 14, kind: output, shape index: {0}]   ;;  %s4341_s15 = inlined_call_operand.hbm [shape: f32[2,3,4], index: 15, kind: output, shape index: {1}]  }
   0x1   :  { %4371 = sst [smem:[#allocation51_spill]] %s4327_s1  ;;  %v21_v0 = vstv %s4337_s11 }
   0x2   :  { %4372 = sst [smem:[#allocation52_spill]] %s4340_s14  ;;  %22 = vst [vmem:[#allocation5] sm:$0x1] %v21_v0 }
   0x3   :  { %4373 = sst [smem:[#allocation53_spill]] %s4341_s15 }
   0x4   :  { %23 = vsyncpa [#allocation7], 0 }
   0x5   :  { %24 = vsyncpa [#allocation10], 0 }
   0x6   :  { %25 = vsyncpa [#allocation13], 0 }
   0x7   :  { %26 = vsyncpa [#allocation16], 0 }
   0x8   :  { %27 = vsyncpa [#allocation19], 0 }
   0x9   :  { %28 = vsyncpa [#allocation22], 0 }
   0xa   :  { %29 = vsyncpa [#allocation25], 0 }
   0xb   :  { %30 = vsyncpa [#allocation8], 0 }
   0xc   :  { %32 = vsyncpa [#allocation8 + $0x1], 0 }
   0xd   :  { %33 = vsyncpa [#allocation29], 0  ;;  %s3595_s20 = smov 0   ;;  %s3597_s21 = smov 0  }
   0xe   :  { %s3599_s22 = smov 0   ;;  %s3601_s23 = smov 0  }
   0xf   :  { %s3603_s11 = smov 0   ;;  %s3605_s24 = smov 0  }
  0x10 LB: > { %4374 = sst [smem:[#allocation39_spill]] %s3453_s20  ;;  %s2488_s25 = sadd.s32 4294967295, %s3473_s24   ;;  %s3473_s24 = sphi %s3605_s24, %s39_s24   ;;  %s3469_s11 = sphi %s3603_s11, %s4421_s11   ;;  %s3465_s23 = sphi %s3601_s23, %s4420_s23   ;;  %s3461_s22 = sphi %s3599_s22, %s4419_s22   ;;  %s3457_s21 = sphi %s3597_s21, %s4418_s21   ;;  %s3453_s20 = sphi %s3595_s20, %s4417_s20  }
  0x11   : > { %4375 = sst [smem:[#allocation40_spill]] %s3457_s21  ;;  %s2489_s26 = sadd.s32 4294967294, %s3473_s24  }
  0x12   : > { %4376 = sst [smem:[#allocation41_spill]] %s3461_s22  ;;  %s48_s27 = sadd.s32 1, %s3469_s11 }
  0x13   : > { %4377 = sst [smem:[#allocation42_spill]] %s3465_s23  ;;  %s374_s28 = sadd.s32 1, %s3461_s22 }
  0x14   : > { %4378 = sst [smem:[#allocation43_spill]] %s3469_s11  ;;  %p49_p0 = scmp.ge.s32.totalorder %s48_s27, 4 }
  0x15   : > { %4379 = sst [smem:[#allocation44_spill]] %s3473_s24  ;;  %p384_p1 = scmp.ne.s32.totalorder %s3461_s22, %s3457_s21 }
  0x16   : > { %p3631_p2 = scmp.eq.s32.totalorder %s2488_s25, 3  ;;  %p390_p3 = scmp.ne.s32.totalorder %s3457_s21, %s3453_s20 }
  0x17   : > { %s4423_s27 = smov (%p49_p0, %s48_s27), 0  ;;  %p391_p5 = scmp.eq.s32.totalorder %s2489_s26, 3 }
  0x18   : > { %s4380_s29 = scalar_select %p3631_p2, 1, 0 }
  0x19   : > { %4382 = sst [smem:[#allocation46_spill]] %s4423_s27  ;;  %p3641_p4 = por %p3631_p2, %p384_p1 }
  0x1a   : > { %4381 = sst [smem:[#allocation45_spill]] %s4380_s29  ;;  %s370_s16 = ssub.s32 %s3469_s11, %s4423_s27 }
  0x1b   : > { %s4383_s30 = scalar_select %p3641_p4, 1, 0 }
  0x1c   : > { %p2490_p6 = scmp.ge.s32.totalorder %s3473_s24, 1  ;;  %p372_p7 = scmp.eq.s32.totalorder %s370_s16, 0 }
  0x1d   : > { %4384 = sst [smem:[#allocation47_spill]] %s4383_s30  ;;  %p3648_p8 = por %p391_p5, %p390_p3 }
  0x1e   : > { %p424_p9 = scmp.lt.s32.totalorder %s3473_s24, 5  ;;  %p3660_p11 = scmp.eq.s32.totalorder %s2488_s25, 0 }
  0x1f   : > { %s4385_s17 = scalar_select %p3648_p8, 1, 0 }
  0x20   : > { %s3654_s18 = scalar_select %p372_p7, %s3461_s22, %s374_s28  }
  0x21   : > { %4386 = sst [smem:[#allocation48_spill]] %s4385_s17  ;;  %p3656_p10 = pnand %p2490_p6, %p424_p9 }
  0x22   : > { %4387 = sst [smem:[#allocation49_spill]] %s3654_s18  ;;  %s3475_s26 = smov [#allocation9]  }
  0x23   : > { %s4388_s19 = scalar_select %p3656_p10, 1, 0 }
  0x24   : > { %s4389_s20 = scalar_select %p3660_p11, 1, 0 }
  0x25   : > { %p2779_p12 = pneg %p3656_p10  ;;  %s450_s16 = sshll.u32 %s3475_s26, 4  ;;  %s451_s16 = int_to_ptr.vmem [resolvable:$true] %s450_s16 }
  0x26   : > { %4390 = sst [smem:[#allocation50_spill]] %s4389_s20  ;;  %s3476_s28 = smov [#allocation12]  }
  0x27   : > { %p3668_p13 = pnand %p3660_p11, %p2779_p12  ;;  %s482_s11 = sshll.u32 %s3476_s28, 4  ;;  %s3672_s11 = int_to_ptr.vmem [resolvable:$true] %s482_s11 }
  0x28   : > { %s4392_s1 = sld [smem:[#allocation51_spill]] }
  0x29   : > { %p3682_p1 = pneg %p3668_p13 }
  0x2e   : > { %s2973_s22 = scalar_lea.hbm %s4392_s1, 32 }
  0x2f   : > { %p2974_p0 = scmp.ne.s32.totalorder %s4392_s1, %s2973_s22  ;;  %p2980_p6 = scmp.lt.u32.totalorder %s2973_s22, %s4392_s1 }
  0x31   : > { %p2976_p3 = pnand %p3682_p1, %p2974_p0 }
  0x33   : > { %p2977_p5 = pneg %p2976_p3 }
  0x35   : > { %p2982_p7 = pnand %p2980_p6, %p2977_p5 }
  0x37   : > { %2985 = shalt.err (!%p2982_p7)
}
  0x38   : > { %s2986_s18 = scalar_lea.vmem %s451_s16, 32  ;;  %p2994_p2 = scmp.lt.s32.totalorder %s451_s16, %s451_s16 }
  0x39   : > { %p2987_p9 = scmp.ne.s32.totalorder %s451_s16, %s2986_s18  ;;  %p2995_p4 = scmp.lt.s32.totalorder %s2986_s18, %s2986_s18 }
  0x3b   : > { %p2989_p12 = pnand %p2987_p9, %p3682_p1  ;;  %p2996_p11 = por %p2995_p4, %p2994_p2 }
  0x3d   : > { %p2990_p8 = pneg %p2989_p12 }
  0x3f   : > { %p2997_p10 = pnand %p2996_p11, %p2990_p8 }
  0x41   : > { %3000 = shalt.err (!%p2997_p10)
}
  0x42   : > { %s4362_s24 = smov 16   ;;  %s4363_s17 = smov 1  }
  0x43   : > { %2785 = dma.hbm_to_vmem [thread:$0]  (!%p3668_p13), %s4392_s1, 32, %s451_s16, [#allocation10], %s4362_s24, %s4362_s24, %s4363_s17  }
  0x44   : > { %s3001_s29 = scalar_lea.hbm %s4329_s3, 256 }
  0x45   : > { %p3002_p2 = scmp.ne.s32.totalorder %s4329_s3, %s3001_s29  ;;  %p3008_p10 = scmp.lt.u32.totalorder %s3001_s29, %s4329_s3 }
  0x47   : > { %p3004_p4 = pnand %p3002_p2, %p3682_p1 }
  0x49   : > { %p3005_p8 = pneg %p3004_p4 }
  0x4b   : > { %p3010_p11 = pnand %p3008_p10, %p3005_p8 }
  0x4d   : > { %3013 = shalt.err (!%p3010_p11)
}
  0x4e   : > { %s3014_s16 = scalar_lea.vmem %s3672_s11, 256  ;;  %p3022_p6 = scmp.lt.s32.totalorder %s3672_s11, %s3672_s11 }
  0x4f   : > { %p3015_p0 = scmp.ne.s32.totalorder %s3672_s11, %s3014_s16  ;;  %p3023_p7 = scmp.lt.s32.totalorder %s3014_s16, %s3014_s16 }
  0x51   : > { %p3017_p3 = pnand %p3015_p0, %p3682_p1  ;;  %p3024_p9 = por %p3023_p7, %p3022_p6 }
  0x53   : > { %p3018_p5 = pneg %p3017_p3 }
  0x55   : > { %p3025_p12 = pnand %p3024_p9, %p3018_p5 }
  0x57   : > { %3028 = shalt.err (!%p3025_p12)
}
  0x58   : > { %s4368_s14 = smov 128   ;;  %s3480_s23 = smov 8  }
  0x59   : > { %2791 = dma.hbm_to_vmem [thread:$0]  (!%p3668_p13), %s4329_s3, 256, %s3672_s11, [#allocation13], %s4368_s14, %s4368_s14, %s3480_s23  }
  0x5a   : > { %s3481_s15 = smov [#allocation15]   ;;  %s3482_s25 = smov [#allocation18]  }
  0x5b   : > { %s511_s22 = sshll.u32 %s3481_s15, 4  ;;  %s537_s28 = sshll.u32 %s3482_s25, 4  ;;  %s512_s22 = int_to_ptr.vmem [resolvable:$true] %s511_s22  ;;  %s538_s28 = int_to_ptr.vmem [resolvable:$true] %s537_s28 }
  0x5c   : > { %s3029_s24 = scalar_lea.hbm %s4331_s5, 1024 }
  0x5d   : > { %p3030_p2 = scmp.ne.s32.totalorder %s4331_s5, %s3029_s24  ;;  %p3036_p10 = scmp.lt.u32.totalorder %s3029_s24, %s4331_s5 }
  0x5f   : > { %p3032_p4 = pnand %p3030_p2, %p3682_p1 }
  0x61   : > { %p3033_p8 = pneg %p3032_p4 }
  0x63   : > { %p3038_p11 = pnand %p3036_p10, %p3033_p8 }
  0x65   : > { %3041 = shalt.err (!%p3038_p11)
}
  0x66   : > { %s3042_s11 = scalar_lea.vmem %s512_s22, 1024  ;;  %p3050_p6 = scmp.lt.s32.totalorder %s512_s22, %s512_s22 }
  0x67   : > { %p3043_p0 = scmp.ne.s32.totalorder %s512_s22, %s3042_s11  ;;  %p3051_p7 = scmp.lt.s32.totalorder %s3042_s11, %s3042_s11 }
  0x69   : > { %p3045_p3 = pnand %p3043_p0, %p3682_p1  ;;  %p3052_p9 = por %p3051_p7, %p3050_p6 }
  0x6b   : > { %p3046_p5 = pneg %p3045_p3 }
  0x6d   : > { %p3053_p12 = pnand %p3052_p9, %p3046_p5 }
  0x6f   : > { %3056 = shalt.err (!%p3053_p12)
}
  0x70   : > { %s4369_s1 = smov 64   ;;  %s3484_s17 = smov 4  }
  0x71   : > { %2797 = dma.hbm_to_vmem [thread:$0]  (!%p3668_p13), %s4331_s5, 1024, %s512_s22, [#allocation16], %s4369_s1, %s4369_s1, %s3484_s17  }
  0x72   : > { %s3057_s30 = scalar_lea.hbm %s4333_s7, 256 }
  0x73   : > { %p3058_p2 = scmp.ne.s32.totalorder %s4333_s7, %s3057_s30  ;;  %p3064_p10 = scmp.lt.u32.totalorder %s3057_s30, %s4333_s7 }
  0x75   : > { %p3060_p4 = pnand %p3058_p2, %p3682_p1 }
  0x77   : > { %p3061_p8 = pneg %p3060_p4 }
  0x79   : > { %p3066_p11 = pnand %p3064_p10, %p3061_p8 }
  0x7b   : > { %3069 = shalt.err (!%p3066_p11)
}
  0x7c   : > { %s3070_s11 = scalar_lea.vmem %s538_s28, 256  ;;  %p3078_p6 = scmp.lt.s32.totalorder %s538_s28, %s538_s28 }
  0x7d   : > { %p3071_p0 = scmp.ne.s32.totalorder %s538_s28, %s3070_s11  ;;  %p3079_p7 = scmp.lt.s32.totalorder %s3070_s11, %s3070_s11 }
  0x7f   : > { %p3073_p3 = pnand %p3071_p0, %p3682_p1  ;;  %p3080_p9 = por %p3079_p7, %p3078_p6 }
  0x81   : > { %p3074_p5 = pneg %p3073_p3 }
  0x83   : > { %p3081_p12 = pnand %p3080_p9, %p3074_p5 }
  0x85   : > { %3084 = shalt.err (!%p3081_p12)
}
  0x86   : > { %2803 = dma.hbm_to_vmem [thread:$0]  (!%p3668_p13), %s4333_s7, 256, %s538_s28, [#allocation19], %s4369_s1, %s4369_s1, %s3484_s17  }
  0x87   : > { %s3485_s21 = smov [#allocation21]   ;;  %s3486_s29 = smov [#allocation24]  }
  0x88   : > { %s562_s24 = sshll.u32 %s3485_s21, 4  ;;  %s586_s30 = sshll.u32 %s3486_s29, 4  ;;  %s563_s24 = int_to_ptr.vmem [resolvable:$true] %s562_s24  ;;  %s587_s30 = int_to_ptr.vmem [resolvable:$true] %s586_s30 }
  0x89   : > { %s3085_s18 = scalar_lea.hbm %s4335_s9, 16 }
  0x8a   : > { %p3086_p2 = scmp.ne.s32.totalorder %s4335_s9, %s3085_s18  ;;  %p3092_p10 = scmp.lt.u32.totalorder %s3085_s18, %s4335_s9 }
  0x8c   : > { %p3088_p4 = pnand %p3086_p2, %p3682_p1 }
  0x8e   : > { %p3089_p8 = pneg %p3088_p4 }
  0x90   : > { %p3094_p11 = pnand %p3092_p10, %p3089_p8 }
  0x92   : > { %3097 = shalt.err (!%p3094_p11)
}
  0x93   : > { %s3098_s28 = scalar_lea.vmem %s563_s24, 16  ;;  %s3105_s20 = scalar_lea.vmem %s563_s24, 32 }
  0x94   : > { %p3099_p0 = scmp.ne.s32.totalorder %s563_s24, %s3098_s28  ;;  %p3106_p6 = scmp.lt.s32.totalorder %s563_s24, %s563_s24 }
  0x95   : > { %p3107_p7 = scmp.lt.s32.totalorder %s3105_s20, %s3098_s28 }
  0x96   : > { %p3101_p3 = pnand %p3099_p0, %p3682_p1 }
  0x97   : > { %p3108_p9 = por %p3107_p7, %p3106_p6 }
  0x98   : > { %p3102_p5 = pneg %p3101_p3 }
  0x9a   : > { %p3109_p12 = pnand %p3108_p9, %p3102_p5 }
  0x9c   : > { %3112 = shalt.err (!%p3109_p12)
}
  0x9d   : > { %2809 = dma.hbm_to_vmem [thread:$0]  (!%p3668_p13), %s4335_s9, 16, %s563_s24, [#allocation22]  }
  0x9e   : > { %s3113_s25 = scalar_lea.hbm %s4338_s12, 512 }
  0x9f   : > { %p3114_p2 = scmp.ne.s32.totalorder %s4338_s12, %s3113_s25  ;;  %p3120_p10 = scmp.lt.u32.totalorder %s3113_s25, %s4338_s12 }
  0xa1   : > { %p3116_p4 = pnand %p3114_p2, %p3682_p1 }
  0xa3   : > { %p3117_p8 = pneg %p3116_p4 }
  0xa5   : > { %p3122_p11 = pnand %p3120_p10, %p3117_p8 }
  0xa7   : > { %3125 = shalt.err (!%p3122_p11)
}
  0xa8   : > { %s3126_s28 = scalar_lea.vmem %s587_s30, 512  ;;  %p3134_p6 = scmp.lt.s32.totalorder %s587_s30, %s587_s30 }
  0xa9   : > { %p3127_p0 = scmp.ne.s32.totalorder %s587_s30, %s3126_s28  ;;  %p3135_p7 = scmp.lt.s32.totalorder %s3126_s28, %s3126_s28 }
  0xab   : > { %p3129_p3 = pnand %p3127_p0, %p3682_p1  ;;  %p3136_p9 = por %p3135_p7, %p3134_p6 }
  0xad   : > { %p3130_p5 = pneg %p3129_p3 }
  0xaf   : > { %p3137_p12 = pnand %p3136_p9, %p3130_p5 }
  0xb1   : > { %3140 = shalt.err (!%p3137_p12)
}
  0xb2   : > { %s4394_s24 = smov 128   ;;  %s3487_s29 = smov [#allocation6]  }
  0xb3   : > { %2815 = dma.hbm_to_vmem [thread:$0]  (!%p3668_p13), %s4338_s12, 512, %s587_s30, [#allocation25], %s4394_s24, %s4394_s24, %s3480_s23  }
  0xb4   : > { %s437_s14 = sshll.u32 %s3487_s29, 4  ;;  %s3488_s15 = smov [#allocation11]   ;;  %s438_s14 = int_to_ptr.vmem [resolvable:$true] %s437_s14 }
  0xb5   : > { %s466_s25 = sshll.u32 %s3488_s15, 4  ;;  %s3141_s11 = scalar_lea.hbm %s4326_s0, 64  ;;  %s467_s25 = int_to_ptr.vmem [resolvable:$true] %s466_s25 }
  0xb6   : > { %p3142_p2 = scmp.ne.s32.totalorder %s4326_s0, %s3141_s11  ;;  %p3148_p10 = scmp.lt.u32.totalorder %s3141_s11, %s4326_s0 }
  0xb8   : > { %p3144_p4 = pnand %p3142_p2, %p3682_p1 }
  0xba   : > { %p3145_p8 = pneg %p3144_p4 }
  0xbc   : > { %p3150_p11 = pnand %p3148_p10, %p3145_p8 }
  0xbe   : > { %3153 = shalt.err (!%p3150_p11)
}
  0xbf   : > { %s3154_s23 = scalar_lea.vmem %s438_s14, 64  ;;  %p3162_p6 = scmp.lt.s32.totalorder %s438_s14, %s438_s14 }
  0xc0   : > { %p3155_p0 = scmp.ne.s32.totalorder %s438_s14, %s3154_s23  ;;  %p3163_p7 = scmp.lt.s32.totalorder %s3154_s23, %s3154_s23 }
  0xc2   : > { %p3157_p3 = pnand %p3155_p0, %p3682_p1  ;;  %p3164_p9 = por %p3163_p7, %p3162_p6 }
  0xc4   : > { %p3158_p5 = pneg %p3157_p3 }
  0xc6   : > { %p3165_p12 = pnand %p3164_p9, %p3158_p5 }
  0xc8   : > { %3168 = shalt.err (!%p3165_p12)
}
  0xc9   : > { %2782 = dma.hbm_to_vmem [thread:$0]  (!%p3668_p13), %s4326_s0, 64, %s438_s14, [#allocation7]  }
  0xca   : > { %s3169_s29 = scalar_lea.hbm %s4328_s2, 128 }
  0xcb   : > { %p3170_p2 = scmp.ne.s32.totalorder %s4328_s2, %s3169_s29  ;;  %p3176_p10 = scmp.lt.u32.totalorder %s3169_s29, %s4328_s2 }
  0xcd   : > { %p3172_p4 = pnand %p3170_p2, %p3682_p1 }
  0xcf   : > { %p3173_p8 = pneg %p3172_p4 }
  0xd1   : > { %p3178_p11 = pnand %p3176_p10, %p3173_p8 }
  0xd3   : > { %3181 = shalt.err (!%p3178_p11)
}
  0xd4   : > { %s3182_s22 = scalar_lea.vmem %s467_s25, 128  ;;  %p3190_p6 = scmp.lt.s32.totalorder %s467_s25, %s467_s25 }
  0xd5   : > { %p3183_p0 = scmp.ne.s32.totalorder %s467_s25, %s3182_s22  ;;  %p3191_p7 = scmp.lt.s32.totalorder %s3182_s22, %s3182_s22 }
  0xd7   : > { %p3185_p3 = pnand %p3183_p0, %p3682_p1  ;;  %p3192_p9 = por %p3191_p7, %p3190_p6 }
  0xd9   : > { %p3186_p5 = pneg %p3185_p3 }
  0xdb   : > { %p3193_p12 = pnand %p3192_p9, %p3186_p5 }
  0xdd   : > { %3196 = shalt.err (!%p3193_p12)
}
  0xde   : > { %s4395_s14 = smov 64   ;;  %s3489_s23 = smov [#allocation14]  }
  0xdf   : > { %2788 = dma.hbm_to_vmem [thread:$0]  (!%p3668_p13), %s4328_s2, 128, %s467_s25, [#allocation10], %s4395_s14, %s4395_s14, %s3484_s17  }
  0xe0   : > { %s498_s30 = sshll.u32 %s3489_s23, 4  ;;  %s3490_s24 = smov [#allocation17]   ;;  %s499_s30 = int_to_ptr.vmem [resolvable:$true] %s498_s30 }
  0xe1   : > { %s524_s1 = sshll.u32 %s3490_s24, 4  ;;  %s3197_s15 = scalar_lea.hbm %s4330_s4, 32  ;;  %s525_s1 = int_to_ptr.vmem [resolvable:$true] %s524_s1 }
  0xe2   : > { %p3198_p2 = scmp.ne.s32.totalorder %s4330_s4, %s3197_s15  ;;  %p3204_p10 = scmp.lt.u32.totalorder %s3197_s15, %s4330_s4 }
  0xe4   : > { %p3200_p4 = pnand %p3198_p2, %p3682_p1 }
  0xe6   : > { %p3201_p8 = pneg %p3200_p4 }
  0xe8   : > { %p3206_p11 = pnand %p3204_p10, %p3201_p8 }
  0xea   : > { %3209 = shalt.err (!%p3206_p11)
}
  0xeb   : > { %s3210_s25 = scalar_lea.vmem %s499_s30, 32  ;;  %p3218_p6 = scmp.lt.s32.totalorder %s499_s30, %s499_s30 }
  0xec   : > { %p3211_p0 = scmp.ne.s32.totalorder %s499_s30, %s3210_s25  ;;  %p3219_p7 = scmp.lt.s32.totalorder %s3210_s25, %s3210_s25 }
  0xee   : > { %p3213_p3 = pnand %p3211_p0, %p3682_p1  ;;  %p3220_p9 = por %p3219_p7, %p3218_p6 }
  0xf0   : > { %p3214_p5 = pneg %p3213_p3 }
  0xf2   : > { %p3221_p12 = pnand %p3220_p9, %p3214_p5 }
  0xf4   : > { %3224 = shalt.err (!%p3221_p12)
}
  0xf5   : > { %s4396_s28 = smov 1   ;;  %s4397_s20 = smov 16  }
  0xf6   : > { %2794 = dma.hbm_to_vmem [thread:$0]  (!%p3668_p13), %s4330_s4, 32, %s499_s30, [#allocation13], %s4397_s20, %s4397_s20, %s4396_s28  }
  0xf7   : > { %s3225_s15 = scalar_lea.hbm %s4332_s6, 256 }
  0xf8   : > { %p3226_p2 = scmp.ne.s32.totalorder %s4332_s6, %s3225_s15  ;;  %p3232_p10 = scmp.lt.u32.totalorder %s3225_s15, %s4332_s6 }
  0xfa   : > { %p3228_p4 = pnand %p3226_p2, %p3682_p1 }
  0xfc   : > { %p3229_p8 = pneg %p3228_p4 }
  0xfe   : > { %p3234_p11 = pnand %p3232_p10, %p3229_p8 }
 0x100   : > { %3237 = shalt.err (!%p3234_p11)
}
 0x101   : > { %s3238_s25 = scalar_lea.vmem %s525_s1, 256  ;;  %p3246_p6 = scmp.lt.s32.totalorder %s525_s1, %s525_s1 }
 0x102   : > { %p3239_p0 = scmp.ne.s32.totalorder %s525_s1, %s3238_s25  ;;  %p3247_p7 = scmp.lt.s32.totalorder %s3238_s25, %s3238_s25 }
 0x104   : > { %p3241_p3 = pnand %p3239_p0, %p3682_p1  ;;  %p3248_p9 = por %p3247_p7, %p3246_p6 }
 0x106   : > { %p3242_p5 = pneg %p3241_p3 }
 0x108   : > { %p3249_p12 = pnand %p3248_p9, %p3242_p5 }
 0x10a   : > { %3252 = shalt.err (!%p3249_p12)
}
 0x10b   : > { %2800 = dma.hbm_to_vmem [thread:$0]  (!%p3668_p13), %s4332_s6, 256, %s525_s1, [#allocation16], %s4395_s14, %s4395_s14, %s3484_s17  }
 0x10c   : > { %s3491_s20 = smov [#allocation20]   ;;  %s3492_s24 = smov [#allocation23]  }
 0x10d   : > { %s551_s23 = sshll.u32 %s3491_s20, 4  ;;  %s573_s21 = sshll.u32 %s3492_s24, 4  ;;  %s552_s23 = int_to_ptr.vmem [resolvable:$true] %s551_s23  ;;  %s574_s21 = int_to_ptr.vmem [resolvable:$true] %s573_s21 }
 0x10e   : > { %s3253_s18 = scalar_lea.hbm %s4334_s8, 16 }
 0x10f   : > { %p3254_p2 = scmp.ne.s32.totalorder %s4334_s8, %s3253_s18  ;;  %p3260_p10 = scmp.lt.u32.totalorder %s3253_s18, %s4334_s8 }
 0x111   : > { %p3256_p4 = pnand %p3254_p2, %p3682_p1 }
 0x113   : > { %p3257_p8 = pneg %p3256_p4 }
 0x115   : > { %p3262_p11 = pnand %p3260_p10, %p3257_p8 }
 0x117   : > { %3265 = shalt.err (!%p3262_p11)
}
 0x118   : > { %s3266_s17 = scalar_lea.vmem %s552_s23, 16  ;;  %s3273_s14 = scalar_lea.vmem %s552_s23, 32 }
 0x119   : > { %p3267_p0 = scmp.ne.s32.totalorder %s552_s23, %s3266_s17  ;;  %p3274_p6 = scmp.lt.s32.totalorder %s552_s23, %s552_s23 }
 0x11a   : > { %p3275_p7 = scmp.lt.s32.totalorder %s3273_s14, %s3266_s17 }
 0x11b   : > { %p3269_p3 = pnand %p3267_p0, %p3682_p1 }
 0x11c   : > { %p3276_p9 = por %p3275_p7, %p3274_p6 }
 0x11d   : > { %p3270_p5 = pneg %p3269_p3 }
 0x11f   : > { %p3277_p12 = pnand %p3276_p9, %p3270_p5 }
 0x121   : > { %3280 = shalt.err (!%p3277_p12)
}
 0x122   : > { %2806 = dma.hbm_to_vmem [thread:$0]  (!%p3668_p13), %s4334_s8, 16, %s552_s23, [#allocation19]  }
 0x123   : > { %s3281_s24 = scalar_lea.hbm %s4336_s10, 16 }
 0x124   : > { %p3282_p2 = scmp.ne.s32.totalorder %s4336_s10, %s3281_s24  ;;  %p3288_p10 = scmp.lt.u32.totalorder %s3281_s24, %s4336_s10 }
 0x126   : > { %p3284_p4 = pnand %p3282_p2, %p3682_p1 }
 0x128   : > { %p3285_p8 = pneg %p3284_p4 }
 0x12a   : > { %p3290_p11 = pnand %p3288_p10, %p3285_p8 }
 0x12c   : > { %3293 = shalt.err (!%p3290_p11)
}
 0x12d   : > { %s3294_s11 = scalar_lea.vmem %s574_s21, 16  ;;  %s3301_s23 = scalar_lea.vmem %s574_s21, 32 }
 0x12e   : > { %p3295_p0 = scmp.ne.s32.totalorder %s574_s21, %s3294_s11  ;;  %p3302_p6 = scmp.lt.s32.totalorder %s574_s21, %s574_s21 }
 0x12f   : > { %p3303_p7 = scmp.lt.s32.totalorder %s3301_s23, %s3294_s11 }
 0x130   : > { %p3297_p3 = pnand %p3295_p0, %p3682_p1 }
 0x131   : > { %p3304_p9 = por %p3303_p7, %p3302_p6 }
 0x132   : > { %p3298_p5 = pneg %p3297_p3 }
 0x134   : > { %p3305_p12 = pnand %p3304_p9, %p3298_p5 }
 0x136   : > { %3308 = shalt.err (!%p3305_p12)
}
 0x137   : > { %2812 = dma.hbm_to_vmem [thread:$0]  (!%p3668_p13), %s4336_s10, 16, %s574_s21, [#allocation22]  }
 0x138   : > { %s3493_s17 = smov [#allocation26]   ;;  %s3309_s28 = scalar_lea.hbm %s4339_s13, 16 }
 0x139   : > { %s600_s14 = sshll.u32 %s3493_s17, 4  ;;  %p3310_p2 = scmp.ne.s32.totalorder %s4339_s13, %s3309_s28  ;;  %s601_s14 = int_to_ptr.vmem [resolvable:$true] %s600_s14 }
 0x13a   : > { %p3316_p10 = scmp.lt.u32.totalorder %s3309_s28, %s4339_s13 }
 0x13b   : > { %p3312_p4 = pnand %p3310_p2, %p3682_p1 }
 0x13d   : > { %p3313_p8 = pneg %p3312_p4 }
 0x13f   : > { %p3318_p11 = pnand %p3316_p10, %p3313_p8 }
 0x141   : > { %3321 = shalt.err (!%p3318_p11)
}
 0x142   : > { %s3322_s21 = scalar_lea.vmem %s601_s14, 16  ;;  %s3329_s18 = scalar_lea.vmem %s601_s14, 32 }
 0x143   : > { %p3323_p0 = scmp.ne.s32.totalorder %s601_s14, %s3322_s21  ;;  %p3330_p6 = scmp.lt.s32.totalorder %s601_s14, %s601_s14 }
 0x144   : > { %p3331_p7 = scmp.lt.s32.totalorder %s3329_s18, %s3322_s21 }
 0x145   : > { %p3325_p3 = pnand %p3323_p0, %p3682_p1 }
 0x146   : > { %p3332_p9 = por %p3331_p7, %p3330_p6 }
 0x147   : > { %p3326_p5 = pneg %p3325_p3 }
 0x149   : > { %p3333_p12 = pnand %p3332_p9, %p3326_p5 }
 0x14b   : > { %3336 = shalt.err (!%p3333_p12)
}
 0x14c   : > { %2818 = dma.hbm_to_vmem [thread:$0]  (!%p3668_p13), %s4339_s13, 16, %s601_s14, [#allocation25]  }
 0x14d   : > { %p4398_p2 = scmp.ne.s32.totalorder %s4388_s19, 0 }
 0x14e   : > { %s4399_s23 = sld [smem:[#allocation50_spill]] (!%p4398_p2) }
 0x14f   : > { %613 = sbr.rel (%p4398_p2) target bundleno = 3010 (0xbc2), region = 76 }
 0x154   : > { %p4400_p4 = scmp.ne.s32.totalorder (!%p4398_p2), %s4399_s23, 0 }
 0x156   : > { %3416 = dma.done.wait (%p4400_p4), [#allocation7], 64  }
 0x157   : > { %3418 = vsyncadd (%p4400_p4), [#allocation7], 4294967232 }
 0x158   : > { %3420 = dma.done.wait (%p4400_p4), [#allocation10], 160  }
 0x159   : > { %3422 = vsyncadd (%p4400_p4), [#allocation10], 4294967136 }
 0x15a   : > { %3424 = dma.done.wait (%p4400_p4), [#allocation13], 288  }
 0x15b   : > { %3426 = vsyncadd (%p4400_p4), [#allocation13], 4294967008 }
 0x15c   : > { %3428 = dma.done.wait (%p4400_p4), [#allocation16], 1280  }
 0x15d   : > { %3430 = vsyncadd (%p4400_p4), [#allocation16], 4294966016 }
 0x15e   : > { %3432 = dma.done.wait (%p4400_p4), [#allocation19], 272  }
 0x15f   : > { %3434 = vsyncadd (%p4400_p4), [#allocation19], 4294967024 }
 0x160   : > { %3436 = dma.done.wait (%p4400_p4), [#allocation22], 32  }
 0x161   : > { %3438 = vsyncadd (%p4400_p4), [#allocation22], 4294967264 }
 0x162   : > { %3440 = dma.done.wait (%p4400_p4), [#allocation25], 528  }
 0x163   : > { %3442 = vsyncadd (%p4400_p4), [#allocation25], 4294966768  ;;  %s4401_s27 = sld [smem:[#allocation40_spill]]  ;;  %s4402_s25 = sld [smem:[#allocation42_spill]] }
 0x169   : > { %s699_s19 = sand.u32 1, %s4401_s27   ;;  %p2519_p13 = scmp.ne.s32.totalorder %s4402_s25, 0 }
 0x16a   : > { %s2518_s26 = sshll.u32 %s699_s19, 3  ;;  %v823_v1 = vld [vmem:[#allocation12] sm:$0xff] (!%p2519_p13)  ;;  %v738_v2 = vlaneseq (!%p2519_p13)  ;;  %v3494_v3 = vmov (!%p2519_p13), 0   ;;  %v715_v4 = vld [vmem:[#allocation6] sm:$0x7] (!%p2519_p13)  ;;  %vm719_vm0 = vcmask (!%p2519_p13), 1042432  }
 0x16b   : > { %s3976_s22 = scalar_lea.vmem [#allocation27], %s2518_s26  ;;  %714 = sbr.rel (%p2519_p13) target bundleno = 501 (0x1f5), region = 132  ;;  %2936 = vset.pattern.permute.xlu0 (!%p2519_p13), %v3494_v3  ;;  %v717_v5 = vrot.slane (!%p2519_p13), %v715_v4, 5  ;;  %vm721_vm1 = vcmask (!%p2519_p13), 259072   ;;  %v824_v6 = vld [vmem:[#allocation12 + $0x8] sm:$0xff] (!%p2519_p13)  ;;  %v3496_v38 = vmov (!%p2519_p13), 0.0  }
 0x16c   : > { %828 = vperm.xlu0 (!%p2519_p13), %2936, %v823_v1   ;;  %v3495_v7 = vmov (!%p2519_p13), 1966171168   ;;  %v739_v9 = vshrl.u32 (!%p2519_p13), %v738_v2, 7  ;;  %v2520_v12 = vld [vmem:[#allocation9] ss:$0 sm:$0xff] (!%p2519_p13)  ;;  %v826_v35 = vand.u32 (!%p2519_p13), 127, %v738_v2 }
 0x16d   : > { %v736_v8 = vunpack.c.l.s4 (!%p2519_p13), %v3495_v7  ;;  %v720_v10 = vsel (!%p2519_p13), %vm719_vm0, %v715_v4, %v717_v5  ;;  %v2521_v13 = vld [vmem:[#allocation9 + $0x1] ss:$0 sm:$0xff] (!%p2519_p13) }
 0x16e   : > { %722 = vst.msk [vmem:[#allocation2] sm:$0x3f] (!%p2519_p13), %vm721_vm1, %v720_v10 }
 0x16f   : > { %v737_v11 = vunpack.c.0.s8 (!%p2519_p13), %v736_v8 }
 0x170   : > { %831 = vperm.xlu0 (!%p2519_p13), %2936, %v824_v6  }
 0x171   : > { %v740_v14 = vsub.s32 (!%p2519_p13), %v737_v11, %v739_v9 }
 0x173   : > { %v741_v15 = vrot.slane %v2520_v12, %v740_v14  ;;  %v764_v16 = vrot.slane %v2521_v13, %v740_v14 }
 0x175   : > { %v742_v17 = vcombine.high %v741_v15, %v741_v15  ;;  %v749_v18 = vrot.slane %v741_v15, %v740_v14  ;;  %v765_v19 = vcombine.high %v764_v16, %v764_v16  ;;  %v772_v20 = vrot.slane %v764_v16, %v740_v14 }
 0x177   : > { %v756_v21 = vrot.slane %v742_v17, %v740_v14  ;;  %v757_v22 = vcombine.high %v749_v18, %v749_v18  ;;  %v779_v23 = vrot.slane %v765_v19, %v740_v14  ;;  %v780_v24 = vcombine.high %v772_v20, %v772_v20 }
 0x179   : > { %v781_v25 = vcombine.low %v749_v18, %v756_v21  ;;  %v782_v26 = vcombine.low %v757_v22, %v772_v20  ;;  %v783_v27 = vcombine.low %v779_v23, %v780_v24 }
 0x17b   : > { %v790_v28 = vrot.slane %v781_v25, %v740_v14  ;;  %v797_v29 = vrot.slane %v782_v26, %v740_v14  ;;  %v804_v30 = vrot.slane %v783_v27, %v740_v14 }
 0x17d   : > { %v805_v31 = vcombine.low %v790_v28, %v797_v29  ;;  %v819_v32 = vrot.slane %v804_v30, %v740_v14 }
 0x17f   : > { %v812_v33 = vrot.slane %v805_v31, %v740_v14 }
 0x181   : > { %v820_v34 = vcombine.low %v812_v33, %v819_v32 }
 0x183   : > { %822 = vst.msk [vmem:[#allocation3] sm:$0x3f] %vm721_vm1, %v820_v34 }
 0x1eb   : > { %v829_v36 = vpop.permute.xlu0 %828 }
 0x1ec   : > { %vm833_vm2 = vcmp.eq.s32.totalorder %v829_v36, %v826_v35 }
 0x1ed   : > { %v2522_v39 = vsel %vm833_vm2, 1.0, %v3496_v38 }
 0x1ef   : > { %v832_v37 = vpop.permute.xlu0 %831 }
 0x1f0   : > { %vm834_vm3 = vcmp.eq.s32.totalorder %v832_v37, %v826_v35 }
 0x1f1   : > { %v2523_v40 = vsel %vm834_vm3, 1.0, %v3496_v38 }
 0x1f2   : > { %v2569_v41 = vpack.c.bf16 %v2523_v40, %v2522_v39 }
 0x1f4   : > { %2570 = vst [vmem:[#allocation4] sm:$0xff] %v2569_v41  }
 0x1f5 PF: > { %v2939_v42 = vld [vmem:[#allocation17] sm:$0xff]   ;;  %v3497_v43 = vmov 0.0   ;;  %v2940_v44 = vld [vmem:[#allocation18] sm:$0xff]   ;;  %v2941_v45 = vld [vmem:[#allocation17 + $0x8] sm:$0xff]   ;;  %vm3498_vm4 = vmmov 0   ;;  %vm888_vm5 = vcmask 261120   ;;  %v1036_v16 = vlaneseq }
 0x1f6   : > { %2612 = vmatprep.subr.bf16.mxu0 %v3497_v43  ;;  %2620 = vmatprep.subr.bf16.mxu1 %v3497_v43  ;;  %v2942_v46 = vld [vmem:[#allocation18 + $0x8] sm:$0xff]   ;;  %v844_v48 = vld [vmem:[#allocation3] sm:$0x3f]  ;;  %v2532_v49 = vld [vmem:[#allocation21] ss:$0 sm:$0xff]  ;;  %s3499_s17 = smov 64  }
 0x1f7   : > { %2613 = vmatpush3.bf16.msra.mxu0 %v2939_v42  ;;  %2616 = vmatprep.mubr.msk.bf16.mxu0 %vm3498_vm4, %v3497_v43  ;;  %v864_v51 = vpack.c.bf16 %v844_v48, %v844_v48  ;;  %s3500_s14 = smov 32   ;;  %v2524_v62 = vld [vmem:[#allocation20] ss:$0 sm:$0xff]  ;;  %s3501_s1 = smov 96   ;;  %v4007_v10 = vld [vmem:[#allocation11] sm:$0xf] }
 0x1f8   : > { %2621 = vmatpush3.bf16.msra.mxu1 %v2940_v44  ;;  %2614 = vmatprep.subr.bf16.mxu0 %v3497_v43  ;;  %v3991_v47 = vld [vmem:[#allocation2] sm:$0x3f]  ;;  %v1099_v12 = vsel %vm888_vm5, %v4007_v10, 0  ;;  %v3502_v14 = vmov 1966171168   ;;  %v1037_v20 = vshrl.u32 %v1036_v16, 7 }
 0x1f9   : > { %2622 = vmatprep.subr.bf16.mxu1 %v3497_v43  ;;  %2624 = vmatprep.mubr.msk.bf16.mxu1 %vm3498_vm4, %v3497_v43  ;;  %v863_v50 = vpack.c.bf16 %v3991_v47, %v3991_v47  ;;  %v4009_v11 = vld [vmem:[#allocation11 + $0x4] sm:$0xf]  ;;  %v1034_v15 = vunpack.c.l.s4 %v3502_v14  ;;  %vm1206_vm6 = vcmask 59392   ;;  %vm1356_vm7 = vcmask 1043456  }
 0x1fa   : > { %1004 = vrot.lane.b32.xlu0 %v2532_v49, %s3499_s17  ;;  %v1164_v13 = vsel %vm888_vm5, %v4009_v11, 0  ;;  %vm1506_vm8 = vcmask 259072   ;;  %vm1352_vm9 = vcmask 64512   ;;  %vm1340_vm10 = vcmask 1045504  }
 0x1fb   : > { %2615 = vmatpush3.bf16.msra.mxu0 %v2941_v45  ;;  %v1035_v19 = vunpack.c.0.s8 %v1034_v15  ;;  %v2533_v45 = vld [vmem:[#allocation14] ss:$0 sm:$0xff]  ;;  %vm3506_vm15 = vmmov (!%p2519_p13), 0   ;;  %vm2246_vm0 = vcmask (!%p2519_p13), 26624  }
 0x1fc   : > { %2623 = vmatpush3.bf16.msra.mxu1 %v2942_v46  ;;  %2628 = vmatprep.subr.bf16.mxu0 %v3497_v43 }
 0x1fd   : > { %2634 = vmatprep.subr.bf16.mxu1 %v3497_v43  ;;  %v4018_v24 = vsub.s32 %v1035_v19, %v1037_v20 }
 0x1fe   : > { %2617 = vmatmul.mubr.msk.bf16.vlgmr.msra.gmra.mrb[0].mxu0 %vm888_vm5, %v863_v50 }
 0x1ff   : > { %2625 = vmatmul.mubr.msk.bf16.vlgmr.msra.gmra.mrb[0].mxu1 %vm888_vm5, %v864_v51  ;;  %2630 = vmatprep.mubr.msk.bf16.mxu0 %vm3498_vm4, %v3497_v43 }
 0x200   : > { %2636 = vmatprep.mubr.msk.bf16.mxu1 %vm3498_vm4, %v3497_v43 }
 0x204   : > { %2629 = vmatpush3.bf16.xpose.msra.mxu0 %v1099_v12  ;;  %v4079_v12 = vld [vmem:[#allocation15 + $0x38] sm:$0xff]  }
 0x205   : > { %2635 = vmatpush3.bf16.xpose.msra.mxu1 %v1164_v13  ;;  %2640 = vmatprep.subr.bf16.mxu0 %v3497_v43  ;;  %v1298_v13 = vsel %vm888_vm5, %v4079_v12, 0 }
 0x206   : > { %2660 = vmatprep.subr.bf16.mxu1 %v3497_v43 }
 0x26c   : > { %v1005_v52 = vpop.permute.xlu0 %1004 }
 0x2d1   : > { %v926_v53 = vpop.f32.mrb[0].mxu0 }
 0x2d2   : > { %v985_v54 = vpop.f32.mrb[0].mxu1  ;;  %v2618_v55 = vpop.f32.mrb[1].mxu0  ;;  %v927_v63 = vadd.f32 %v2524_v62, %v926_v53  ;;  %v4049_v62 = vld [vmem:[#allocation15 + $0x8] sm:$0xff]  }
 0x2d3   : > { %v1007_v56 = vadd.f32 %v1005_v52, %v985_v54  ;;  %v2626_v57 = vpop.f32.mrb[1].mxu1  ;;  %v929_v58 = vpop.f32.mrb[2].mxu0 }
 0x2d4   : > { %v988_v59 = vpop.f32.mrb[2].mxu1  ;;  %v2619_v60 = vpop.f32.mrb[3].mxu0  ;;  %v991_v0 = vadd.f32 %v985_v54, %v927_v63 }
 0x2d5   : > { %1009 = vrot.lane.b32.xlu0 %v1007_v56, %s3499_s17  ;;  %v2627_v61 = vpop.f32.mrb[3].mxu1  ;;  %v4044_v60 = vld [vmem:[#allocation15] sm:$0xff]  }
 0x2d6   : > { %v2531_v1 = vmul.f32 -1.442695, %v991_v0  ;;  %v1277_v61 = vsel %vm888_vm5, %v4044_v60, 0  ;;  %v4054_v0 = vld [vmem:[#allocation15 + $0x10] sm:$0xff]  }
 0x2d8   : > { %2951 = vpow2.f32 %v2531_v1  ;;  %v1283_v1 = vsel %vm888_vm5, %v4054_v0, 0 }
 0x2d9   : > { %1026 = vrot.lane.b32.xlu0 %v844_v48, %s3500_s14  ;;  %v2534_v48 = vld [vmem:[#allocation14 + $0x1] ss:$0 sm:$0xff] }
 0x2e2   : > { %v2952_v2 = vpop.eup %2951 }
 0x2e3   : > { %v995_v3 = vadd.f32 1.0, %v2952_v2  ;;  %v4059_v2 = vld [vmem:[#allocation15 + $0x18] sm:$0xff]  }
 0x2e5   : > { %2953 = vrcp.f32 %v995_v3  ;;  %v1286_v3 = vsel %vm888_vm5, %v4059_v2, 0 }
 0x2ef   : > { %v2954_v4 = vpop.eup %2953 }
 0x2f0   : > { %v1019_v18 = vsub.f32 1.0, %v2954_v4 }
 0x347   : > { %v1010_v5 = vpop.permute.xlu0 %1009 }
 0x348   : > { %v1012_v6 = vmul.f32 %v2954_v4, %v1010_v5 }
 0x34a   : > { %1014 = vrot.lane.b32.xlu1 %v1012_v6, %s3499_s17  ;;  %v4069_v6 = vld [vmem:[#allocation15 + $0x28] sm:$0xff]  }
 0x34b   : > { %v1027_v17 = vpop.permute.xlu0 %1026 }
 0x34c   : > { %v1029_v22 = vmul.f32 %v2954_v4, %v1027_v17  ;;  %v4064_v4 = vld [vmem:[#allocation15 + $0x20] sm:$0xff]  }
 0x34d   : > { %v1289_v5 = vsel %vm888_vm5, %v4064_v4, 0 }
 0x3bc   : > { %v1015_v7 = vpop.permute.xlu1 %1014 }
 0x3bd   : > { %v1017_v8 = vadd.f32 %v1015_v7, %v927_v63  ;;  %v1280_v63 = vsel %vm888_vm5, %v4049_v62, 0  ;;  %v1292_v7 = vsel %vm888_vm5, %v4069_v6, 0 }
 0x3bf   : > { %2955 = vtanh.f32 %v1017_v8  ;;  %v4074_v8 = vld [vmem:[#allocation15 + $0x30] sm:$0xff]  }
 0x3c9   : > { %v2956_v9 = vpop.eup %2955 }
 0x3ca   : > { %1021 = vrot.lane.b32.xlu1 %v2956_v9, %s3501_s1  ;;  %v1295_v9 = vsel %vm888_vm5, %v4074_v8, 0 }
 0x43c   : > { %v1022_v21 = vpop.permute.xlu1 %1021 }
 0x43d   : > { %v1024_v23 = vmul.f32 %v1022_v21, %v1019_v18 }
 0x43f   : > { %v4020_v25 = vadd.f32 %v1029_v22, %v1024_v23 }
 0x441   : > { %v4024_v26 = vpack.c.bf16 %v4020_v25, %v4020_v25 }
 0x443   : > { %v1039_v27 = vrot.slane %v4024_v26, %v4018_v24 }
 0x445   : > { %v1040_v28 = vcombine.high %v1039_v27, %v1039_v27  ;;  %v1047_v29 = vrot.slane %v1039_v27, %v4018_v24 }
 0x447   : > { %v1054_v30 = vrot.slane %v1040_v28, %v4018_v24  ;;  %v1055_v31 = vcombine.high %v1047_v29, %v1047_v29  ;;  %v2549_v28 = vld [vmem:[#allocation23] ss:$0 sm:$0xff] }
 0x449   : > { %v1058_v32 = vunpack.i.l.s16 %v1054_v30  ;;  %v1059_v33 = vunpack.i.h.s16 %v1054_v30  ;;  %v1061_v35 = vunpack.i.h.s16 %v1055_v31 }
 0x44b   : > { %v1078_v34 = vcombine.low %v1047_v29, %v1058_v32  ;;  %v2536_v36 = vpack.i.b16 %v1055_v31, %v1059_v33  ;;  %v1526_v29 = vrot.slane %v2549_v28, %v4018_v24  ;;  %v1519_v31 = vcombine.high %v2549_v28, %v2549_v28 }
 0x44d   : > { %v1085_v37 = vrot.slane %v1078_v34, %v4018_v24  ;;  %v1143_v38 = vcombine.low %v2536_v36, %v1061_v35  ;;  %v1542_v30 = vrot.slane %v1526_v29, %v4018_v24  ;;  %v1533_v33 = vrot.slane %v1519_v31, %v4018_v24 }
 0x44e   : > { %v1357_v34 = vsel %vm1356_vm7, %v4007_v10, 0  ;;  %v1510_v36 = vmul.f32 %v2549_v28, %v4020_v25 }
 0x44f   : > { %v1092_v39 = vrot.slane %v1085_v37, %v4018_v24  ;;  %v1150_v40 = vrot.slane %v1143_v38, %v4018_v24  ;;  %v1564_v32 = vcombine.high %v1542_v30, %v1542_v30  ;;  %v1549_v35 = vrot.slane %v1533_v33, %v4018_v24 }
 0x450   : > { %v1535_v10 = vcombine.high %v1533_v33, %v1533_v33 }
 0x451   : > { %1093 = vrot.lane.b32.xlu1 %v1092_v39, %s3501_s1  ;;  %v1157_v41 = vrot.slane %v1150_v40, %v4018_v24  ;;  %v1505_v39 = vmul.f32 %v2549_v28, %v3991_v47 }
 0x452   : > { %v1563_v40 = vrot.slane %v1535_v10, %v4018_v24 }
 0x453   : > { %1158 = vrot.lane.b32.xlu0 %v1157_v41, %s3501_s1  ;;  %v1507_v41 = vsel %vm1506_vm8, %v1505_v39, 0.0 }
 0x4c3   : > { %v1094_v42 = vpop.permute.xlu1 %1093 }
 0x4c4   : > { %2631 = vmatmul.mubr.msk.bf16.vlgmr.msra.gmra.mrb[4].mxu0 %vm888_vm5, %v1094_v42 }
 0x4c5   : > { %v1159_v44 = vpop.permute.xlu0 %1158  ;;  %2656 = vmatprep.mubr.msk.bf16.mxu0 %vm3498_vm4, %v3497_v43  ;;  %2641 = vmatpush3.bf16.xpose.msra.mxu0 %v1277_v61 }
 0x4c6   : > { %2637 = vmatmul.mubr.msk.bf16.vlgmr.msra.gmra.mrb[4].mxu1 %vm888_vm5, %v1159_v44  ;;  %2642 = vmatprep.subr.bf16.mxu0 %v3497_v43 }
 0x4c7   : > { %2662 = vmatprep.mubr.msk.bf16.mxu1 %vm3498_vm4, %v3497_v43  ;;  %2661 = vmatpush3.bf16.msra.mxu1 %v1357_v34 }
 0x4c8   : > { %2666 = vmatprep.subr.bf16.mxu1 %v3497_v43 }
 0x4cd   : > { %2643 = vmatpush3.bf16.xpose.msra.mxu0 %v1280_v63 }
 0x4ce   : > { %2644 = vmatprep.subr.bf16.mxu0 %v3497_v43 }
 0x4d5   : > { %2645 = vmatpush3.bf16.xpose.msra.mxu0 %v1283_v1 }
 0x4d6   : > { %2646 = vmatprep.subr.bf16.mxu0 %v3497_v43 }
 0x4dd   : > { %2647 = vmatpush3.bf16.xpose.msra.mxu0 %v1286_v3 }
 0x4de   : > { %2648 = vmatprep.subr.bf16.mxu0 %v3497_v43 }
 0x4e5   : > { %2649 = vmatpush3.bf16.xpose.msra.mxu0 %v1289_v5 }
 0x4e6   : > { %2650 = vmatprep.subr.bf16.mxu0 %v3497_v43 }
 0x4ed   : > { %2651 = vmatpush3.bf16.xpose.msra.mxu0 %v1292_v7 }
 0x4ee   : > { %2652 = vmatprep.subr.bf16.mxu0 %v3497_v43 }
 0x4f5   : > { %2653 = vmatpush3.bf16.xpose.msra.mxu0 %v1295_v9 }
 0x4f6   : > { %2654 = vmatprep.subr.bf16.mxu0 %v3497_v43 }
 0x4fd   : > { %2655 = vmatpush3.bf16.xpose.msra.mxu0 %v1298_v13 }
 0x597   : > { %v1135_v46 = vpop.f32.mrb[4].mxu0 }
 0x598   : > { %v1136_v49 = vadd.f32 %v2533_v45, %v1135_v46  ;;  %v2632_v50 = vpop.f32.mrb[5].mxu0 }
 0x599   : > { %v1138_v51 = vpop.f32.mrb[6].mxu0  ;;  %v1200_v52 = vpop.f32.mrb[4].mxu1 }
 0x59a   : > { %v1201_v53 = vadd.f32 %v2534_v48, %v1200_v52  ;;  %v2633_v54 = vpop.f32.mrb[7].mxu0  ;;  %v2638_v55 = vpop.f32.mrb[5].mxu1  ;;  %v1207_v56 = vsel %vm1206_vm6, %v1136_v49, -inf  ;;  %v1402_v51 = vsel %vm1356_vm7, %v4009_v11, 0  ;;  %v1656_v11 = vld [vmem:[#allocation4 + $0x4] sm:$0xf] }
 0x59b   : > { %v1203_v57 = vpop.f32.mrb[6].mxu1  ;;  %1208 = vmax.xlane.f32.xlu1 %v1207_v56  ;;  %v1655_v56 = vld [vmem:[#allocation4] sm:$0xf] }
 0x59c   : > { %v2639_v58 = vpop.f32.mrb[7].mxu1  ;;  %v1210_v59 = vsel %vm1206_vm6, %v1201_v53, -inf }
 0x59d   : > { %1211 = vmax.xlane.f32.xlu0 %v1210_v59  ;;  %v1658_v58 = vsel %vm1356_vm7, %v1655_v56, 0  ;;  %v1701_v59 = vsel %vm1356_vm7, %v1656_v11, 0 }
 0x628   : > { %v1209_v14 = vpop.xlane.xlu1 %1208 }
 0x629   : > { %v1213_v15 = vsub.f32 %v1136_v49, %v1209_v14 }
 0x62a   : > { %v1212_v17 = vpop.xlane.xlu0 %1211 }
 0x62b   : > { %v1215_v18 = vmul.f32 1.442695, %v1213_v15  ;;  %v1214_v19 = vsub.f32 %v1201_v53, %v1212_v17 }
 0x62d   : > { %2957 = vpow2.f32 %v1215_v18  ;;  %v1217_v20 = vmul.f32 1.442695, %v1214_v19 }
 0x62f   : > { %2959 = vpow2.f32 %v1217_v20 }
 0x637   : > { %v2958_v21 = vpop.eup %2957 }
 0x638   : > { %v1219_v22 = vsel %vm1206_vm6, %v2958_v21, 0.0 }
 0x639   : > { %v2960_v23 = vpop.eup %2959  ;;  %1220 = vadd.xlane.f32.xlu0 %v1219_v22 }
 0x63a   : > { %v1222_v27 = vsel %vm1206_vm6, %v2960_v23, 0.0 }
 0x63b   : > { %1223 = vadd.xlane.f32.xlu1 %v1222_v27 }
 0x64c   : > { %1566 = vrot.lane.b32.xlu1 %v1542_v30, %s3499_s17 }
 0x64f   : > { %1231 = vrot.lane.b32.xlu0 %v4024_v26, %s3501_s1  ;;  %v1534_v26 = vcombine.high %v1526_v29, %v1526_v29 }
 0x651   : > { %v1556_v37 = vrot.slane %v1534_v26, %v4018_v24 }
 0x653   : > { %1570 = vrot.lane.b32.xlu0 %v1564_v32, %s3499_s17  ;;  %1568 = vrot.lane.b32.xlu1 %v1556_v37, %s3499_s17  ;;  %v1565_v38 = vcombine.high %v1556_v37, %v1556_v37 }
 0x657   : > { %1574 = vrot.lane.b32.xlu0 %v1549_v35, %s3499_s17  ;;  %1572 = vrot.lane.b32.xlu1 %v1565_v38, %s3499_s17 }
 0x65b   : > { %1512 = vrot.lane.b32.xlu0 %v1510_v36, %s3501_s1  ;;  %1576 = vrot.lane.b32.xlu1 %v1563_v40, %s3499_s17 }
 0x67a   : > { %1508 = vadd.xlane.f32.xlu0 %v1507_v41 }
 0x6c6   : > { %v1221_v42 = vpop.xlane.xlu0 %1220 }
 0x6c7   : > { %2961 = vrcp.f32 %v1221_v42 }
 0x6c8   : > { %v1224_v44 = vpop.xlane.xlu1 %1223 }
 0x6c9   : > { %2963 = vrcp.f32 %v1224_v44 }
 0x6ca   : > { %v1232_v45 = vpop.permute.xlu0 %1231 }
 0x6cb   : > { %2657 = vmatmul.mubr.msk.bf16.vlgmr.msra.gmra.mrb[8].mxu0 %vm888_vm5, %v1232_v45 }
 0x6cc   : > { %v1567_v1 = vpop.permute.xlu1 %1566 }
 0x6ce   : > { %v4107_v46 = vpop.permute.xlu0 %1570 }
 0x6d0   : > { %v1569_v3 = vpop.permute.xlu1 %1568 }
 0x6d1   : > { %v2962_v47 = vpop.eup %2961 }
 0x6d2   : > { %v1226_v48 = vmul.f32 %v2962_v47, %v2958_v21  ;;  %v4109_v49 = vpop.permute.xlu0 %1574 }
 0x6d3   : > { %v2964_v52 = vpop.eup %2963 }
 0x6d4   : > { %v1229_v50 = vpack.c.bf16 %v1226_v48, %v1226_v48  ;;  %v1228_v55 = vmul.f32 %v2964_v52, %v2960_v23 }
 0x6d6   : > { %2663 = vmatmul.mubr.msk.bf16.vlgmr.msra.gmra.mrb[8].mxu1 %vm1352_vm9, %v1229_v50  ;;  %v1513_v53 = vpop.permute.xlu0 %1512  ;;  %v1230_v57 = vpack.c.bf16 %v1228_v55, %v1228_v55 }
 0x6d7   : > { %2667 = vmatpush3.bf16.msra.mxu1 %v1402_v51  ;;  %v1515_v54 = vsel %vm1506_vm8, %v1513_v53, 0.0  ;;  %2668 = vmatprep.mubr.msk.bf16.mxu1 %vm3498_vm4, %v3497_v43 }
 0x6d8   : > { %1516 = vadd.xlane.f32.xlu0 %v1515_v54  ;;  %2672 = vmatprep.subr.bf16.mxu1 %v3497_v43 }
 0x6de   : > { %2669 = vmatmul.mubr.msk.bf16.vlgmr.msra.gmra.mrb[12].mxu1 %vm1352_vm9, %v1230_v57 }
 0x6df   : > { %2673 = vmatpush3.bf16.msra.mxu1 %v1658_v58  ;;  %2674 = vmatprep.mubr.msk.bf16.mxu1 %vm3498_vm4, %v3497_v43 }
 0x6e0   : > { %2678 = vmatprep.subr.bf16.mxu1 %v3497_v43 }
 0x6e6   : > { %2675 = vmatmul.mubr.msk.bf16.vlgmr.msra.gmra.mrb[16].mxu1 %vm1352_vm9, %v1229_v50 }
 0x6e7   : > { %2679 = vmatpush3.bf16.msra.mxu1 %v1701_v59  ;;  %2680 = vmatprep.mubr.msk.bf16.mxu1 %vm3498_vm4, %v3497_v43 }
 0x6e8   : > { %2684 = vmatprep.subr.bf16.mxu1 %v3497_v43 }
 0x6ee   : > { %2681 = vmatmul.mubr.msk.bf16.vlgmr.msra.gmra.mrb[20].mxu1 %vm1352_vm9, %v1230_v57 }
 0x6ef   : > { %2685 = vmatpush3.bf16.msra.mxu1 %v4044_v60  ;;  %2700 = vmatprep.mubr.msk.bf16.mxu1 %vm3498_vm4, %v3497_v43 }
 0x6f0   : > { %2686 = vmatprep.subr.bf16.mxu1 %v3497_v43 }
 0x6f3   : > { %2687 = vmatpush3.bf16.msra.mxu1 %v4049_v62 }
 0x6f4   : > { %2688 = vmatprep.subr.bf16.mxu1 %v3497_v43 }
 0x6f7   : > { %2689 = vmatpush3.bf16.msra.mxu1 %v4054_v0 }
 0x6f8   : > { %2690 = vmatprep.subr.bf16.mxu1 %v3497_v43 }
 0x6fb   : > { %2691 = vmatpush3.bf16.msra.mxu1 %v4059_v2 }
 0x6fc   : > { %2692 = vmatprep.subr.bf16.mxu1 %v3497_v43 }
 0x6ff   : > { %2693 = vmatpush3.bf16.msra.mxu1 %v4064_v4 }
 0x700   : > { %2694 = vmatprep.subr.bf16.mxu1 %v3497_v43 }
 0x703   : > { %2695 = vmatpush3.bf16.msra.mxu1 %v4069_v6 }
 0x704   : > { %2696 = vmatprep.subr.bf16.mxu1 %v3497_v43 }
 0x707   : > { %2697 = vmatpush3.bf16.msra.mxu1 %v4074_v8 }
 0x708   : > { %2698 = vmatprep.subr.bf16.mxu1 %v3497_v43 }
 0x70b   : > { %2699 = vmatpush3.bf16.msra.mxu1 %v4079_v12  ;;  %v1573_v12 = vpop.permute.xlu1 %1572 }
 0x70f   : > { %v1577_v28 = vpop.permute.xlu1 %1576 }
 0x79e   : > { %v4146_v60 = vpop.f32.mrb[8].mxu0 }
 0x79f   : > { %v2658_v61 = vpop.f32.mrb[9].mxu0  ;;  %v1341_v62 = vsel %vm1340_vm10, %v4146_v60, -inf }
 0x7a0   : > { %1342 = vmax.xlane.f32.xlu1 %v1341_v62  ;;  %v1337_v63 = vpop.f32.mrb[10].mxu0 }
 0x7a1   : > { %v2659_v0 = vpop.f32.mrb[11].mxu0 }
 0x7a9   : > { %v1393_v2 = vpop.f32.mrb[8].mxu1 }
 0x7aa   : > { %v1452_v4 = vrot.slane %v1393_v2, %v4018_v24  ;;  %v2664_v5 = vpop.f32.mrb[9].mxu1 }
 0x7ab   : > { %v1396_v6 = vpop.f32.mrb[10].mxu1 }
 0x7ac   : > { %v1453_v43 = vcombine.high %v1452_v4, %v1452_v4  ;;  %v2665_v7 = vpop.f32.mrb[11].mxu1  ;;  %v4152_v8 = vrot.slane %v1452_v4, %v4018_v24 }
 0x7ad   : > { %v3503_v7 = vmov 0  }
 0x7ae   : > { %v4155_v9 = vrot.slane %v1453_v43, %v4018_v24  ;;  %v4159_v13 = vcombine.high %v4152_v8, %v4152_v8  ;;  %v1584_v20 = vmul.f32 %v1567_v1, %v4152_v8  ;;  %2937 = vset.pattern.permute.xlu1 %v3503_v7  ;;  %2938 = vset.pattern.permute.xlu0 %v3503_v7 }
 0x7b0   : > { %v1585_v15 = vmul.f32 %v1569_v3, %v4155_v9  ;;  %v1586_v27 = vmul.f32 %v4107_v46, %v4159_v13 }
 0x7b1   : > { %v1438_v14 = vpop.f32.mrb[12].mxu1 }
 0x7b2   : > { %v1475_v17 = vrot.slane %v1438_v14, %v4018_v24  ;;  %v2670_v18 = vpop.f32.mrb[13].mxu1  ;;  %v1596_v29 = vcombine.low %v1584_v20, %v1585_v15 }
 0x7b3   : > { %v1441_v19 = vpop.f32.mrb[14].mxu1 }
 0x7b4   : > { %v1476_v21 = vcombine.high %v1475_v17, %v1475_v17  ;;  %v4165_v22 = vrot.slane %v1475_v17, %v4018_v24  ;;  %v2671_v23 = vpop.f32.mrb[15].mxu1  ;;  %v1605_v26 = vrot.slane %v1596_v29, %v4018_v24  ;;  %v1509_v19 = vpop.xlane.xlu0 %1508 }
 0x7b5   : > { %v2550_v23 = vld [vmem:[#allocation5] ss:$0 sm:$0xff] }
 0x7b6   : > { %v4170_v30 = vrot.slane %v1476_v21, %v4018_v24  ;;  %v1587_v31 = vmul.f32 %v1573_v12, %v4165_v22  ;;  %v4175_v32 = vcombine.high %v4165_v22, %v4165_v22 }
 0x7b8   : > { %v1597_v33 = vcombine.low %v1586_v27, %v1587_v31  ;;  %v1588_v34 = vmul.f32 %v4109_v49, %v4170_v30  ;;  %v1589_v35 = vmul.f32 %v1577_v28, %v4175_v32  ;;  %v1517_v20 = vpop.xlane.xlu0 %1516 }
 0x7b9   : > { %v1694_v36 = vpop.f32.mrb[16].mxu1  ;;  %v1518_v21 = vadd.f32 %v1517_v20, %v1509_v19  ;;  %v3504_v19 = vmov 1.0|1.0  }
 0x7ba   : > { %v1612_v37 = vrot.slane %v1597_v33, %v4018_v24  ;;  %v1598_v38 = vcombine.low %v1588_v34, %v1589_v35  ;;  %v1751_v10 = vrot.slane %v1694_v36, %v4018_v24  ;;  %v2676_v39 = vpop.f32.mrb[17].mxu1 }
 0x7bb   : > { %v1697_v40 = vpop.f32.mrb[18].mxu1 }
 0x7bc   : > { %v1619_v41 = vrot.slane %v1598_v38, %v4018_v24  ;;  %v1752_v42 = vcombine.high %v1751_v10, %v1751_v10  ;;  %v2677_v44 = vpop.f32.mrb[19].mxu1  ;;  %v1620_v45 = vcombine.low %v1605_v26, %v1612_v37  ;;  %v1759_v48 = vrot.slane %v1751_v10, %v4018_v24 }
 0x7be   : > { %v1627_v46 = vrot.slane %v1620_v45, %v4018_v24  ;;  %v1634_v47 = vrot.slane %v1619_v41, %v4018_v24  ;;  %v1766_v49 = vrot.slane %v1752_v42, %v4018_v24  ;;  %v1767_v56 = vcombine.high %v1759_v48, %v1759_v48 }
 0x7c0   : > { %v1635_v50 = vcombine.low %v1627_v46, %v1634_v47  ;;  %v1803_v57 = vcombine.low %v1759_v48, %v1766_v49 }
 0x7c1   : > { %v1737_v51 = vpop.f32.mrb[20].mxu1 }
 0x7c2   : > { %v1774_v52 = vrot.slane %v1737_v51, %v4018_v24  ;;  %v2682_v53 = vpop.f32.mrb[21].mxu1  ;;  %v1637_v54 = vsel %vm1506_vm8, %v1635_v50, 0.0  ;;  %v1812_v0 = vrot.slane %v1803_v57, %v4018_v24 }
 0x7c3   : > { %v1740_v55 = vpop.f32.mrb[22].mxu1  ;;  %1638 = vadd.xlane.f32.xlu1 %v1637_v54 }
 0x7c4   : > { %v1775_v58 = vcombine.high %v1774_v52, %v1774_v52  ;;  %v1782_v11 = vrot.slane %v1774_v52, %v4018_v24  ;;  %v2683_v59 = vpop.f32.mrb[23].mxu1 }
 0x7c6   : > { %v1789_v61 = vrot.slane %v1775_v58, %v4018_v24  ;;  %v1790_v62 = vcombine.high %v1782_v11, %v1782_v11  ;;  %v1804_v63 = vcombine.low %v1767_v56, %v1782_v11 }
 0x7c8   : > { %v1805_v1 = vcombine.low %v1789_v61, %v1790_v62  ;;  %v1819_v2 = vrot.slane %v1804_v63, %v4018_v24  ;;  %v1847_v63 = vand.u32 127, %v1036_v16 }
 0x7ca   : > { %v1826_v3 = vrot.slane %v1805_v1, %v4018_v24  ;;  %v1827_v4 = vcombine.low %v1812_v0, %v1819_v2 }
 0x7cc   : > { %v1834_v5 = vrot.slane %v1827_v4, %v4018_v24  ;;  %v1841_v6 = vrot.slane %v1826_v3, %v4018_v24 }
 0x7ce   : > { %v1842_v43 = vcombine.low %v1834_v5, %v1841_v6 }
 0x82d   : > { %v1343_v12 = vpop.xlane.xlu1 %1342 }
 0x82e   : > { %v1344_v14 = vsub.f32 %v4146_v60, %v1343_v12 }
 0x830   : > { %v1345_v15 = vmul.f32 1.442695, %v1344_v14 }
 0x832   : > { %2965 = vpow2.f32 %v1345_v15 }
 0x83c   : > { %v2966_v17 = vpop.eup %2965 }
 0x83d   : > { %v1347_v18 = vsel %vm1340_vm10, %v2966_v17, 0.0 }
 0x83e   : > { %1348 = vadd.xlane.f32.xlu0 %v1347_v18 }
 0x850   : > { %v1639_v27 = vpop.xlane.xlu1 %1638 }
 0x851   : > { %v1640_v28 = vadd.f32 %v1639_v27, %v1518_v21 }
 0x853   : > { %v1648_v29 = vadd.f32 %v2550_v23, %v1640_v28  ;;  %v2028_v28 = vld [vmem:[#allocation24 + $0x8] sm:$0xff] (!%p2519_p13) }
 0x855   : > { %v2551_v31 = vmul.f32 -1.442695, %v1648_v29  ;;  %v2029_v29 = vld [vmem:[#allocation24 + $0x10] sm:$0xff] (!%p2519_p13) }
 0x857   : > { %2967 = vpow2.f32 %v2551_v31  ;;  %v2038_v31 = vcombine.low (!%p2519_p13), %v4152_v8, %v4155_v9 }
 0x861   : > { %v2968_v33 = vpop.eup %2967 }
 0x862   : > { %v1652_v34 = vadd.f32 1.0, %v2968_v33  ;;  %v3505_v33 = vmov (!%p2519_p13), 0.0|0.0  }
 0x863   : > { %2715 = vmatprep.subr.bf16.mxu0 (!%p2519_p13), %v3505_v33 }
 0x864   : > { %2969 = vrcp.f32 %v1652_v34 }
 0x86e   : > { %v2970_v35 = vpop.eup %2969 }
 0x86f   : > { %1793 = vperm.xlu1 %2937, %v2970_v35   ;;  %v1797_v60 = vsub.f32 1.0, %v2970_v35  ;;  %v2030_v35 = vld [vmem:[#allocation24 + $0x18] sm:$0xff] (!%p2519_p13) }
 0x871   : > { %1800 = vperm.xlu0 %2938, %v1797_v60   ;;  %v3507_v60 = vmov (!%p2519_p13), 0.0  }
 0x872   : > { %2712 = vmatprep.mubr.msk.f32.mxu0 (!%p2519_p13), %vm3506_vm15, %v3507_v60 }
 0x8cb   : > { %v1349_v36 = vpop.xlane.xlu0 %1348 }
 0x8cc   : > { %2971 = vrcp.f32 %v1349_v36  ;;  %v2039_v36 = vcombine.low (!%p2519_p13), %v4159_v13, %v4165_v22  ;;  %v2560_v13 = vld [vmem:[#allocation26] ss:$0 sm:$0xff] (!%p2519_p13) }
 0x8d6   : > { %v2972_v26 = vpop.eup %2971 }
 0x8d7   : > { %v1351_v38 = vmul.f32 %v2972_v26, %v2966_v17  ;;  %v2040_v26 = vcombine.low (!%p2519_p13), %v4170_v30, %v4175_v32 }
 0x8d9   : > { %v2061_v8 = vrot.slane (!%p2519_p13), %v2040_v26, %v4018_v24 }
 0x8ee   : > { %v1794_v37 = vpop.permute.xlu1 %1793 }
 0x8ef   : > { %v1796_v39 = vmul.f32 %v1794_v37, %v1351_v38  ;;  %v2047_v37 = vrot.slane (!%p2519_p13), %v2038_v31, %v4018_v24  ;;  %v2719_v38 = vpack.c.bf16 (!%p2519_p13), %v2030_v35, %v2029_v29 }
 0x8f0   : > { %v1801_v10 = vpop.permute.xlu0 %1800 }
 0x8f1   : > { %v1844_v40 = vmul.f32 %v1842_v43, %v1801_v10  ;;  %v2054_v10 = vrot.slane (!%p2519_p13), %v2039_v36, %v4018_v24 }
 0x8f3   : > { %v1845_v41 = vadd.f32 %v1844_v40, %v1796_v39  ;;  %v2062_v9 = vcombine.low (!%p2519_p13), %v2047_v37, %v2054_v10  ;;  %v2076_v39 = vrot.slane (!%p2519_p13), %v2061_v8, %v4018_v24 }
 0x8f5   : > { %v1921_v42 = vcombine.high %v1845_v41, %v1845_v41  ;;  %v1928_v44 = vrot.slane %v1845_v41, %v4018_v24  ;;  %v1848_v45 = vsel %vm1340_vm10, %v1845_v41, -inf  ;;  %v2069_v40 = vrot.slane (!%p2519_p13), %v2062_v9, %v4018_v24 }
 0x8f6   : > { %1849 = vmax.xlane.f32.xlu1 %v1848_v45 }
 0x8f7   : > { %v1935_v46 = vrot.slane %v1921_v42, %v4018_v24  ;;  %v1936_v47 = vcombine.high %v1928_v44, %v1928_v44  ;;  %v1944_v48 = vrot.slane %v1928_v44, %v4018_v24 }
 0x8f9   : > { %v1937_v49 = vcombine.high %v1935_v46, %v1935_v46  ;;  %v1958_v50 = vrot.slane %v1936_v47, %v4018_v24  ;;  %v1966_v51 = vcombine.high %v1944_v48, %v1944_v48  ;;  %v1951_v52 = vrot.slane %v1935_v46, %v4018_v24 }
 0x8fb   : > { %v1965_v53 = vrot.slane %v1937_v49, %v4018_v24  ;;  %v1967_v54 = vcombine.high %v1958_v50, %v1958_v50  ;;  %v1968_v55 = vcombine.low %v1944_v48, %v1958_v50  ;;  %v1982_v57 = vrot.slane %v1966_v51, %v4018_v24 }
 0x8fd   : > { %v1975_v56 = vrot.slane %v1968_v55, %v4018_v24  ;;  %v1991_v58 = vcombine.low %v1967_v54, %v1951_v52  ;;  %v2005_v61 = vrot.slane %v1965_v53, %v4018_v24 }
 0x8ff   : > { %v1983_v11 = vcombine.low %v1975_v56, %v1982_v57  ;;  %v1998_v59 = vrot.slane %v1991_v58, %v4018_v24 }
 0x901   : > { %v2006_v62 = vcombine.low %v1998_v59, %v2005_v61  ;;  %2557 = vst.sshfl [vmem:[%s3976_s22] sm:$0x15 pattern:$0x73625140] %v1983_v11 }
 0x903   : > { %2558 = vst.sshfl [vmem:[%s3976_s22 + $0x4] sm:$0x15 pattern:$0x73625140] %v2006_v62 }
 0x983   : > { %v1850_v0 = vpop.xlane.xlu1 %1849 }
 0x984   : > { %vm1851_vm11 = vcmp.eq.f32.partialorder %v1845_v41, %v1850_v0  ;;  %v2077_v41 = vcombine.low (!%p2519_p13), %v2069_v40, %v2076_v39 }
 0x985   : > { %v1852_v1 = vsel %vm1851_vm11, %v1847_v63, 128 }
 0x986   : > { %v1853_v2 = vsel %vm1340_vm10, %v1852_v1, 2147483647 }
 0x987   : > { %v1855_v3 = vshra.s32 %v1853_v2, 16  ;;  %v1854_v5 = vand.u32 65535, %v1853_v2 }
 0x989   : > { %v1857_v4 = vcvt.s32.f32 %v1855_v3  ;;  %v1856_v43 = vcvt.s32.f32 %v1854_v5 }
 0x98b   : > { %1858 = vmin.xlane.f32.xlu0 %v1857_v4 }
 0xa18   : > { %v1859_v6 = vpop.xlane.xlu0 %1858 }
 0xa19   : > { %vm1860_vm12 = vcmp.eq.f32.partialorder %v1857_v4, %v1859_v6  ;;  %v1865_v12 = vcvt.f32.s32 %v1859_v6 }
 0xa1a   : > { %v1861_v7 = vsel %vm1860_vm12, %v1856_v43, inf }
 0xa1b   : > { %1862 = vmin.xlane.f32.xlu1 %v1861_v7  ;;  %v1866_v16 = vshll.u32 %v1865_v12, 16 }
 0xa2c   : > { %2020 = vrot.lane.b32.xlu1 %v4020_v25, %s3501_s1  ;;  %v2027_v25 = vld [vmem:[#allocation24] sm:$0xff] (!%p2519_p13) }
 0xa2d   : > { %v2716_v34 = vpack.c.bf16 (!%p2519_p13), %v2028_v28, %v2027_v25 }
 0xa2f   : > { %2717 = vmatpush3.bf16.msra.mxu0 (!%p2519_p13), %v2716_v34 }
 0xa30   : > { %2718 = vmatprep.subr.bf16.mxu0 (!%p2519_p13), %v3505_v33 }
 0xa33   : > { %2720 = vmatpush3.bf16.msra.mxu0 (!%p2519_p13), %v2719_v38 }
 0xa36   : > { %2713 = vmatmul.mubr.msk.f32.vlgmr.msra.gmra.mrb[0].mxu0 (!%p2519_p13), %vm888_vm5, %v2077_v41 }
 0xaa8   : > { %v1863_v14 = vpop.xlane.xlu1 %1862 }
 0xaa9   : > { %v1864_v15 = vcvt.f32.s32 %v1863_v14 }
 0xaab   : > { %v1867_v17 = vadd.s32 %v1866_v16, %v1864_v15 }
 0xaac   : > { %v2021_v18 = vpop.permute.xlu1 %2020 }
 0xaad   : > { %vm1868_vm13 = vcmp.eq.s32.totalorder %v1847_v63, %v1867_v17  ;;  %2023 = vst.msk [vmem:[#allocation3] sm:$0x3f] %vm1506_vm8, %v2021_v18 }
 0xaae   : > { %vm2555_vm14 = vmpackc.low %vm1868_vm13, %vm1868_vm13 }
 0xaaf   : > { %2701 = vmatmul.mubr.msk.bf16.vlgmr.msra.gmra.mrb[24].mxu1 %vm2555_vm14, %v3504_v19 }
 0xb09   : > { %v2146_v22 = vpop.f32.mrb[0].mxu0 (!%p2519_p13) }
 0xb0a   : > { %v2147_v30 = vadd.f32 (!%p2519_p13), %v2560_v13, %v2146_v22  ;;  %v2714_v32 = vpop.f32.mrb[1].mxu0 (!%p2519_p13) }
 0xb0c   : > { %v2151_v42 = vcombine.high (!%p2519_p13), %v2147_v30, %v2147_v30  ;;  %v2158_v44 = vrot.slane (!%p2519_p13), %v2147_v30, %v4018_v24 }
 0xb0e   : > { %v2165_v45 = vrot.slane (!%p2519_p13), %v2151_v42, %v4018_v24  ;;  %v2166_v46 = vcombine.high (!%p2519_p13), %v2158_v44, %v2158_v44  ;;  %v2174_v47 = vrot.slane (!%p2519_p13), %v2158_v44, %v4018_v24 }
 0xb10   : > { %v2167_v48 = vcombine.high (!%p2519_p13), %v2165_v45, %v2165_v45  ;;  %v2188_v49 = vrot.slane (!%p2519_p13), %v2166_v46, %v4018_v24  ;;  %v2196_v50 = vcombine.high (!%p2519_p13), %v2174_v47, %v2174_v47  ;;  %v2181_v51 = vrot.slane (!%p2519_p13), %v2165_v45, %v4018_v24 }
 0xb12   : > { %v2195_v52 = vrot.slane (!%p2519_p13), %v2167_v48, %v4018_v24  ;;  %v2197_v53 = vcombine.high (!%p2519_p13), %v2188_v49, %v2188_v49  ;;  %v2198_v54 = vcombine.low (!%p2519_p13), %v2174_v47, %v2188_v49  ;;  %v2212_v56 = vrot.slane (!%p2519_p13), %v2196_v50, %v4018_v24 }
 0xb14   : > { %v2205_v55 = vrot.slane (!%p2519_p13), %v2198_v54, %v4018_v24  ;;  %v2221_v57 = vcombine.low (!%p2519_p13), %v2197_v53, %v2181_v51  ;;  %v2235_v59 = vrot.slane (!%p2519_p13), %v2195_v52, %v4018_v24 }
 0xb16   : > { %v2213_v58 = vcombine.low (!%p2519_p13), %v2205_v55, %v2212_v56  ;;  %v2228_v11 = vrot.slane (!%p2519_p13), %v2221_v57, %v4018_v24 }
 0xb18   : > { %v2220_v61 = vrot.slane (!%p2519_p13), %v2213_v58, %v4018_v24  ;;  %v2236_v62 = vcombine.low (!%p2519_p13), %v2228_v11, %v2235_v59 }
 0xb1a   : > { %v2243_v63 = vrot.slane (!%p2519_p13), %v2236_v62, %v4018_v24  ;;  %2247 = vst.msk [vmem:[#allocation28] sm:$0x7] (!%p2519_p13), %vm2246_vm0, %v2220_v61 }
 0xb1c   : > { %2248 = vst.msk [vmem:[#allocation28 + $0x4] sm:$0x7] (!%p2519_p13), %vm2246_vm0, %v2243_v63 }
 0xb7f   : > { %2026 = sbr.rel (%p2519_p13) target bundleno = 2950 (0xb86), region = 136 }
 0xb82   : > { %v1914_v20 = vpop.f32.mrb[24].mxu1 }
 0xb83   : > { %2018 = vst.msk [vmem:[#allocation2] sm:$0x3f] %vm1506_vm8, %v1914_v20  ;;  %v2702_v21 = vpop.f32.mrb[25].mxu1 }
 0xb84   : > { %v1917_v23 = vpop.f32.mrb[26].mxu1 }
 0xb85   : > { %v2703_v27 = vpop.f32.mrb[27].mxu1 }
 0xb86 PF: > { %s4404_s28 = sld [smem:[#allocation42_spill]]  ;;  %s4406_s24 = sld [smem:[#allocation47_spill]] }
 0xb87   : > { %s4407_s18 = sld [smem:[#allocation52_spill]]  ;;  %s2265_s11 = sshll.u32 %s3976_s22, 4  ;;  %s4251_s11 = int_to_ptr.vmem [resolvable:$true] %s2265_s11 }
 0xb88   : > { %s4255_s23 = scalar_lea.sflag [#allocation8], %s699_s19  ;;  %s3337_s27 = scalar_lea.vmem %s4251_s11, 128 }
 0xb89   : > { %p3338_p1 = scmp.ne.s32.totalorder %s4251_s11, %s3337_s27  ;;  %s3508_s26 = smov [#allocation27]  }
 0xb8a   : > { %s3341_s25 = sshll.u32 %s3508_s26, 4  ;;  %s3342_s25 = int_to_ptr.vmem [resolvable:$false] %s3341_s25 }
 0xb8b   : > { %s3343_s14 = scalar_lea.vmem %s3342_s25, 256  ;;  %p3344_p0 = scmp.lt.s32.totalorder %s4251_s11, %s3342_s25 }
 0xb8c   : > { %s2563_s29 = sshll.u32 %s4404_s28, 6  ;;  %p4408_p8 = scmp.ne.s32.totalorder %s4406_s24, 0 }
 0xb8d   : > { %s4248_s16 = scalar_lea.hbm %s4407_s18, %s2563_s29  ;;  %p3345_p3 = scmp.lt.s32.totalorder %s3343_s14, %s3337_s27 }
 0xb8e   : > { %p3339_p10 = pnand %p3338_p1, %p4408_p8 }
 0xb8f   : > { %p3346_p5 = por %p3345_p3, %p3344_p0 }
 0xb90   : > { %p3340_p11 = pneg %p3339_p10 }
 0xb92   : > { %p3347_p6 = pnand %p3346_p5, %p3340_p11 }
 0xb94   : > { %3350 = shalt.err (!%p3347_p6)
}
 0xb95   : > { %s3351_s19 = scalar_lea.hbm %s4248_s16, 128  ;;  %s3355_s30 = scalar_lea.hbm %s4407_s18, 512 }
 0xb96   : > { %p3352_p7 = scmp.ne.s32.totalorder %s4248_s16, %s3351_s19  ;;  %p3356_p2 = scmp.lt.u32.totalorder %s4248_s16, %s4407_s18 }
 0xb97   : > { %p3357_p4 = scmp.lt.u32.totalorder %s3355_s30, %s3351_s19  ;;  %p3359_p1 = scmp.lt.u32.totalorder %s3351_s19, %s4248_s16 }
 0xb98   : > { %p3353_p9 = pnand %p3352_p7, %p4408_p8 }
 0xb99   : > { %p3358_p13 = por %p3357_p4, %p3356_p2 }
 0xb9a   : > { %p3354_p12 = pneg %p3353_p9 }
 0xb9b   : > { %p3360_p10 = por %p3359_p1, %p3358_p13 }
 0xb9d   : > { %p3361_p11 = pnand %p3360_p10, %p3354_p12 }
 0xb9f   : > { %3364 = shalt.err (!%p3361_p11)
}
 0xba0   : > { %s3509_s29 = smov 256   ;;  %s4409_s15 = sld [smem:[#allocation45_spill]] }
 0xba1   : > { %s3510_s21 = smov 4   ;;  %s3511_s27 = smov [#allocation28]  }
 0xba2   : > { %2773 = dma.vmem_to_hbm [thread:$0]  (%p4408_p8), %s4251_s11, 128, %s4248_s16, %s4255_s23, %s3499_s17, %s3509_s29, %s3510_s21  }
 0xba3   : > { %s2281_s26 = sshll.u32 %s3511_s27, 4  ;;  %s2282_s26 = int_to_ptr.vmem [resolvable:$true] %s2281_s26 }
 0xba4   : > { %s3365_s25 = scalar_lea.vmem %s2282_s26, 128  ;;  %p3372_p7 = scmp.lt.s32.totalorder %s2282_s26, %s2282_s26 }
 0xba5   : > { %p3366_p0 = scmp.ne.s32.totalorder %s2282_s26, %s3365_s25  ;;  %p3373_p9 = scmp.lt.s32.totalorder %s3365_s25, %s3365_s25 }
 0xba6   : > { %p4410_p3 = scmp.ne.s32.totalorder %s4409_s15, 0 }
 0xba7   : > { %p3374_p12 = por %p3373_p9, %p3372_p7 }
 0xba8   : > { %p3367_p5 = pnand %p3366_p0, %p4410_p3 }
 0xbaa   : > { %p3368_p6 = pneg %p3367_p5 }
 0xbac   : > { %p3375_p2 = pnand %p3374_p12, %p3368_p6 }
 0xbae   : > { %3378 = shalt.err (!%p3375_p2)
}
 0xbaf   : > { %s4411_s22 = sld [smem:[#allocation53_spill]] }
 0xbb5   : > { %s4412_s1 = smov %s4411_s22  ;;  %s3379_s24 = scalar_lea.hbm %s4411_s22, 128 }
 0xbb6   : > { %p3380_p8 = scmp.ne.s32.totalorder %s4412_s1, %s3379_s24  ;;  %p3385_p1 = scmp.lt.u32.totalorder %s3379_s24, %s4412_s1 }
 0xbb8   : > { %p3381_p4 = pnand %p3380_p8, %p4410_p3 }
 0xbba   : > { %p3382_p13 = pneg %p3381_p4 }
 0xbbc   : > { %p3387_p10 = pnand %p3385_p1, %p3382_p13 }
 0xbbe   : > { %3390 = shalt.err (!%p3387_p10)
}
 0xbbf   : > { %2775 = dma.vmem_to_hbm [thread:$0]  (%p4410_p3), %s2282_s26, 128, %s4412_s1, [#allocation29], %s3499_s17, %s3499_s17, %s3510_s21  }
 0xbc0   : > { %3444 = dma.done.wait (%p4410_p3), [#allocation29], 128  }
 0xbc1   : > { %3446 = vsyncadd (%p4410_p3), [#allocation29], 4294967168 }
 0xbc2 PF: > { %s4413_s29 = sld [smem:[#allocation44_spill]]  ;;  %s4414_s27 = sld [smem:[#allocation39_spill]] }
 0xbc3   : > { %s4415_s25 = sld [smem:[#allocation48_spill]] }
 0xbc8   : > { %p2851_p11 = scmp.ge.s32.totalorder %s4413_s29, 2  ;;  %s2300_s14 = sand.u32 1, %s4414_s27  }
 0xbc9   : > { %p4416_p0 = scmp.ne.s32.totalorder %s4415_s25, 0  ;;  %s2301_s19 = scalar_lea.sflag [#allocation8], %s2300_s14 }
 0xbcb   : > { %p2820_p5 = pnand %p2851_p11, %p4416_p0 }
 0xbcd   : > { %3448 = dma.done.wait (!%p2820_p5), %s2301_s19, 128  }
 0xbce   : > { %3450 = vsyncadd (!%p2820_p5), %s2301_s19, 4294967168  ;;  %s39_s24 = sadd.s32 1, %s4413_s29   ;;  %s4417_s20 = sld [smem:[#allocation40_spill]] }
 0xbcf   : > { %p36_p6 = scmp.ge.s32.totalorder %s39_s24, 6   ;;  %s4418_s21 = sld [smem:[#allocation41_spill]] }
 0xbd0   : > { %s4419_s22 = sld [smem:[#allocation49_spill]]  ;;  %s4420_s23 = sld [smem:[#allocation43_spill]] }
 0xbd1   : > { %s4421_s11 = sld [smem:[#allocation46_spill]]  ;;  %38 = sbr.rel (!%p36_p6) target bundleno = 16 (0x10), region = 182 }
 0xbd8   :  { %2306 = vsyncpa [#allocation7], 1 }
 0xbd9   :  { %2308 = vsyncpa [#allocation7 + $0x1], 1 }
 0xbda   :  { %2309 = vsyncpa [#allocation10], 1 }
 0xbdb   :  { %2310 = vsyncpa [#allocation13], 1 }
 0xbdc   :  { %2311 = vsyncpa [#allocation16], 1 }
 0xbdd   :  { %2312 = vsyncpa [#allocation19], 1 }
 0xbde   :  { %2313 = vsyncpa [#allocation22], 1 }
 0xbdf   :  { %2314 = vsyncpa [#allocation25], 1 }
 0xbe0   :  { %2315 = vsyncpa [#allocation8], 1 }
 0xbe1   :  { %2317 = vsyncpa [#allocation8 + $0x1], 1 }
 0xbe2   :  { %2318 = vsyncpa [#allocation29], 1 }

// kernel: tpu_custom_call.1
= control target key start
LH: loop header
LB: loop body
LE: loop exit
PB: predicated region body
PF: predicated region fallthrough
CT: control target
= control target key end

     0   :  { %s4326_s0 = inlined_call_operand.hbm [shape: f32[3,32], index: 0, kind: input, shape index: {}]   ;;  %s4327_s1 = inlined_call_operand.hbm [shape: f32[2,1,32], index: 1, kind: input, shape index: {}]   ;;  %s4328_s2 = inlined_call_operand.hbm [shape: bf16[2,8,32], index: 2, kind: input, shape index: {}]   ;;  %s4329_s3 = inlined_call_operand.hbm [shape: s32[2,8,1], index: 3, kind: input, shape index: {}]   ;;  %s4330_s4 = inlined_call_operand.hbm [shape: f32[2,1,8], index: 4, kind: input, shape index: {}]   ;;  %s4331_s5 = inlined_call_operand.hbm [shape: bf16[128,32], index: 5, kind: input, shape index: {}]   ;;  %s4332_s6 = inlined_call_operand.hbm [shape: bf16[32,96], index: 6, kind: input, shape index: {}]   ;;  %s4333_s7 = inlined_call_operand.hbm [shape: bf16[32,96], index: 7, kind: input, shape index: {}]   ;;  %s4334_s8 = inlined_call_operand.hbm [shape: f32[1,96], index: 8, kind: input, shape index: {}]   ;;  %s4335_s9 = inlined_call_operand.hbm [shape: f32[1,32], index: 9, kind: input, shape index: {}]   ;;  %s4336_s10 = inlined_call_operand.hbm [shape: f32[1,96], index: 10, kind: input, shape index: {}]   ;;  %s4337_s11 = inlined_call_operand.<no memory space> [shape: f32[1,1], index: 11, kind: input, shape index: {}]   ;;  %s4338_s12 = inlined_call_operand.hbm [shape: f32[32,4], index: 12, kind: input, shape index: {}]   ;;  %s4339_s13 = inlined_call_operand.hbm [shape: f32[1,4], index: 13, kind: input, shape index: {}]   ;;  %s4340_s14 = inlined_call_operand.hbm [shape: f32[2,4,3,128], index: 14, kind: output, shape index: {0}]   ;;  %s4341_s15 = inlined_call_operand.hbm [shape: f32[2,3,4], index: 15, kind: output, shape index: {1}]  }
   0x1   :  { %4371 = sst [smem:[#allocation51_spill]] %s4327_s1  ;;  %v21_v0 = vstv %s4337_s11 }
   0x2   :  { %4372 = sst [smem:[#allocation52_spill]] %s4340_s14  ;;  %22 = vst [vmem:[#allocation5] sm:$0x1] %v21_v0 }
   0x3   :  { %4373 = sst [smem:[#allocation53_spill]] %s4341_s15 }
   0x4   :  { %23 = vsyncpa [#allocation7], 0 }
   0x5   :  { %24 = vsyncpa [#allocation10], 0 }
   0x6   :  { %25 = vsyncpa [#allocation13], 0 }
   0x7   :  { %26 = vsyncpa [#allocation16], 0 }
   0x8   :  { %27 = vsyncpa [#allocation19], 0 }
   0x9   :  { %28 = vsyncpa [#allocation22], 0 }
   0xa   :  { %29 = vsyncpa [#allocation25], 0 }
   0xb   :  { %30 = vsyncpa [#allocation8], 0 }
   0xc   :  { %32 = vsyncpa [#allocation8 + $0x1], 0 }
   0xd   :  { %33 = vsyncpa [#allocation29], 0  ;;  %s3595_s20 = smov 0   ;;  %s3597_s21 = smov 0  }
   0xe   :  { %s3599_s22 = smov 0   ;;  %s3601_s23 = smov 0  }
   0xf   :  { %s3603_s11 = smov 0   ;;  %s3605_s24 = smov 0  }
  0x10 LB: > { %4374 = sst [smem:[#allocation39_spill]] %s3453_s20  ;;  %s2488_s25 = sadd.s32 4294967295, %s3473_s24   ;;  %s3473_s24 = sphi %s3605_s24, %s39_s24   ;;  %s3469_s11 = sphi %s3603_s11, %s4421_s11   ;;  %s3465_s23 = sphi %s3601_s23, %s4420_s23   ;;  %s3461_s22 = sphi %s3599_s22, %s4419_s22   ;;  %s3457_s21 = sphi %s3597_s21, %s4418_s21   ;;  %s3453_s20 = sphi %s3595_s20, %s4417_s20  }
  0x11   : > { %4375 = sst [smem:[#allocation40_spill]] %s3457_s21  ;;  %s2489_s26 = sadd.s32 4294967294, %s3473_s24  }
  0x12   : > { %4376 = sst [smem:[#allocation41_spill]] %s3461_s22  ;;  %s48_s27 = sadd.s32 1, %s3469_s11 }
  0x13   : > { %4377 = sst [smem:[#allocation42_spill]] %s3465_s23  ;;  %s374_s28 = sadd.s32 1, %s3461_s22 }
  0x14   : > { %4378 = sst [smem:[#allocation43_spill]] %s3469_s11  ;;  %p49_p0 = scmp.ge.s32.totalorder %s48_s27, 4 }
  0x15   : > { %4379 = sst [smem:[#allocation44_spill]] %s3473_s24  ;;  %p384_p1 = scmp.ne.s32.totalorder %s3461_s22, %s3457_s21 }
  0x16   : > { %p3631_p2 = scmp.eq.s32.totalorder %s2488_s25, 3  ;;  %p390_p3 = scmp.ne.s32.totalorder %s3457_s21, %s3453_s20 }
  0x17   : > { %s4423_s27 = smov (%p49_p0, %s48_s27), 0  ;;  %p391_p5 = scmp.eq.s32.totalorder %s2489_s26, 3 }
  0x18   : > { %s4380_s29 = scalar_select %p3631_p2, 1, 0 }
  0x19   : > { %4382 = sst [smem:[#allocation46_spill]] %s4423_s27  ;;  %p3641_p4 = por %p3631_p2, %p384_p1 }
  0x1a   : > { %4381 = sst [smem:[#allocation45_spill]] %s4380_s29  ;;  %s370_s16 = ssub.s32 %s3469_s11, %s4423_s27 }
  0x1b   : > { %s4383_s30 = scalar_select %p3641_p4, 1, 0 }
  0x1c   : > { %p2490_p6 = scmp.ge.s32.totalorder %s3473_s24, 1  ;;  %p372_p7 = scmp.eq.s32.totalorder %s370_s16, 0 }
  0x1d   : > { %4384 = sst [smem:[#allocation47_spill]] %s4383_s30  ;;  %p3648_p8 = por %p391_p5, %p390_p3 }
  0x1e   : > { %p424_p9 = scmp.lt.s32.totalorder %s3473_s24, 5  ;;  %p3660_p11 = scmp.eq.s32.totalorder %s2488_s25, 0 }
  0x1f   : > { %s4385_s17 = scalar_select %p3648_p8, 1, 0 }
  0x20   : > { %s3654_s18 = scalar_select %p372_p7, %s3461_s22, %s374_s28  }
  0x21   : > { %4386 = sst [smem:[#allocation48_spill]] %s4385_s17  ;;  %p3656_p10 = pnand %p2490_p6, %p424_p9 }
  0x22   : > { %4387 = sst [smem:[#allocation49_spill]] %s3654_s18  ;;  %s3475_s26 = smov [#allocation9]  }
  0x23   : > { %s4388_s19 = scalar_select %p3656_p10, 1, 0 }
  0x24   : > { %s4389_s20 = scalar_select %p3660_p11, 1, 0 }
  0x25   : > { %p2779_p12 = pneg %p3656_p10  ;;  %s450_s16 = sshll.u32 %s3475_s26, 4  ;;  %s451_s16 = int_to_ptr.vmem [resolvable:$true] %s450_s16 }
  0x26   : > { %4390 = sst [smem:[#allocation50_spill]] %s4389_s20  ;;  %s3476_s28 = smov [#allocation12]  }
  0x27   : > { %p3668_p13 = pnand %p3660_p11, %p2779_p12  ;;  %s482_s11 = sshll.u32 %s3476_s28, 4  ;;  %s3672_s11 = int_to_ptr.vmem [resolvable:$true] %s482_s11 }
  0x28   : > { %s4392_s1 = sld [smem:[#allocation51_spill]] }
  0x29   : > { %p3682_p1 = pneg %p3668_p13 }
  0x2e   : > { %s2973_s22 = scalar_lea.hbm %s4392_s1, 32 }
  0x2f   : > { %p2974_p0 = scmp.ne.s32.totalorder %s4392_s1, %s2973_s22  ;;  %p2980_p6 = scmp.lt.u32.totalorder %s2973_s22, %s4392_s1 }
  0x31   : > { %p2976_p3 = pnand %p3682_p1, %p2974_p0 }
  0x33   : > { %p2977_p5 = pneg %p2976_p3 }
  0x35   : > { %p2982_p7 = pnand %p2980_p6, %p2977_p5 }
  0x37   : > { %2985 = shalt.err (!%p2982_p7)
}
  0x38   : > { %s2986_s18 = scalar_lea.vmem %s451_s16, 32  ;;  %p2994_p2 = scmp.lt.s32.totalorder %s451_s16, %s451_s16 }
  0x39   : > { %p2987_p9 = scmp.ne.s32.totalorder %s451_s16, %s2986_s18  ;;  %p2995_p4 = scmp.lt.s32.totalorder %s2986_s18, %s2986_s18 }
  0x3b   : > { %p2989_p12 = pnand %p2987_p9, %p3682_p1  ;;  %p2996_p11 = por %p2995_p4, %p2994_p2 }
  0x3d   : > { %p2990_p8 = pneg %p2989_p12 }
  0x3f   : > { %p2997_p10 = pnand %p2996_p11, %p2990_p8 }
  0x41   : > { %3000 = shalt.err (!%p2997_p10)
}
  0x42   : > { %s4362_s24 = smov 16   ;;  %s4363_s17 = smov 1  }
  0x43   : > { %2785 = dma.hbm_to_vmem [thread:$0]  (!%p3668_p13), %s4392_s1, 32, %s451_s16, [#allocation10], %s4362_s24, %s4362_s24, %s4363_s17  }
  0x44   : > { %s3001_s29 = scalar_lea.hbm %s4329_s3, 256 }
  0x45   : > { %p3002_p2 = scmp.ne.s32.totalorder %s4329_s3, %s3001_s29  ;;  %p3008_p10 = scmp.lt.u32.totalorder %s3001_s29, %s4329_s3 }
  0x47   : > { %p3004_p4 = pnand %p3002_p2, %p3682_p1 }
  0x49   : > { %p3005_p8 = pneg %p3004_p4 }
  0x4b   : > { %p3010_p11 = pnand %p3008_p10, %p3005_p8 }
  0x4d   : > { %3013 = shalt.err (!%p3010_p11)
}
  0x4e   : > { %s3014_s16 = scalar_lea.vmem %s3672_s11, 256  ;;  %p3022_p6 = scmp.lt.s32.totalorder %s3672_s11, %s3672_s11 }
  0x4f   : > { %p3015_p0 = scmp.ne.s32.totalorder %s3672_s11, %s3014_s16  ;;  %p3023_p7 = scmp.lt.s32.totalorder %s3014_s16, %s3014_s16 }
  0x51   : > { %p3017_p3 = pnand %p3015_p0, %p3682_p1  ;;  %p3024_p9 = por %p3023_p7, %p3022_p6 }
  0x53   : > { %p3018_p5 = pneg %p3017_p3 }
  0x55   : > { %p3025_p12 = pnand %p3024_p9, %p3018_p5 }
  0x57   : > { %3028 = shalt.err (!%p3025_p12)
}
  0x58   : > { %s4368_s14 = smov 128   ;;  %s3480_s23 = smov 8  }
  0x59   : > { %2791 = dma.hbm_to_vmem [thread:$0]  (!%p3668_p13), %s4329_s3, 256, %s3672_s11, [#allocation13], %s4368_s14, %s4368_s14, %s3480_s23  }
  0x5a   : > { %s3481_s15 = smov [#allocation15]   ;;  %s3482_s25 = smov [#allocation18]  }
  0x5b   : > { %s511_s22 = sshll.u32 %s3481_s15, 4  ;;  %s537_s28 = sshll.u32 %s3482_s25, 4  ;;  %s512_s22 = int_to_ptr.vmem [resolvable:$true] %s511_s22  ;;  %s538_s28 = int_to_ptr.vmem [resolvable:$true] %s537_s28 }
  0x5c   : > { %s3029_s24 = scalar_lea.hbm %s4331_s5, 1024 }
  0x5d   : > { %p3030_p2 = scmp.ne.s32.totalorder %s4331_s5, %s3029_s24  ;;  %p3036_p10 = scmp.lt.u32.totalorder %s3029_s24, %s4331_s5 }
  0x5f   : > { %p3032_p4 = pnand %p3030_p2, %p3682_p1 }
  0x61   : > { %p3033_p8 = pneg %p3032_p4 }
  0x63   : > { %p3038_p11 = pnand %p3036_p10, %p3033_p8 }
  0x65   : > { %3041 = shalt.err (!%p3038_p11)
}
  0x66   : > { %s3042_s11 = scalar_lea.vmem %s512_s22, 1024  ;;  %p3050_p6 = scmp.lt.s32.totalorder %s512_s22, %s512_s22 }
  0x67   : > { %p3043_p0 = scmp.ne.s32.totalorder %s512_s22, %s3042_s11  ;;  %p3051_p7 = scmp.lt.s32.totalorder %s3042_s11, %s3042_s11 }
  0x69   : > { %p3045_p3 = pnand %p3043_p0, %p3682_p1  ;;  %p3052_p9 = por %p3051_p7, %p3050_p6 }
  0x6b   : > { %p3046_p5 = pneg %p3045_p3 }
  0x6d   : > { %p3053_p12 = pnand %p3052_p9, %p3046_p5 }
  0x6f   : > { %3056 = shalt.err (!%p3053_p12)
}
  0x70   : > { %s4369_s1 = smov 64   ;;  %s3484_s17 = smov 4  }
  0x71   : > { %2797 = dma.hbm_to_vmem [thread:$0]  (!%p3668_p13), %s4331_s5, 1024, %s512_s22, [#allocation16], %s4369_s1, %s4369_s1, %s3484_s17  }
  0x72   : > { %s3057_s30 = scalar_lea.hbm %s4333_s7, 256 }
  0x73   : > { %p3058_p2 = scmp.ne.s32.totalorder %s4333_s7, %s3057_s30  ;;  %p3064_p10 = scmp.lt.u32.totalorder %s3057_s30, %s4333_s7 }
  0x75   : > { %p3060_p4 = pnand %p3058_p2, %p3682_p1 }
  0x77   : > { %p3061_p8 = pneg %p3060_p4 }
  0x79   : > { %p3066_p11 = pnand %p3064_p10, %p3061_p8 }
  0x7b   : > { %3069 = shalt.err (!%p3066_p11)
}
  0x7c   : > { %s3070_s11 = scalar_lea.vmem %s538_s28, 256  ;;  %p3078_p6 = scmp.lt.s32.totalorder %s538_s28, %s538_s28 }
  0x7d   : > { %p3071_p0 = scmp.ne.s32.totalorder %s538_s28, %s3070_s11  ;;  %p3079_p7 = scmp.lt.s32.totalorder %s3070_s11, %s3070_s11 }
  0x7f   : > { %p3073_p3 = pnand %p3071_p0, %p3682_p1  ;;  %p3080_p9 = por %p3079_p7, %p3078_p6 }
  0x81   : > { %p3074_p5 = pneg %p3073_p3 }
  0x83   : > { %p3081_p12 = pnand %p3080_p9, %p3074_p5 }
  0x85   : > { %3084 = shalt.err (!%p3081_p12)
}
  0x86   : > { %2803 = dma.hbm_to_vmem [thread:$0]  (!%p3668_p13), %s4333_s7, 256, %s538_s28, [#allocation19], %s4369_s1, %s4369_s1, %s3484_s17  }
  0x87   : > { %s3485_s21 = smov [#allocation21]   ;;  %s3486_s29 = smov [#allocation24]  }
  0x88   : > { %s562_s24 = sshll.u32 %s3485_s21, 4  ;;  %s586_s30 = sshll.u32 %s3486_s29, 4  ;;  %s563_s24 = int_to_ptr.vmem [resolvable:$true] %s562_s24  ;;  %s587_s30 = int_to_ptr.vmem [resolvable:$true] %s586_s30 }
  0x89   : > { %s3085_s18 = scalar_lea.hbm %s4335_s9, 16 }
  0x8a   : > { %p3086_p2 = scmp.ne.s32.totalorder %s4335_s9, %s3085_s18  ;;  %p3092_p10 = scmp.lt.u32.totalorder %s3085_s18, %s4335_s9 }
  0x8c   : > { %p3088_p4 = pnand %p3086_p2, %p3682_p1 }
  0x8e   : > { %p3089_p8 = pneg %p3088_p4 }
  0x90   : > { %p3094_p11 = pnand %p3092_p10, %p3089_p8 }
  0x92   : > { %3097 = shalt.err (!%p3094_p11)
}
  0x93   : > { %s3098_s28 = scalar_lea.vmem %s563_s24, 16  ;;  %s3105_s20 = scalar_lea.vmem %s563_s24, 32 }
  0x94   : > { %p3099_p0 = scmp.ne.s32.totalorder %s563_s24, %s3098_s28  ;;  %p3106_p6 = scmp.lt.s32.totalorder %s563_s24, %s563_s24 }
  0x95   : > { %p3107_p7 = scmp.lt.s32.totalorder %s3105_s20, %s3098_s28 }
  0x96   : > { %p3101_p3 = pnand %p3099_p0, %p3682_p1 }
  0x97   : > { %p3108_p9 = por %p3107_p7, %p3106_p6 }
  0x98   : > { %p3102_p5 = pneg %p3101_p3 }
  0x9a   : > { %p3109_p12 = pnand %p3108_p9, %p3102_p5 }
  0x9c   : > { %3112 = shalt.err (!%p3109_p12)
}
  0x9d   : > { %2809 = dma.hbm_to_vmem [thread:$0]  (!%p3668_p13), %s4335_s9, 16, %s563_s24, [#allocation22]  }
  0x9e   : > { %s3113_s25 = scalar_lea.hbm %s4338_s12, 512 }
  0x9f   : > { %p3114_p2 = scmp.ne.s32.totalorder %s4338_s12, %s3113_s25  ;;  %p3120_p10 = scmp.lt.u32.totalorder %s3113_s25, %s4338_s12 }
  0xa1   : > { %p3116_p4 = pnand %p3114_p2, %p3682_p1 }
  0xa3   : > { %p3117_p8 = pneg %p3116_p4 }
  0xa5   : > { %p3122_p11 = pnand %p3120_p10, %p3117_p8 }
  0xa7   : > { %3125 = shalt.err (!%p3122_p11)
}
  0xa8   : > { %s3126_s28 = scalar_lea.vmem %s587_s30, 512  ;;  %p3134_p6 = scmp.lt.s32.totalorder %s587_s30, %s587_s30 }
  0xa9   : > { %p3127_p0 = scmp.ne.s32.totalorder %s587_s30, %s3126_s28  ;;  %p3135_p7 = scmp.lt.s32.totalorder %s3126_s28, %s3126_s28 }
  0xab   : > { %p3129_p3 = pnand %p3127_p0, %p3682_p1  ;;  %p3136_p9 = por %p3135_p7, %p3134_p6 }
  0xad   : > { %p3130_p5 = pneg %p3129_p3 }
  0xaf   : > { %p3137_p12 = pnand %p3136_p9, %p3130_p5 }
  0xb1   : > { %3140 = shalt.err (!%p3137_p12)
}
  0xb2   : > { %s4394_s24 = smov 128   ;;  %s3487_s29 = smov [#allocation6]  }
  0xb3   : > { %2815 = dma.hbm_to_vmem [thread:$0]  (!%p3668_p13), %s4338_s12, 512, %s587_s30, [#allocation25], %s4394_s24, %s4394_s24, %s3480_s23  }
  0xb4   : > { %s437_s14 = sshll.u32 %s3487_s29, 4  ;;  %s3488_s15 = smov [#allocation11]   ;;  %s438_s14 = int_to_ptr.vmem [resolvable:$true] %s437_s14 }
  0xb5   : > { %s466_s25 = sshll.u32 %s3488_s15, 4  ;;  %s3141_s11 = scalar_lea.hbm %s4326_s0, 64  ;;  %s467_s25 = int_to_ptr.vmem [resolvable:$true] %s466_s25 }
  0xb6   : > { %p3142_p2 = scmp.ne.s32.totalorder %s4326_s0, %s3141_s11  ;;  %p3148_p10 = scmp.lt.u32.totalorder %s3141_s11, %s4326_s0 }
  0xb8   : > { %p3144_p4 = pnand %p3142_p2, %p3682_p1 }
  0xba   : > { %p3145_p8 = pneg %p3144_p4 }
  0xbc   : > { %p3150_p11 = pnand %p3148_p10, %p3145_p8 }
  0xbe   : > { %3153 = shalt.err (!%p3150_p11)
}
  0xbf   : > { %s3154_s23 = scalar_lea.vmem %s438_s14, 64  ;;  %p3162_p6 = scmp.lt.s32.totalorder %s438_s14, %s438_s14 }
  0xc0   : > { %p3155_p0 = scmp.ne.s32.totalorder %s438_s14, %s3154_s23  ;;  %p3163_p7 = scmp.lt.s32.totalorder %s3154_s23, %s3154_s23 }
  0xc2   : > { %p3157_p3 = pnand %p3155_p0, %p3682_p1  ;;  %p3164_p9 = por %p3163_p7, %p3162_p6 }
  0xc4   : > { %p3158_p5 = pneg %p3157_p3 }
  0xc6   : > { %p3165_p12 = pnand %p3164_p9, %p3158_p5 }
  0xc8   : > { %3168 = shalt.err (!%p3165_p12)
}
  0xc9   : > { %2782 = dma.hbm_to_vmem [thread:$0]  (!%p3668_p13), %s4326_s0, 64, %s438_s14, [#allocation7]  }
  0xca   : > { %s3169_s29 = scalar_lea.hbm %s4328_s2, 128 }
  0xcb   : > { %p3170_p2 = scmp.ne.s32.totalorder %s4328_s2, %s3169_s29  ;;  %p3176_p10 = scmp.lt.u32.totalorder %s3169_s29, %s4328_s2 }
  0xcd   : > { %p3172_p4 = pnand %p3170_p2, %p3682_p1 }
  0xcf   : > { %p3173_p8 = pneg %p3172_p4 }
  0xd1   : > { %p3178_p11 = pnand %p3176_p10, %p3173_p8 }
  0xd3   : > { %3181 = shalt.err (!%p3178_p11)
}
  0xd4   : > { %s3182_s22 = scalar_lea.vmem %s467_s25, 128  ;;  %p3190_p6 = scmp.lt.s32.totalorder %s467_s25, %s467_s25 }
  0xd5   : > { %p3183_p0 = scmp.ne.s32.totalorder %s467_s25, %s3182_s22  ;;  %p3191_p7 = scmp.lt.s32.totalorder %s3182_s22, %s3182_s22 }
  0xd7   : > { %p3185_p3 = pnand %p3183_p0, %p3682_p1  ;;  %p3192_p9 = por %p3191_p7, %p3190_p6 }
  0xd9   : > { %p3186_p5 = pneg %p3185_p3 }
  0xdb   : > { %p3193_p12 = pnand %p3192_p9, %p3186_p5 }
  0xdd   : > { %3196 = shalt.err (!%p3193_p12)
}
  0xde   : > { %s4395_s14 = smov 64   ;;  %s3489_s23 = smov [#allocation14]  }
  0xdf   : > { %2788 = dma.hbm_to_vmem [thread:$0]  (!%p3668_p13), %s4328_s2, 128, %s467_s25, [#allocation10], %s4395_s14, %s4395_s14, %s3484_s17  }
  0xe0   : > { %s498_s30 = sshll.u32 %s3489_s23, 4  ;;  %s3490_s24 = smov [#allocation17]   ;;  %s499_s30 = int_to_ptr.vmem [resolvable:$true] %s498_s30 }
  0xe1   : > { %s524_s1 = sshll.u32 %s3490_s24, 4  ;;  %s3197_s15 = scalar_lea.hbm %s4330_s4, 32  ;;  %s525_s1 = int_to_ptr.vmem [resolvable:$true] %s524_s1 }
  0xe2   : > { %p3198_p2 = scmp.ne.s32.totalorder %s4330_s4, %s3197_s15  ;;  %p3204_p10 = scmp.lt.u32.totalorder %s3197_s15, %s4330_s4 }
  0xe4   : > { %p3200_p4 = pnand %p3198_p2, %p3682_p1 }
  0xe6   : > { %p3201_p8 = pneg %p3200_p4 }
  0xe8   : > { %p3206_p11 = pnand %p3204_p10, %p3201_p8 }
  0xea   : > { %3209 = shalt.err (!%p3206_p11)
}
  0xeb   : > { %s3210_s25 = scalar_lea.vmem %s499_s30, 32  ;;  %p3218_p6 = scmp.lt.s32.totalorder %s499_s30, %s499_s30 }
  0xec   : > { %p3211_p0 = scmp.ne.s32.totalorder %s499_s30, %s3210_s25  ;;  %p3219_p7 = scmp.lt.s32.totalorder %s3210_s25, %s3210_s25 }
  0xee   : > { %p3213_p3 = pnand %p3211_p0, %p3682_p1  ;;  %p3220_p9 = por %p3219_p7, %p3218_p6 }
  0xf0   : > { %p3214_p5 = pneg %p3213_p3 }
  0xf2   : > { %p3221_p12 = pnand %p3220_p9, %p3214_p5 }
  0xf4   : > { %3224 = shalt.err (!%p3221_p12)
}
  0xf5   : > { %s4396_s28 = smov 1   ;;  %s4397_s20 = smov 16  }
  0xf6   : > { %2794 = dma.hbm_to_vmem [thread:$0]  (!%p3668_p13), %s4330_s4, 32, %s499_s30, [#allocation13], %s4397_s20, %s4397_s20, %s4396_s28  }
  0xf7   : > { %s3225_s15 = scalar_lea.hbm %s4332_s6, 256 }
  0xf8   : > { %p3226_p2 = scmp.ne.s32.totalorder %s4332_s6, %s3225_s15  ;;  %p3232_p10 = scmp.lt.u32.totalorder %s3225_s15, %s4332_s6 }
  0xfa   : > { %p3228_p4 = pnand %p3226_p2, %p3682_p1 }
  0xfc   : > { %p3229_p8 = pneg %p3228_p4 }
  0xfe   : > { %p3234_p11 = pnand %p3232_p10, %p3229_p8 }
 0x100   : > { %3237 = shalt.err (!%p3234_p11)
}
 0x101   : > { %s3238_s25 = scalar_lea.vmem %s525_s1, 256  ;;  %p3246_p6 = scmp.lt.s32.totalorder %s525_s1, %s525_s1 }
 0x102   : > { %p3239_p0 = scmp.ne.s32.totalorder %s525_s1, %s3238_s25  ;;  %p3247_p7 = scmp.lt.s32.totalorder %s3238_s25, %s3238_s25 }
 0x104   : > { %p3241_p3 = pnand %p3239_p0, %p3682_p1  ;;  %p3248_p9 = por %p3247_p7, %p3246_p6 }
 0x106   : > { %p3242_p5 = pneg %p3241_p3 }
 0x108   : > { %p3249_p12 = pnand %p3248_p9, %p3242_p5 }
 0x10a   : > { %3252 = shalt.err (!%p3249_p12)
}
 0x10b   : > { %2800 = dma.hbm_to_vmem [thread:$0]  (!%p3668_p13), %s4332_s6, 256, %s525_s1, [#allocation16], %s4395_s14, %s4395_s14, %s3484_s17  }
 0x10c   : > { %s3491_s20 = smov [#allocation20]   ;;  %s3492_s24 = smov [#allocation23]  }
 0x10d   : > { %s551_s23 = sshll.u32 %s3491_s20, 4  ;;  %s573_s21 = sshll.u32 %s3492_s24, 4  ;;  %s552_s23 = int_to_ptr.vmem [resolvable:$true] %s551_s23  ;;  %s574_s21 = int_to_ptr.vmem [resolvable:$true] %s573_s21 }
 0x10e   : > { %s3253_s18 = scalar_lea.hbm %s4334_s8, 16 }
 0x10f   : > { %p3254_p2 = scmp.ne.s32.totalorder %s4334_s8, %s3253_s18  ;;  %p3260_p10 = scmp.lt.u32.totalorder %s3253_s18, %s4334_s8 }
 0x111   : > { %p3256_p4 = pnand %p3254_p2, %p3682_p1 }
 0x113   : > { %p3257_p8 = pneg %p3256_p4 }
 0x115   : > { %p3262_p11 = pnand %p3260_p10, %p3257_p8 }
 0x117   : > { %3265 = shalt.err (!%p3262_p11)
}
 0x118   : > { %s3266_s17 = scalar_lea.vmem %s552_s23, 16  ;;  %s3273_s14 = scalar_lea.vmem %s552_s23, 32 }
 0x119   : > { %p3267_p0 = scmp.ne.s32.totalorder %s552_s23, %s3266_s17  ;;  %p3274_p6 = scmp.lt.s32.totalorder %s552_s23, %s552_s23 }
 0x11a   : > { %p3275_p7 = scmp.lt.s32.totalorder %s3273_s14, %s3266_s17 }
 0x11b   : > { %p3269_p3 = pnand %p3267_p0, %p3682_p1 }
 0x11c   : > { %p3276_p9 = por %p3275_p7, %p3274_p6 }
 0x11d   : > { %p3270_p5 = pneg %p3269_p3 }
 0x11f   : > { %p3277_p12 = pnand %p3276_p9, %p3270_p5 }
 0x121   : > { %3280 = shalt.err (!%p3277_p12)
}
 0x122   : > { %2806 = dma.hbm_to_vmem [thread:$0]  (!%p3668_p13), %s4334_s8, 16, %s552_s23, [#allocation19]  }
 0x123   : > { %s3281_s24 = scalar_lea.hbm %s4336_s10, 16 }
 0x124   : > { %p3282_p2 = scmp.ne.s32.totalorder %s4336_s10, %s3281_s24  ;;  %p3288_p10 = scmp.lt.u32.totalorder %s3281_s24, %s4336_s10 }
 0x126   : > { %p3284_p4 = pnand %p3282_p2, %p3682_p1 }
 0x128   : > { %p3285_p8 = pneg %p3284_p4 }
 0x12a   : > { %p3290_p11 = pnand %p3288_p10, %p3285_p8 }
 0x12c   : > { %3293 = shalt.err (!%p3290_p11)
}
 0x12d   : > { %s3294_s11 = scalar_lea.vmem %s574_s21, 16  ;;  %s3301_s23 = scalar_lea.vmem %s574_s21, 32 }
 0x12e   : > { %p3295_p0 = scmp.ne.s32.totalorder %s574_s21, %s3294_s11  ;;  %p3302_p6 = scmp.lt.s32.totalorder %s574_s21, %s574_s21 }
 0x12f   : > { %p3303_p7 = scmp.lt.s32.totalorder %s3301_s23, %s3294_s11 }
 0x130   : > { %p3297_p3 = pnand %p3295_p0, %p3682_p1 }
 0x131   : > { %p3304_p9 = por %p3303_p7, %p3302_p6 }
 0x132   : > { %p3298_p5 = pneg %p3297_p3 }
 0x134   : > { %p3305_p12 = pnand %p3304_p9, %p3298_p5 }
 0x136   : > { %3308 = shalt.err (!%p3305_p12)
}
 0x137   : > { %2812 = dma.hbm_to_vmem [thread:$0]  (!%p3668_p13), %s4336_s10, 16, %s574_s21, [#allocation22]  }
 0x138   : > { %s3493_s17 = smov [#allocation26]   ;;  %s3309_s28 = scalar_lea.hbm %s4339_s13, 16 }
 0x139   : > { %s600_s14 = sshll.u32 %s3493_s17, 4  ;;  %p3310_p2 = scmp.ne.s32.totalorder %s4339_s13, %s3309_s28  ;;  %s601_s14 = int_to_ptr.vmem [resolvable:$true] %s600_s14 }
 0x13a   : > { %p3316_p10 = scmp.lt.u32.totalorder %s3309_s28, %s4339_s13 }
 0x13b   : > { %p3312_p4 = pnand %p3310_p2, %p3682_p1 }
 0x13d   : > { %p3313_p8 = pneg %p3312_p4 }
 0x13f   : > { %p3318_p11 = pnand %p3316_p10, %p3313_p8 }
 0x141   : > { %3321 = shalt.err (!%p3318_p11)
}
 0x142   : > { %s3322_s21 = scalar_lea.vmem %s601_s14, 16  ;;  %s3329_s18 = scalar_lea.vmem %s601_s14, 32 }
 0x143   : > { %p3323_p0 = scmp.ne.s32.totalorder %s601_s14, %s3322_s21  ;;  %p3330_p6 = scmp.lt.s32.totalorder %s601_s14, %s601_s14 }
 0x144   : > { %p3331_p7 = scmp.lt.s32.totalorder %s3329_s18, %s3322_s21 }
 0x145   : > { %p3325_p3 = pnand %p3323_p0, %p3682_p1 }
 0x146   : > { %p3332_p9 = por %p3331_p7, %p3330_p6 }
 0x147   : > { %p3326_p5 = pneg %p3325_p3 }
 0x149   : > { %p3333_p12 = pnand %p3332_p9, %p3326_p5 }
 0x14b   : > { %3336 = shalt.err (!%p3333_p12)
}
 0x14c   : > { %2818 = dma.hbm_to_vmem [thread:$0]  (!%p3668_p13), %s4339_s13, 16, %s601_s14, [#allocation25]  }
 0x14d   : > { %p4398_p2 = scmp.ne.s32.totalorder %s4388_s19, 0 }
 0x14e   : > { %s4399_s23 = sld [smem:[#allocation50_spill]] (!%p4398_p2) }
 0x14f   : > { %613 = sbr.rel (%p4398_p2) target bundleno = 3010 (0xbc2), region = 76 }
 0x154   : > { %p4400_p4 = scmp.ne.s32.totalorder (!%p4398_p2), %s4399_s23, 0 }
 0x156   : > { %3416 = dma.done.wait (%p4400_p4), [#allocation7], 64  }
 0x157   : > { %3418 = vsyncadd (%p4400_p4), [#allocation7], 4294967232 }
 0x158   : > { %3420 = dma.done.wait (%p4400_p4), [#allocation10], 160  }
 0x159   : > { %3422 = vsyncadd (%p4400_p4), [#allocation10], 4294967136 }
 0x15a   : > { %3424 = dma.done.wait (%p4400_p4), [#allocation13], 288  }
 0x15b   : > { %3426 = vsyncadd (%p4400_p4), [#allocation13], 4294967008 }
 0x15c   : > { %3428 = dma.done.wait (%p4400_p4), [#allocation16], 1280  }
 0x15d   : > { %3430 = vsyncadd (%p4400_p4), [#allocation16], 4294966016 }
 0x15e   : > { %3432 = dma.done.wait (%p4400_p4), [#allocation19], 272  }
 0x15f   : > { %3434 = vsyncadd (%p4400_p4), [#allocation19], 4294967024 }
 0x160   : > { %3436 = dma.done.wait (%p4400_p4), [#allocation22], 32  }
 0x161   : > { %3438 = vsyncadd (%p4400_p4), [#allocation22], 4294967264 }
 0x162   : > { %3440 = dma.done.wait (%p4400_p4), [#allocation25], 528  }
 0x163   : > { %3442 = vsyncadd (%p4400_p4), [#allocation25], 4294966768  ;;  %s4401_s27 = sld [smem:[#allocation40_spill]]  ;;  %s4402_s25 = sld [smem:[#allocation42_spill]] }
 0x169   : > { %s699_s19 = sand.u32 1, %s4401_s27   ;;  %p2519_p13 = scmp.ne.s32.totalorder %s4402_s25, 0 }
 0x16a   : > { %s2518_s26 = sshll.u32 %s699_s19, 3  ;;  %v823_v1 = vld [vmem:[#allocation12] sm:$0xff] (!%p2519_p13)  ;;  %v738_v2 = vlaneseq (!%p2519_p13)  ;;  %v3494_v3 = vmov (!%p2519_p13), 0   ;;  %v715_v4 = vld [vmem:[#allocation6] sm:$0x7] (!%p2519_p13)  ;;  %vm719_vm0 = vcmask (!%p2519_p13), 1042432  }
 0x16b   : > { %s3976_s22 = scalar_lea.vmem [#allocation27], %s2518_s26  ;;  %714 = sbr.rel (%p2519_p13) target bundleno = 501 (0x1f5), region = 132  ;;  %2936 = vset.pattern.permute.xlu0 (!%p2519_p13), %v3494_v3  ;;  %v717_v5 = vrot.slane (!%p2519_p13), %v715_v4, 5  ;;  %vm721_vm1 = vcmask (!%p2519_p13), 259072   ;;  %v824_v6 = vld [vmem:[#allocation12 + $0x8] sm:$0xff] (!%p2519_p13)  ;;  %v3496_v38 = vmov (!%p2519_p13), 0.0  }
 0x16c   : > { %828 = vperm.xlu0 (!%p2519_p13), %2936, %v823_v1   ;;  %v3495_v7 = vmov (!%p2519_p13), 1966171168   ;;  %v739_v9 = vshrl.u32 (!%p2519_p13), %v738_v2, 7  ;;  %v2520_v12 = vld [vmem:[#allocation9] ss:$0 sm:$0xff] (!%p2519_p13)  ;;  %v826_v35 = vand.u32 (!%p2519_p13), 127, %v738_v2 }
 0x16d   : > { %v736_v8 = vunpack.c.l.s4 (!%p2519_p13), %v3495_v7  ;;  %v720_v10 = vsel (!%p2519_p13), %vm719_vm0, %v715_v4, %v717_v5  ;;  %v2521_v13 = vld [vmem:[#allocation9 + $0x1] ss:$0 sm:$0xff] (!%p2519_p13) }
 0x16e   : > { %722 = vst.msk [vmem:[#allocation2] sm:$0x3f] (!%p2519_p13), %vm721_vm1, %v720_v10 }
 0x16f   : > { %v737_v11 = vunpack.c.0.s8 (!%p2519_p13), %v736_v8 }
 0x170   : > { %831 = vperm.xlu0 (!%p2519_p13), %2936, %v824_v6  }
 0x171   : > { %v740_v14 = vsub.s32 (!%p2519_p13), %v737_v11, %v739_v9 }
 0x173   : > { %v741_v15 = vrot.slane %v2520_v12, %v740_v14  ;;  %v764_v16 = vrot.slane %v2521_v13, %v740_v14 }
 0x175   : > { %v742_v17 = vcombine.high %v741_v15, %v741_v15  ;;  %v749_v18 = vrot.slane %v741_v15, %v740_v14  ;;  %v765_v19 = vcombine.high %v764_v16, %v764_v16  ;;  %v772_v20 = vrot.slane %v764_v16, %v740_v14 }
 0x177   : > { %v756_v21 = vrot.slane %v742_v17, %v740_v14  ;;  %v757_v22 = vcombine.high %v749_v18, %v749_v18  ;;  %v779_v23 = vrot.slane %v765_v19, %v740_v14  ;;  %v780_v24 = vcombine.high %v772_v20, %v772_v20 }
 0x179   : > { %v781_v25 = vcombine.low %v749_v18, %v756_v21  ;;  %v782_v26 = vcombine.low %v757_v22, %v772_v20  ;;  %v783_v27 = vcombine.low %v779_v23, %v780_v24 }
 0x17b   : > { %v790_v28 = vrot.slane %v781_v25, %v740_v14  ;;  %v797_v29 = vrot.slane %v782_v26, %v740_v14  ;;  %v804_v30 = vrot.slane %v783_v27, %v740_v14 }
 0x17d   : > { %v805_v31 = vcombine.low %v790_v28, %v797_v29  ;;  %v819_v32 = vrot.slane %v804_v30, %v740_v14 }
 0x17f   : > { %v812_v33 = vrot.slane %v805_v31, %v740_v14 }
 0x181   : > { %v820_v34 = vcombine.low %v812_v33, %v819_v32 }
 0x183   : > { %822 = vst.msk [vmem:[#allocation3] sm:$0x3f] %vm721_vm1, %v820_v34 }
 0x1eb   : > { %v829_v36 = vpop.permute.xlu0 %828 }
 0x1ec   : > { %vm833_vm2 = vcmp.eq.s32.totalorder %v829_v36, %v826_v35 }
 0x1ed   : > { %v2522_v39 = vsel %vm833_vm2, 1.0, %v3496_v38 }
 0x1ef   : > { %v832_v37 = vpop.permute.xlu0 %831 }
 0x1f0   : > { %vm834_vm3 = vcmp.eq.s32.totalorder %v832_v37, %v826_v35 }
 0x1f1   : > { %v2523_v40 = vsel %vm834_vm3, 1.0, %v3496_v38 }
 0x1f2   : > { %v2569_v41 = vpack.c.bf16 %v2523_v40, %v2522_v39 }
 0x1f4   : > { %2570 = vst [vmem:[#allocation4] sm:$0xff] %v2569_v41  }
 0x1f5 PF: > { %v2939_v42 = vld [vmem:[#allocation17] sm:$0xff]   ;;  %v3497_v43 = vmov 0.0   ;;  %v2940_v44 = vld [vmem:[#allocation18] sm:$0xff]   ;;  %v2941_v45 = vld [vmem:[#allocation17 + $0x8] sm:$0xff]   ;;  %vm3498_vm4 = vmmov 0   ;;  %vm888_vm5 = vcmask 261120   ;;  %v1036_v16 = vlaneseq }
 0x1f6   : > { %2612 = vmatprep.subr.bf16.mxu0 %v3497_v43  ;;  %2620 = vmatprep.subr.bf16.mxu1 %v3497_v43  ;;  %v2942_v46 = vld [vmem:[#allocation18 + $0x8] sm:$0xff]   ;;  %v844_v48 = vld [vmem:[#allocation3] sm:$0x3f]  ;;  %v2532_v49 = vld [vmem:[#allocation21] ss:$0 sm:$0xff]  ;;  %s3499_s17 = smov 64  }
 0x1f7   : > { %2613 = vmatpush3.bf16.msra.mxu0 %v2939_v42  ;;  %2616 = vmatprep.mubr.msk.bf16.mxu0 %vm3498_vm4, %v3497_v43  ;;  %v864_v51 = vpack.c.bf16 %v844_v48, %v844_v48  ;;  %s3500_s14 = smov 32   ;;  %v2524_v62 = vld [vmem:[#allocation20] ss:$0 sm:$0xff]  ;;  %s3501_s1 = smov 96   ;;  %v4007_v10 = vld [vmem:[#allocation11] sm:$0xf] }
 0x1f8   : > { %2621 = vmatpush3.bf16.msra.mxu1 %v2940_v44  ;;  %2614 = vmatprep.subr.bf16.mxu0 %v3497_v43  ;;  %v3991_v47 = vld [vmem:[#allocation2] sm:$0x3f]  ;;  %v1099_v12 = vsel %vm888_vm5, %v4007_v10, 0  ;;  %v3502_v14 = vmov 1966171168   ;;  %v1037_v20 = vshrl.u32 %v1036_v16, 7 }
 0x1f9   : > { %2622 = vmatprep.subr.bf16.mxu1 %v3497_v43  ;;  %2624 = vmatprep.mubr.msk.bf16.mxu1 %vm3498_vm4, %v3497_v43  ;;  %v863_v50 = vpack.c.bf16 %v3991_v47, %v3991_v47  ;;  %v4009_v11 = vld [vmem:[#allocation11 + $0x4] sm:$0xf]  ;;  %v1034_v15 = vunpack.c.l.s4 %v3502_v14  ;;  %vm1206_vm6 = vcmask 59392   ;;  %vm1356_vm7 = vcmask 1043456  }
 0x1fa   : > { %1004 = vrot.lane.b32.xlu0 %v2532_v49, %s3499_s17  ;;  %v1164_v13 = vsel %vm888_vm5, %v4009_v11, 0  ;;  %vm1506_vm8 = vcmask 259072   ;;  %vm1352_vm9 = vcmask 64512   ;;  %vm1340_vm10 = vcmask 1045504  }
 0x1fb   : > { %2615 = vmatpush3.bf16.msra.mxu0 %v2941_v45  ;;  %v1035_v19 = vunpack.c.0.s8 %v1034_v15  ;;  %v2533_v45 = vld [vmem:[#allocation14] ss:$0 sm:$0xff]  ;;  %vm3506_vm15 = vmmov (!%p2519_p13), 0   ;;  %vm2246_vm0 = vcmask (!%p2519_p13), 26624  }
 0x1fc   : > { %2623 = vmatpush3.bf16.msra.mxu1 %v2942_v46  ;;  %2628 = vmatprep.subr.bf16.mxu0 %v3497_v43 }
 0x1fd   : > { %2634 = vmatprep.subr.bf16.mxu1 %v3497_v43  ;;  %v4018_v24 = vsub.s32 %v1035_v19, %v1037_v20 }
 0x1fe   : > { %2617 = vmatmul.mubr.msk.bf16.vlgmr.msra.gmra.mrb[0].mxu0 %vm888_vm5, %v863_v50 }
 0x1ff   : > { %2625 = vmatmul.mubr.msk.bf16.vlgmr.msra.gmra.mrb[0].mxu1 %vm888_vm5, %v864_v51  ;;  %2630 = vmatprep.mubr.msk.bf16.mxu0 %vm3498_vm4, %v3497_v43 }
 0x200   : > { %2636 = vmatprep.mubr.msk.bf16.mxu1 %vm3498_vm4, %v3497_v43 }
 0x204   : > { %2629 = vmatpush3.bf16.xpose.msra.mxu0 %v1099_v12  ;;  %v4079_v12 = vld [vmem:[#allocation15 + $0x38] sm:$0xff]  }
 0x205   : > { %2635 = vmatpush3.bf16.xpose.msra.mxu1 %v1164_v13  ;;  %2640 = vmatprep.subr.bf16.mxu0 %v3497_v43  ;;  %v1298_v13 = vsel %vm888_vm5, %v4079_v12, 0 }
 0x206   : > { %2660 = vmatprep.subr.bf16.mxu1 %v3497_v43 }
 0x26c   : > { %v1005_v52 = vpop.permute.xlu0 %1004 }
 0x2d1   : > { %v926_v53 = vpop.f32.mrb[0].mxu0 }
 0x2d2   : > { %v985_v54 = vpop.f32.mrb[0].mxu1  ;;  %v2618_v55 = vpop.f32.mrb[1].mxu0  ;;  %v927_v63 = vadd.f32 %v2524_v62, %v926_v53  ;;  %v4049_v62 = vld [vmem:[#allocation15 + $0x8] sm:$0xff]  }
 0x2d3   : > { %v1007_v56 = vadd.f32 %v1005_v52, %v985_v54  ;;  %v2626_v57 = vpop.f32.mrb[1].mxu1  ;;  %v929_v58 = vpop.f32.mrb[2].mxu0 }
 0x2d4   : > { %v988_v59 = vpop.f32.mrb[2].mxu1  ;;  %v2619_v60 = vpop.f32.mrb[3].mxu0  ;;  %v991_v0 = vadd.f32 %v985_v54, %v927_v63 }
 0x2d5   : > { %1009 = vrot.lane.b32.xlu0 %v1007_v56, %s3499_s17  ;;  %v2627_v61 = vpop.f32.mrb[3].mxu1  ;;  %v4044_v60 = vld [vmem:[#allocation15] sm:$0xff]  }
 0x2d6   : > { %v2531_v1 = vmul.f32 -1.442695, %v991_v0  ;;  %v1277_v61 = vsel %vm888_vm5, %v4044_v60, 0  ;;  %v4054_v0 = vld [vmem:[#allocation15 + $0x10] sm:$0xff]  }
 0x2d8   : > { %2951 = vpow2.f32 %v2531_v1  ;;  %v1283_v1 = vsel %vm888_vm5, %v4054_v0, 0 }
 0x2d9   : > { %1026 = vrot.lane.b32.xlu0 %v844_v48, %s3500_s14  ;;  %v2534_v48 = vld [vmem:[#allocation14 + $0x1] ss:$0 sm:$0xff] }
 0x2e2   : > { %v2952_v2 = vpop.eup %2951 }
 0x2e3   : > { %v995_v3 = vadd.f32 1.0, %v2952_v2  ;;  %v4059_v2 = vld [vmem:[#allocation15 + $0x18] sm:$0xff]  }
 0x2e5   : > { %2953 = vrcp.f32 %v995_v3  ;;  %v1286_v3 = vsel %vm888_vm5, %v4059_v2, 0 }
 0x2ef   : > { %v2954_v4 = vpop.eup %2953 }
 0x2f0   : > { %v1019_v18 = vsub.f32 1.0, %v2954_v4 }
 0x347   : > { %v1010_v5 = vpop.permute.xlu0 %1009 }
 0x348   : > { %v1012_v6 = vmul.f32 %v2954_v4, %v1010_v5 }
 0x34a   : > { %1014 = vrot.lane.b32.xlu1 %v1012_v6, %s3499_s17  ;;  %v4069_v6 = vld [vmem:[#allocation15 + $0x28] sm:$0xff]  }
 0x34b   : > { %v1027_v17 = vpop.permute.xlu0 %1026 }
 0x34c   : > { %v1029_v22 = vmul.f32 %v2954_v4, %v1027_v17  ;;  %v4064_v4 = vld [vmem:[#allocation15 + $0x20] sm:$0xff]  }
 0x34d   : > { %v1289_v5 = vsel %vm888_vm5, %v4064_v4, 0 }
 0x3bc   : > { %v1015_v7 = vpop.permute.xlu1 %1014 }
 0x3bd   : > { %v1017_v8 = vadd.f32 %v1015_v7, %v927_v63  ;;  %v1280_v63 = vsel %vm888_vm5, %v4049_v62, 0  ;;  %v1292_v7 = vsel %vm888_vm5, %v4069_v6, 0 }
 0x3bf   : > { %2955 = vtanh.f32 %v1017_v8  ;;  %v4074_v8 = vld [vmem:[#allocation15 + $0x30] sm:$0xff]  }
 0x3c9   : > { %v2956_v9 = vpop.eup %2955 }
 0x3ca   : > { %1021 = vrot.lane.b32.xlu1 %v2956_v9, %s3501_s1  ;;  %v1295_v9 = vsel %vm888_vm5, %v4074_v8, 0 }
 0x43c   : > { %v1022_v21 = vpop.permute.xlu1 %1021 }
 0x43d   : > { %v1024_v23 = vmul.f32 %v1022_v21, %v1019_v18 }
 0x43f   : > { %v4020_v25 = vadd.f32 %v1029_v22, %v1024_v23 }
 0x441   : > { %v4024_v26 = vpack.c.bf16 %v4020_v25, %v4020_v25 }
 0x443   : > { %v1039_v27 = vrot.slane %v4024_v26, %v4018_v24 }
 0x445   : > { %v1040_v28 = vcombine.high %v1039_v27, %v1039_v27  ;;  %v1047_v29 = vrot.slane %v1039_v27, %v4018_v24 }
 0x447   : > { %v1054_v30 = vrot.slane %v1040_v28, %v4018_v24  ;;  %v1055_v31 = vcombine.high %v1047_v29, %v1047_v29  ;;  %v2549_v28 = vld [vmem:[#allocation23] ss:$0 sm:$0xff] }
 0x449   : > { %v1058_v32 = vunpack.i.l.s16 %v1054_v30  ;;  %v1059_v33 = vunpack.i.h.s16 %v1054_v30  ;;  %v1061_v35 = vunpack.i.h.s16 %v1055_v31 }
 0x44b   : > { %v1078_v34 = vcombine.low %v1047_v29, %v1058_v32  ;;  %v2536_v36 = vpack.i.b16 %v1055_v31, %v1059_v33  ;;  %v1526_v29 = vrot.slane %v2549_v28, %v4018_v24  ;;  %v1519_v31 = vcombine.high %v2549_v28, %v2549_v28 }
 0x44d   : > { %v1085_v37 = vrot.slane %v1078_v34, %v4018_v24  ;;  %v1143_v38 = vcombine.low %v2536_v36, %v1061_v35  ;;  %v1542_v30 = vrot.slane %v1526_v29, %v4018_v24  ;;  %v1533_v33 = vrot.slane %v1519_v31, %v4018_v24 }
 0x44e   : > { %v1357_v34 = vsel %vm1356_vm7, %v4007_v10, 0  ;;  %v1510_v36 = vmul.f32 %v2549_v28, %v4020_v25 }
 0x44f   : > { %v1092_v39 = vrot.slane %v1085_v37, %v4018_v24  ;;  %v1150_v40 = vrot.slane %v1143_v38, %v4018_v24  ;;  %v1564_v32 = vcombine.high %v1542_v30, %v1542_v30  ;;  %v1549_v35 = vrot.slane %v1533_v33, %v4018_v24 }
 0x450   : > { %v1535_v10 = vcombine.high %v1533_v33, %v1533_v33 }
 0x451   : > { %1093 = vrot.lane.b32.xlu1 %v1092_v39, %s3501_s1  ;;  %v1157_v41 = vrot.slane %v1150_v40, %v4018_v24  ;;  %v1505_v39 = vmul.f32 %v2549_v28, %v3991_v47 }
 0x452   : > { %v1563_v40 = vrot.slane %v1535_v10, %v4018_v24 }
 0x453   : > { %1158 = vrot.lane.b32.xlu0 %v1157_v41, %s3501_s1  ;;  %v1507_v41 = vsel %vm1506_vm8, %v1505_v39, 0.0 }
 0x4c3   : > { %v1094_v42 = vpop.permute.xlu1 %1093 }
 0x4c4   : > { %2631 = vmatmul.mubr.msk.bf16.vlgmr.msra.gmra.mrb[4].mxu0 %vm888_vm5, %v1094_v42 }
 0x4c5   : > { %v1159_v44 = vpop.permute.xlu0 %1158  ;;  %2656 = vmatprep.mubr.msk.bf16.mxu0 %vm3498_vm4, %v3497_v43  ;;  %2641 = vmatpush3.bf16.xpose.msra.mxu0 %v1277_v61 }
 0x4c6   : > { %2637 = vmatmul.mubr.msk.bf16.vlgmr.msra.gmra.mrb[4].mxu1 %vm888_vm5, %v1159_v44  ;;  %2642 = vmatprep.subr.bf16.mxu0 %v3497_v43 }
 0x4c7   : > { %2662 = vmatprep.mubr.msk.bf16.mxu1 %vm3498_vm4, %v3497_v43  ;;  %2661 = vmatpush3.bf16.msra.mxu1 %v1357_v34 }
 0x4c8   : > { %2666 = vmatprep.subr.bf16.mxu1 %v3497_v43 }
 0x4cd   : > { %2643 = vmatpush3.bf16.xpose.msra.mxu0 %v1280_v63 }
 0x4ce   : > { %2644 = vmatprep.subr.bf16.mxu0 %v3497_v43 }
 0x4d5   : > { %2645 = vmatpush3.bf16.xpose.msra.mxu0 %v1283_v1 }
 0x4d6   : > { %2646 = vmatprep.subr.bf16.mxu0 %v3497_v43 }
 0x4dd   : > { %2647 = vmatpush3.bf16.xpose.msra.mxu0 %v1286_v3 }
 0x4de   : > { %2648 = vmatprep.subr.bf16.mxu0 %v3497_v43 }
 0x4e5   : > { %2649 = vmatpush3.bf16.xpose.msra.mxu0 %v1289_v5 }
 0x4e6   : > { %2650 = vmatprep.subr.bf16.mxu0 %v3497_v43 }
 0x4ed   : > { %2651 = vmatpush3.bf16.xpose.msra.mxu0 %v1292_v7 }
 0x4ee   : > { %2652 = vmatprep.subr.bf16.mxu0 %v3497_v43 }
 0x4f5   : > { %2653 = vmatpush3.bf16.xpose.msra.mxu0 %v1295_v9 }
 0x4f6   : > { %2654 = vmatprep.subr.bf16.mxu0 %v3497_v43 }
 0x4fd   : > { %2655 = vmatpush3.bf16.xpose.msra.mxu0 %v1298_v13 }
 0x597   : > { %v1135_v46 = vpop.f32.mrb[4].mxu0 }
 0x598   : > { %v1136_v49 = vadd.f32 %v2533_v45, %v1135_v46  ;;  %v2632_v50 = vpop.f32.mrb[5].mxu0 }
 0x599   : > { %v1138_v51 = vpop.f32.mrb[6].mxu0  ;;  %v1200_v52 = vpop.f32.mrb[4].mxu1 }
 0x59a   : > { %v1201_v53 = vadd.f32 %v2534_v48, %v1200_v52  ;;  %v2633_v54 = vpop.f32.mrb[7].mxu0  ;;  %v2638_v55 = vpop.f32.mrb[5].mxu1  ;;  %v1207_v56 = vsel %vm1206_vm6, %v1136_v49, -inf  ;;  %v1402_v51 = vsel %vm1356_vm7, %v4009_v11, 0  ;;  %v1656_v11 = vld [vmem:[#allocation4 + $0x4] sm:$0xf] }
 0x59b   : > { %v1203_v57 = vpop.f32.mrb[6].mxu1  ;;  %1208 = vmax.xlane.f32.xlu1 %v1207_v56  ;;  %v1655_v56 = vld [vmem:[#allocation4] sm:$0xf] }
 0x59c   : > { %v2639_v58 = vpop.f32.mrb[7].mxu1  ;;  %v1210_v59 = vsel %vm1206_vm6, %v1201_v53, -inf }
 0x59d   : > { %1211 = vmax.xlane.f32.xlu0 %v1210_v59  ;;  %v1658_v58 = vsel %vm1356_vm7, %v1655_v56, 0  ;;  %v1701_v59 = vsel %vm1356_vm7, %v1656_v11, 0 }
 0x628   : > { %v1209_v14 = vpop.xlane.xlu1 %1208 }
 0x629   : > { %v1213_v15 = vsub.f32 %v1136_v49, %v1209_v14 }
 0x62a   : > { %v1212_v17 = vpop.xlane.xlu0 %1211 }
 0x62b   : > { %v1215_v18 = vmul.f32 1.442695, %v1213_v15  ;;  %v1214_v19 = vsub.f32 %v1201_v53, %v1212_v17 }
 0x62d   : > { %2957 = vpow2.f32 %v1215_v18  ;;  %v1217_v20 = vmul.f32 1.442695, %v1214_v19 }
 0x62f   : > { %2959 = vpow2.f32 %v1217_v20 }
 0x637   : > { %v2958_v21 = vpop.eup %2957 }
 0x638   : > { %v1219_v22 = vsel %vm1206_vm6, %v2958_v21, 0.0 }
 0x639   : > { %v2960_v23 = vpop.eup %2959  ;;  %1220 = vadd.xlane.f32.xlu0 %v1219_v22 }
 0x63a   : > { %v1222_v27 = vsel %vm1206_vm6, %v2960_v23, 0.0 }
 0x63b   : > { %1223 = vadd.xlane.f32.xlu1 %v1222_v27 }
 0x64c   : > { %1566 = vrot.lane.b32.xlu1 %v1542_v30, %s3499_s17 }
 0x64f   : > { %1231 = vrot.lane.b32.xlu0 %v4024_v26, %s3501_s1  ;;  %v1534_v26 = vcombine.high %v1526_v29, %v1526_v29 }
 0x651   : > { %v1556_v37 = vrot.slane %v1534_v26, %v4018_v24 }
 0x653   : > { %1570 = vrot.lane.b32.xlu0 %v1564_v32, %s3499_s17  ;;  %1568 = vrot.lane.b32.xlu1 %v1556_v37, %s3499_s17  ;;  %v1565_v38 = vcombine.high %v1556_v37, %v1556_v37 }
 0x657   : > { %1574 = vrot.lane.b32.xlu0 %v1549_v35, %s3499_s17  ;;  %1572 = vrot.lane.b32.xlu1 %v1565_v38, %s3499_s17 }
 0x65b   : > { %1512 = vrot.lane.b32.xlu0 %v1510_v36, %s3501_s1  ;;  %1576 = vrot.lane.b32.xlu1 %v1563_v40, %s3499_s17 }
 0x67a   : > { %1508 = vadd.xlane.f32.xlu0 %v1507_v41 }
 0x6c6   : > { %v1221_v42 = vpop.xlane.xlu0 %1220 }
 0x6c7   : > { %2961 = vrcp.f32 %v1221_v42 }
 0x6c8   : > { %v1224_v44 = vpop.xlane.xlu1 %1223 }
 0x6c9   : > { %2963 = vrcp.f32 %v1224_v44 }
 0x6ca   : > { %v1232_v45 = vpop.permute.xlu0 %1231 }
 0x6cb   : > { %2657 = vmatmul.mubr.msk.bf16.vlgmr.msra.gmra.mrb[8].mxu0 %vm888_vm5, %v1232_v45 }
 0x6cc   : > { %v1567_v1 = vpop.permute.xlu1 %1566 }
 0x6ce   : > { %v4107_v46 = vpop.permute.xlu0 %1570 }
 0x6d0   : > { %v1569_v3 = vpop.permute.xlu1 %1568 }
 0x6d1   : > { %v2962_v47 = vpop.eup %2961 }
 0x6d2   : > { %v1226_v48 = vmul.f32 %v2962_v47, %v2958_v21  ;;  %v4109_v49 = vpop.permute.xlu0 %1574 }
 0x6d3   : > { %v2964_v52 = vpop.eup %2963 }
 0x6d4   : > { %v1229_v50 = vpack.c.bf16 %v1226_v48, %v1226_v48  ;;  %v1228_v55 = vmul.f32 %v2964_v52, %v2960_v23 }
 0x6d6   : > { %2663 = vmatmul.mubr.msk.bf16.vlgmr.msra.gmra.mrb[8].mxu1 %vm1352_vm9, %v1229_v50  ;;  %v1513_v53 = vpop.permute.xlu0 %1512  ;;  %v1230_v57 = vpack.c.bf16 %v1228_v55, %v1228_v55 }
 0x6d7   : > { %2667 = vmatpush3.bf16.msra.mxu1 %v1402_v51  ;;  %v1515_v54 = vsel %vm1506_vm8, %v1513_v53, 0.0  ;;  %2668 = vmatprep.mubr.msk.bf16.mxu1 %vm3498_vm4, %v3497_v43 }
 0x6d8   : > { %1516 = vadd.xlane.f32.xlu0 %v1515_v54  ;;  %2672 = vmatprep.subr.bf16.mxu1 %v3497_v43 }
 0x6de   : > { %2669 = vmatmul.mubr.msk.bf16.vlgmr.msra.gmra.mrb[12].mxu1 %vm1352_vm9, %v1230_v57 }
 0x6df   : > { %2673 = vmatpush3.bf16.msra.mxu1 %v1658_v58  ;;  %2674 = vmatprep.mubr.msk.bf16.mxu1 %vm3498_vm4, %v3497_v43 }
 0x6e0   : > { %2678 = vmatprep.subr.bf16.mxu1 %v3497_v43 }
 0x6e6   : > { %2675 = vmatmul.mubr.msk.bf16.vlgmr.msra.gmra.mrb[16].mxu1 %vm1352_vm9, %v1229_v50 }
 0x6e7   : > { %2679 = vmatpush3.bf16.msra.mxu1 %v1701_v59  ;;  %2680 = vmatprep.mubr.msk.bf16.mxu1 %vm3498_vm4, %v3497_v43 }
 0x6e8   : > { %2684 = vmatprep.subr.bf16.mxu1 %v3497_v43 }
 0x6ee   : > { %2681 = vmatmul.mubr.msk.bf16.vlgmr.msra.gmra.mrb[20].mxu1 %vm1352_vm9, %v1230_v57 }
 0x6ef   : > { %2685 = vmatpush3.bf16.msra.mxu1 %v4044_v60  ;;  %2700 = vmatprep.mubr.msk.bf16.mxu1 %vm3498_vm4, %v3497_v43 }
 0x6f0   : > { %2686 = vmatprep.subr.bf16.mxu1 %v3497_v43 }
 0x6f3   : > { %2687 = vmatpush3.bf16.msra.mxu1 %v4049_v62 }
 0x6f4   : > { %2688 = vmatprep.subr.bf16.mxu1 %v3497_v43 }
 0x6f7   : > { %2689 = vmatpush3.bf16.msra.mxu1 %v4054_v0 }
 0x6f8   : > { %2690 = vmatprep.subr.bf16.mxu1 %v3497_v43 }
 0x6fb   : > { %2691 = vmatpush3.bf16.msra.mxu1 %v4059_v2 }
 0x6fc   : > { %2692 = vmatprep.subr.bf16.mxu1 %v3497_v43 }
 0x6ff   : > { %2693 = vmatpush3.bf16.msra.mxu1 %v4064_v4 }
 0x700   : > { %2694 = vmatprep.subr.bf16.mxu1 %v3497_v43 }
 0x703   : > { %2695 = vmatpush3.bf16.msra.mxu1 %v4069_v6 }
 0x704   : > { %2696 = vmatprep.subr.bf16.mxu1 %v3497_v43 }
 0x707   : > { %2697 = vmatpush3.bf16.msra.mxu1 %v4074_v8 }
 0x708   : > { %2698 = vmatprep.subr.bf16.mxu1 %v3497_v43 }
 0x70b   : > { %2699 = vmatpush3.bf16.msra.mxu1 %v4079_v12  ;;  %v1573_v12 = vpop.permute.xlu1 %1572 }
 0x70f   : > { %v1577_v28 = vpop.permute.xlu1 %1576 }
 0x79e   : > { %v4146_v60 = vpop.f32.mrb[8].mxu0 }
 0x79f   : > { %v2658_v61 = vpop.f32.mrb[9].mxu0  ;;  %v1341_v62 = vsel %vm1340_vm10, %v4146_v60, -inf }
 0x7a0   : > { %1342 = vmax.xlane.f32.xlu1 %v1341_v62  ;;  %v1337_v63 = vpop.f32.mrb[10].mxu0 }
 0x7a1   : > { %v2659_v0 = vpop.f32.mrb[11].mxu0 }
 0x7a9   : > { %v1393_v2 = vpop.f32.mrb[8].mxu1 }
 0x7aa   : > { %v1452_v4 = vrot.slane %v1393_v2, %v4018_v24  ;;  %v2664_v5 = vpop.f32.mrb[9].mxu1 }
 0x7ab   : > { %v1396_v6 = vpop.f32.mrb[10].mxu1 }
 0x7ac   : > { %v1453_v43 = vcombine.high %v1452_v4, %v1452_v4  ;;  %v2665_v7 = vpop.f32.mrb[11].mxu1  ;;  %v4152_v8 = vrot.slane %v1452_v4, %v4018_v24 }
 0x7ad   : > { %v3503_v7 = vmov 0  }
 0x7ae   : > { %v4155_v9 = vrot.slane %v1453_v43, %v4018_v24  ;;  %v4159_v13 = vcombine.high %v4152_v8, %v4152_v8  ;;  %v1584_v20 = vmul.f32 %v1567_v1, %v4152_v8  ;;  %2937 = vset.pattern.permute.xlu1 %v3503_v7  ;;  %2938 = vset.pattern.permute.xlu0 %v3503_v7 }
 0x7b0   : > { %v1585_v15 = vmul.f32 %v1569_v3, %v4155_v9  ;;  %v1586_v27 = vmul.f32 %v4107_v46, %v4159_v13 }
 0x7b1   : > { %v1438_v14 = vpop.f32.mrb[12].mxu1 }
 0x7b2   : > { %v1475_v17 = vrot.slane %v1438_v14, %v4018_v24  ;;  %v2670_v18 = vpop.f32.mrb[13].mxu1  ;;  %v1596_v29 = vcombine.low %v1584_v20, %v1585_v15 }
 0x7b3   : > { %v1441_v19 = vpop.f32.mrb[14].mxu1 }
 0x7b4   : > { %v1476_v21 = vcombine.high %v1475_v17, %v1475_v17  ;;  %v4165_v22 = vrot.slane %v1475_v17, %v4018_v24  ;;  %v2671_v23 = vpop.f32.mrb[15].mxu1  ;;  %v1605_v26 = vrot.slane %v1596_v29, %v4018_v24  ;;  %v1509_v19 = vpop.xlane.xlu0 %1508 }
 0x7b5   : > { %v2550_v23 = vld [vmem:[#allocation5] ss:$0 sm:$0xff] }
 0x7b6   : > { %v4170_v30 = vrot.slane %v1476_v21, %v4018_v24  ;;  %v1587_v31 = vmul.f32 %v1573_v12, %v4165_v22  ;;  %v4175_v32 = vcombine.high %v4165_v22, %v4165_v22 }
 0x7b8   : > { %v1597_v33 = vcombine.low %v1586_v27, %v1587_v31  ;;  %v1588_v34 = vmul.f32 %v4109_v49, %v4170_v30  ;;  %v1589_v35 = vmul.f32 %v1577_v28, %v4175_v32  ;;  %v1517_v20 = vpop.xlane.xlu0 %1516 }
 0x7b9   : > { %v1694_v36 = vpop.f32.mrb[16].mxu1  ;;  %v1518_v21 = vadd.f32 %v1517_v20, %v1509_v19  ;;  %v3504_v19 = vmov 1.0|1.0  }
 0x7ba   : > { %v1612_v37 = vrot.slane %v1597_v33, %v4018_v24  ;;  %v1598_v38 = vcombine.low %v1588_v34, %v1589_v35  ;;  %v1751_v10 = vrot.slane %v1694_v36, %v4018_v24  ;;  %v2676_v39 = vpop.f32.mrb[17].mxu1 }
 0x7bb   : > { %v1697_v40 = vpop.f32.mrb[18].mxu1 }
 0x7bc   : > { %v1619_v41 = vrot.slane %v1598_v38, %v4018_v24  ;;  %v1752_v42 = vcombine.high %v1751_v10, %v1751_v10  ;;  %v2677_v44 = vpop.f32.mrb[19].mxu1  ;;  %v1620_v45 = vcombine.low %v1605_v26, %v1612_v37  ;;  %v1759_v48 = vrot.slane %v1751_v10, %v4018_v24 }
 0x7be   : > { %v1627_v46 = vrot.slane %v1620_v45, %v4018_v24  ;;  %v1634_v47 = vrot.slane %v1619_v41, %v4018_v24  ;;  %v1766_v49 = vrot.slane %v1752_v42, %v4018_v24  ;;  %v1767_v56 = vcombine.high %v1759_v48, %v1759_v48 }
 0x7c0   : > { %v1635_v50 = vcombine.low %v1627_v46, %v1634_v47  ;;  %v1803_v57 = vcombine.low %v1759_v48, %v1766_v49 }
 0x7c1   : > { %v1737_v51 = vpop.f32.mrb[20].mxu1 }
 0x7c2   : > { %v1774_v52 = vrot.slane %v1737_v51, %v4018_v24  ;;  %v2682_v53 = vpop.f32.mrb[21].mxu1  ;;  %v1637_v54 = vsel %vm1506_vm8, %v1635_v50, 0.0  ;;  %v1812_v0 = vrot.slane %v1803_v57, %v4018_v24 }
 0x7c3   : > { %v1740_v55 = vpop.f32.mrb[22].mxu1  ;;  %1638 = vadd.xlane.f32.xlu1 %v1637_v54 }
 0x7c4   : > { %v1775_v58 = vcombine.high %v1774_v52, %v1774_v52  ;;  %v1782_v11 = vrot.slane %v1774_v52, %v4018_v24  ;;  %v2683_v59 = vpop.f32.mrb[23].mxu1 }
 0x7c6   : > { %v1789_v61 = vrot.slane %v1775_v58, %v4018_v24  ;;  %v1790_v62 = vcombine.high %v1782_v11, %v1782_v11  ;;  %v1804_v63 = vcombine.low %v1767_v56, %v1782_v11 }
 0x7c8   : > { %v1805_v1 = vcombine.low %v1789_v61, %v1790_v62  ;;  %v1819_v2 = vrot.slane %v1804_v63, %v4018_v24  ;;  %v1847_v63 = vand.u32 127, %v1036_v16 }
 0x7ca   : > { %v1826_v3 = vrot.slane %v1805_v1, %v4018_v24  ;;  %v1827_v4 = vcombine.low %v1812_v0, %v1819_v2 }
 0x7cc   : > { %v1834_v5 = vrot.slane %v1827_v4, %v4018_v24  ;;  %v1841_v6 = vrot.slane %v1826_v3, %v4018_v24 }
 0x7ce   : > { %v1842_v43 = vcombine.low %v1834_v5, %v1841_v6 }
 0x82d   : > { %v1343_v12 = vpop.xlane.xlu1 %1342 }
 0x82e   : > { %v1344_v14 = vsub.f32 %v4146_v60, %v1343_v12 }
 0x830   : > { %v1345_v15 = vmul.f32 1.442695, %v1344_v14 }
 0x832   : > { %2965 = vpow2.f32 %v1345_v15 }
 0x83c   : > { %v2966_v17 = vpop.eup %2965 }
 0x83d   : > { %v1347_v18 = vsel %vm1340_vm10, %v2966_v17, 0.0 }
 0x83e   : > { %1348 = vadd.xlane.f32.xlu0 %v1347_v18 }
 0x850   : > { %v1639_v27 = vpop.xlane.xlu1 %1638 }
 0x851   : > { %v1640_v28 = vadd.f32 %v1639_v27, %v1518_v21 }
 0x853   : > { %v1648_v29 = vadd.f32 %v2550_v23, %v1640_v28  ;;  %v2028_v28 = vld [vmem:[#allocation24 + $0x8] sm:$0xff] (!%p2519_p13) }
 0x855   : > { %v2551_v31 = vmul.f32 -1.442695, %v1648_v29  ;;  %v2029_v29 = vld [vmem:[#allocation24 + $0x10] sm:$0xff] (!%p2519_p13) }
 0x857   : > { %2967 = vpow2.f32 %v2551_v31  ;;  %v2038_v31 = vcombine.low (!%p2519_p13), %v4152_v8, %v4155_v9 }
 0x861   : > { %v2968_v33 = vpop.eup %2967 }
 0x862   : > { %v1652_v34 = vadd.f32 1.0, %v2968_v33  ;;  %v3505_v33 = vmov (!%p2519_p13), 0.0|0.0  }
 0x863   : > { %2715 = vmatprep.subr.bf16.mxu0 (!%p2519_p13), %v3505_v33 }
 0x864   : > { %2969 = vrcp.f32 %v1652_v34 }
 0x86e   : > { %v2970_v35 = vpop.eup %2969 }
 0x86f   : > { %1793 = vperm.xlu1 %2937, %v2970_v35   ;;  %v1797_v60 = vsub.f32 1.0, %v2970_v35  ;;  %v2030_v35 = vld [vmem:[#allocation24 + $0x18] sm:$0xff] (!%p2519_p13) }
 0x871   : > { %1800 = vperm.xlu0 %2938, %v1797_v60   ;;  %v3507_v60 = vmov (!%p2519_p13), 0.0  }
 0x872   : > { %2712 = vmatprep.mubr.msk.f32.mxu0 (!%p2519_p13), %vm3506_vm15, %v3507_v60 }
 0x8cb   : > { %v1349_v36 = vpop.xlane.xlu0 %1348 }
 0x8cc   : > { %2971 = vrcp.f32 %v1349_v36  ;;  %v2039_v36 = vcombine.low (!%p2519_p13), %v4159_v13, %v4165_v22  ;;  %v2560_v13 = vld [vmem:[#allocation26] ss:$0 sm:$0xff] (!%p2519_p13) }
 0x8d6   : > { %v2972_v26 = vpop.eup %2971 }
 0x8d7   : > { %v1351_v38 = vmul.f32 %v2972_v26, %v2966_v17  ;;  %v2040_v26 = vcombine.low (!%p2519_p13), %v4170_v30, %v4175_v32 }
 0x8d9   : > { %v2061_v8 = vrot.slane (!%p2519_p13), %v2040_v26, %v4018_v24 }
 0x8ee   : > { %v1794_v37 = vpop.permute.xlu1 %1793 }
 0x8ef   : > { %v1796_v39 = vmul.f32 %v1794_v37, %v1351_v38  ;;  %v2047_v37 = vrot.slane (!%p2519_p13), %v2038_v31, %v4018_v24  ;;  %v2719_v38 = vpack.c.bf16 (!%p2519_p13), %v2030_v35, %v2029_v29 }
 0x8f0   : > { %v1801_v10 = vpop.permute.xlu0 %1800 }
 0x8f1   : > { %v1844_v40 = vmul.f32 %v1842_v43, %v1801_v10  ;;  %v2054_v10 = vrot.slane (!%p2519_p13), %v2039_v36, %v4018_v24 }
 0x8f3   : > { %v1845_v41 = vadd.f32 %v1844_v40, %v1796_v39  ;;  %v2062_v9 = vcombine.low (!%p2519_p13), %v2047_v37, %v2054_v10  ;;  %v2076_v39 = vrot.slane (!%p2519_p13), %v2061_v8, %v4018_v24 }
 0x8f5   : > { %v1921_v42 = vcombine.high %v1845_v41, %v1845_v41  ;;  %v1928_v44 = vrot.slane %v1845_v41, %v4018_v24  ;;  %v1848_v45 = vsel %vm1340_vm10, %v1845_v41, -inf  ;;  %v2069_v40 = vrot.slane (!%p2519_p13), %v2062_v9, %v4018_v24 }
 0x8f6   : > { %1849 = vmax.xlane.f32.xlu1 %v1848_v45 }
 0x8f7   : > { %v1935_v46 = vrot.slane %v1921_v42, %v4018_v24  ;;  %v1936_v47 = vcombine.high %v1928_v44, %v1928_v44  ;;  %v1944_v48 = vrot.slane %v1928_v44, %v4018_v24 }
 0x8f9   : > { %v1937_v49 = vcombine.high %v1935_v46, %v1935_v46  ;;  %v1958_v50 = vrot.slane %v1936_v47, %v4018_v24  ;;  %v1966_v51 = vcombine.high %v1944_v48, %v1944_v48  ;;  %v1951_v52 = vrot.slane %v1935_v46, %v4018_v24 }
 0x8fb   : > { %v1965_v53 = vrot.slane %v1937_v49, %v4018_v24  ;;  %v1967_v54 = vcombine.high %v1958_v50, %v1958_v50  ;;  %v1968_v55 = vcombine.low %v1944_v48, %v1958_v50  ;;  %v1982_v57 = vrot.slane %v1966_v51, %v4018_v24 }
 0x8fd   : > { %v1975_v56 = vrot.slane %v1968_v55, %v4018_v24  ;;  %v1991_v58 = vcombine.low %v1967_v54, %v1951_v52  ;;  %v2005_v61 = vrot.slane %v1965_v53, %v4018_v24 }
 0x8ff   : > { %v1983_v11 = vcombine.low %v1975_v56, %v1982_v57  ;;  %v1998_v59 = vrot.slane %v1991_v58, %v4018_v24 }
 0x901   : > { %v2006_v62 = vcombine.low %v1998_v59, %v2005_v61  ;;  %2557 = vst.sshfl [vmem:[%s3976_s22] sm:$0x15 pattern:$0x73625140] %v1983_v11 }
 0x903   : > { %2558 = vst.sshfl [vmem:[%s3976_s22 + $0x4] sm:$0x15 pattern:$0x73625140] %v2006_v62 }
 0x983   : > { %v1850_v0 = vpop.xlane.xlu1 %1849 }
 0x984   : > { %vm1851_vm11 = vcmp.eq.f32.partialorder %v1845_v41, %v1850_v0  ;;  %v2077_v41 = vcombine.low (!%p2519_p13), %v2069_v40, %v2076_v39 }
 0x985   : > { %v1852_v1 = vsel %vm1851_vm11, %v1847_v63, 128 }
 0x986   : > { %v1853_v2 = vsel %vm1340_vm10, %v1852_v1, 2147483647 }
 0x987   : > { %v1855_v3 = vshra.s32 %v1853_v2, 16  ;;  %v1854_v5 = vand.u32 65535, %v1853_v2 }
 0x989   : > { %v1857_v4 = vcvt.s32.f32 %v1855_v3  ;;  %v1856_v43 = vcvt.s32.f32 %v1854_v5 }
 0x98b   : > { %1858 = vmin.xlane.f32.xlu0 %v1857_v4 }
 0xa18   : > { %v1859_v6 = vpop.xlane.xlu0 %1858 }
 0xa19   : > { %vm1860_vm12 = vcmp.eq.f32.partialorder %v1857_v4, %v1859_v6  ;;  %v1865_v12 = vcvt.f32.s32 %v1859_v6 }
 0xa1a   : > { %v1861_v7 = vsel %vm1860_vm12, %v1856_v43, inf }
 0xa1b   : > { %1862 = vmin.xlane.f32.xlu1 %v1861_v7  ;;  %v1866_v16 = vshll.u32 %v1865_v12, 16 }
 0xa2c   : > { %2020 = vrot.lane.b32.xlu1 %v4020_v25, %s3501_s1  ;;  %v2027_v25 = vld [vmem:[#allocation24] sm:$0xff] (!%p2519_p13) }
 0xa2d   : > { %v2716_v34 = vpack.c.bf16 (!%p2519_p13), %v2028_v28, %v2027_v25 }
 0xa2f   : > { %2717 = vmatpush3.bf16.msra.mxu0 (!%p2519_p13), %v2716_v34 }
 0xa30   : > { %2718 = vmatprep.subr.bf16.mxu0 (!%p2519_p13), %v3505_v33 }
 0xa33   : > { %2720 = vmatpush3.bf16.msra.mxu0 (!%p2519_p13), %v2719_v38 }
 0xa36   : > { %2713 = vmatmul.mubr.msk.f32.vlgmr.msra.gmra.mrb[0].mxu0 (!%p2519_p13), %vm888_vm5, %v2077_v41 }
 0xaa8   : > { %v1863_v14 = vpop.xlane.xlu1 %1862 }
 0xaa9   : > { %v1864_v15 = vcvt.f32.s32 %v1863_v14 }
 0xaab   : > { %v1867_v17 = vadd.s32 %v1866_v16, %v1864_v15 }
 0xaac   : > { %v2021_v18 = vpop.permute.xlu1 %2020 }
 0xaad   : > { %vm1868_vm13 = vcmp.eq.s32.totalorder %v1847_v63, %v1867_v17  ;;  %2023 = vst.msk [vmem:[#allocation3] sm:$0x3f] %vm1506_vm8, %v2021_v18 }
 0xaae   : > { %vm2555_vm14 = vmpackc.low %vm1868_vm13, %vm1868_vm13 }
 0xaaf   : > { %2701 = vmatmul.mubr.msk.bf16.vlgmr.msra.gmra.mrb[24].mxu1 %vm2555_vm14, %v3504_v19 }
 0xb09   : > { %v2146_v22 = vpop.f32.mrb[0].mxu0 (!%p2519_p13) }
 0xb0a   : > { %v2147_v30 = vadd.f32 (!%p2519_p13), %v2560_v13, %v2146_v22  ;;  %v2714_v32 = vpop.f32.mrb[1].mxu0 (!%p2519_p13) }
 0xb0c   : > { %v2151_v42 = vcombine.high (!%p2519_p13), %v2147_v30, %v2147_v30  ;;  %v2158_v44 = vrot.slane (!%p2519_p13), %v2147_v30, %v4018_v24 }
 0xb0e   : > { %v2165_v45 = vrot.slane (!%p2519_p13), %v2151_v42, %v4018_v24  ;;  %v2166_v46 = vcombine.high (!%p2519_p13), %v2158_v44, %v2158_v44  ;;  %v2174_v47 = vrot.slane (!%p2519_p13), %v2158_v44, %v4018_v24 }
 0xb10   : > { %v2167_v48 = vcombine.high (!%p2519_p13), %v2165_v45, %v2165_v45  ;;  %v2188_v49 = vrot.slane (!%p2519_p13), %v2166_v46, %v4018_v24  ;;  %v2196_v50 = vcombine.high (!%p2519_p13), %v2174_v47, %v2174_v47  ;;  %v2181_v51 = vrot.slane (!%p2519_p13), %v2165_v45, %v4018_v24 }
 0xb12   : > { %v2195_v52 = vrot.slane (!%p2519_p13), %v2167_v48, %v4018_v24  ;;  %v2197_v53 = vcombine.high (!%p2519_p13), %v2188_v49, %v2188_v49  ;;  %v2198_v54 = vcombine.low (!%p2519_p13), %v2174_v47, %v2188_v49  ;;  %v2212_v56 = vrot.slane (!%p2519_p13), %v2196_v50, %v4018_v24 }
 0xb14   : > { %v2205_v55 = vrot.slane (!%p2519_p13), %v2198_v54, %v4018_v24  ;;  %v2221_v57 = vcombine.low (!%p2519_p13), %v2197_v53, %v2181_v51  ;;  %v2235_v59 = vrot.slane (!%p2519_p13), %v2195_v52, %v4018_v24 }
 0xb16   : > { %v2213_v58 = vcombine.low (!%p2519_p13), %v2205_v55, %v2212_v56  ;;  %v2228_v11 = vrot.slane (!%p2519_p13), %v2221_v57, %v4018_v24 }
 0xb18   : > { %v2220_v61 = vrot.slane (!%p2519_p13), %v2213_v58, %v4018_v24  ;;  %v2236_v62 = vcombine.low (!%p2519_p13), %v2228_v11, %v2235_v59 }
 0xb1a   : > { %v2243_v63 = vrot.slane (!%p2519_p13), %v2236_v62, %v4018_v24  ;;  %2247 = vst.msk [vmem:[#allocation28] sm:$0x7] (!%p2519_p13), %vm2246_vm0, %v2220_v61 }
 0xb1c   : > { %2248 = vst.msk [vmem:[#allocation28 + $0x4] sm:$0x7] (!%p2519_p13), %vm2246_vm0, %v2243_v63 }
 0xb7f   : > { %2026 = sbr.rel (%p2519_p13) target bundleno = 2950 (0xb86), region = 136 }
 0xb82   : > { %v1914_v20 = vpop.f32.mrb[24].mxu1 }
 0xb83   : > { %2018 = vst.msk [vmem:[#allocation2] sm:$0x3f] %vm1506_vm8, %v1914_v20  ;;  %v2702_v21 = vpop.f32.mrb[25].mxu1 }
 0xb84   : > { %v1917_v23 = vpop.f32.mrb[26].mxu1 }
 0xb85   : > { %v2703_v27 = vpop.f32.mrb[27].mxu1 }
 0xb86 PF: > { %s4404_s28 = sld [smem:[#allocation42_spill]]  ;;  %s4406_s24 = sld [smem:[#allocation47_spill]] }
 0xb87   : > { %s4407_s18 = sld [smem:[#allocation52_spill]]  ;;  %s2265_s11 = sshll.u32 %s3976_s22, 4  ;;  %s4251_s11 = int_to_ptr.vmem [resolvable:$true] %s2265_s11 }
 0xb88   : > { %s4255_s23 = scalar_lea.sflag [#allocation8], %s699_s19  ;;  %s3337_s27 = scalar_lea.vmem %s4251_s11, 128 }
 0xb89   : > { %p3338_p1 = scmp.ne.s32.totalorder %s4251_s11, %s3337_s27  ;;  %s3508_s26 = smov [#allocation27]  }
 0xb8a   : > { %s3341_s25 = sshll.u32 %s3508_s26, 4  ;;  %s3342_s25 = int_to_ptr.vmem [resolvable:$false] %s3341_s25 }
 0xb8b   : > { %s3343_s14 = scalar_lea.vmem %s3342_s25, 256  ;;  %p3344_p0 = scmp.lt.s32.totalorder %s4251_s11, %s3342_s25 }
 0xb8c   : > { %s2563_s29 = sshll.u32 %s4404_s28, 6  ;;  %p4408_p8 = scmp.ne.s32.totalorder %s4406_s24, 0 }
 0xb8d   : > { %s4248_s16 = scalar_lea.hbm %s4407_s18, %s2563_s29  ;;  %p3345_p3 = scmp.lt.s32.totalorder %s3343_s14, %s3337_s27 }
 0xb8e   : > { %p3339_p10 = pnand %p3338_p1, %p4408_p8 }
 0xb8f   : > { %p3346_p5 = por %p3345_p3, %p3344_p0 }
 0xb90   : > { %p3340_p11 = pneg %p3339_p10 }
 0xb92   : > { %p3347_p6 = pnand %p3346_p5, %p3340_p11 }
 0xb94   : > { %3350 = shalt.err (!%p3347_p6)
}
 0xb95   : > { %s3351_s19 = scalar_lea.hbm %s4248_s16, 128  ;;  %s3355_s30 = scalar_lea.hbm %s4407_s18, 512 }
 0xb96   : > { %p3352_p7 = scmp.ne.s32.totalorder %s4248_s16, %s3351_s19  ;;  %p3356_p2 = scmp.lt.u32.totalorder %s4248_s16, %s4407_s18 }
 0xb97   : > { %p3357_p4 = scmp.lt.u32.totalorder %s3355_s30, %s3351_s19  ;;  %p3359_p1 = scmp.lt.u32.totalorder %s3351_s19, %s4248_s16 }
 0xb98   : > { %p3353_p9 = pnand %p3352_p7, %p4408_p8 }
 0xb99   : > { %p3358_p13 = por %p3357_p4, %p3356_p2 }
 0xb9a   : > { %p3354_p12 = pneg %p3353_p9 }
 0xb9b   : > { %p3360_p10 = por %p3359_p1, %p3358_p13 }
 0xb9d   : > { %p3361_p11 = pnand %p3360_p10, %p3354_p12 }
 0xb9f   : > { %3364 = shalt.err (!%p3361_p11)
}
 0xba0   : > { %s3509_s29 = smov 256   ;;  %s4409_s15 = sld [smem:[#allocation45_spill]] }
 0xba1   : > { %s3510_s21 = smov 4   ;;  %s3511_s27 = smov [#allocation28]  }
 0xba2   : > { %2773 = dma.vmem_to_hbm [thread:$0]  (%p4408_p8), %s4251_s11, 128, %s4248_s16, %s4255_s23, %s3499_s17, %s3509_s29, %s3510_s21  }
 0xba3   : > { %s2281_s26 = sshll.u32 %s3511_s27, 4  ;;  %s2282_s26 = int_to_ptr.vmem [resolvable:$true] %s2281_s26 }
 0xba4   : > { %s3365_s25 = scalar_lea.vmem %s2282_s26, 128  ;;  %p3372_p7 = scmp.lt.s32.totalorder %s2282_s26, %s2282_s26 }
 0xba5   : > { %p3366_p0 = scmp.ne.s32.totalorder %s2282_s26, %s3365_s25  ;;  %p3373_p9 = scmp.lt.s32.totalorder %s3365_s25, %s3365_s25 }
 0xba6   : > { %p4410_p3 = scmp.ne.s32.totalorder %s4409_s15, 0 }
 0xba7   : > { %p3374_p12 = por %p3373_p9, %p3372_p7 }
 0xba8   : > { %p3367_p5 = pnand %p3366_p0, %p4410_p3 }
 0xbaa   : > { %p3368_p6 = pneg %p3367_p5 }
 0xbac   : > { %p3375_p2 = pnand %p3374_p12, %p3368_p6 }
 0xbae   : > { %3378 = shalt.err (!%p3375_p2)
}
 0xbaf   : > { %s4411_s22 = sld [smem:[#allocation53_spill]] }
 0xbb5   : > { %s4412_s1 = smov %s4411_s22  ;;  %s3379_s24 = scalar_lea.hbm %s4411_s22, 128 }
 0xbb6   : > { %p3380_p8 = scmp.ne.s32.totalorder %s4412_s1, %s3379_s24  ;;  %p3385_p1 = scmp.lt.u32.totalorder %s3379_s24, %s4412_s1 }
 0xbb8   : > { %p3381_p4 = pnand %p3380_p8, %p4410_p3 }
 0xbba   : > { %p3382_p13 = pneg %p3381_p4 }
 0xbbc   : > { %p3387_p10 = pnand %p3385_p1, %p3382_p13 }
 0xbbe   : > { %3390 = shalt.err (!%p3387_p10)
}
 0xbbf   : > { %2775 = dma.vmem_to_hbm [thread:$0]  (%p4410_p3), %s2282_s26, 128, %s4412_s1, [#allocation29], %s3499_s17, %s3499_s17, %s3510_s21  }
 0xbc0   : > { %3444 = dma.done.wait (%p4410_p3), [#allocation29], 128  }
 0xbc1   : > { %3446 = vsyncadd (%p4410_p3), [#allocation29], 4294967168 }
 0xbc2 PF: > { %s4413_s29 = sld [smem:[#allocation44_spill]]  ;;  %s4414_s27 = sld [smem:[#allocation39_spill]] }
 0xbc3   : > { %s4415_s25 = sld [smem:[#allocation48_spill]] }
 0xbc8   : > { %p2851_p11 = scmp.ge.s32.totalorder %s4413_s29, 2  ;;  %s2300_s14 = sand.u32 1, %s4414_s27  }
 0xbc9   : > { %p4416_p0 = scmp.ne.s32.totalorder %s4415_s25, 0  ;;  %s2301_s19 = scalar_lea.sflag [#allocation8], %s2300_s14 }
 0xbcb   : > { %p2820_p5 = pnand %p2851_p11, %p4416_p0 }
 0xbcd   : > { %3448 = dma.done.wait (!%p2820_p5), %s2301_s19, 128  }
 0xbce   : > { %3450 = vsyncadd (!%p2820_p5), %s2301_s19, 4294967168  ;;  %s39_s24 = sadd.s32 1, %s4413_s29   ;;  %s4417_s20 = sld [smem:[#allocation40_spill]] }
 0xbcf   : > { %p36_p6 = scmp.ge.s32.totalorder %s39_s24, 6   ;;  %s4418_s21 = sld [smem:[#allocation41_spill]] }
 0xbd0   : > { %s4419_s22 = sld [smem:[#allocation49_spill]]  ;;  %s4420_s23 = sld [smem:[#allocation43_spill]] }
 0xbd1   : > { %s4421_s11 = sld [smem:[#allocation46_spill]]  ;;  %38 = sbr.rel (!%p36_p6) target bundleno = 16 (0x10), region = 182 }
 0xbd8   :  { %2306 = vsyncpa [#allocation7], 1 }
 0xbd9   :  { %2308 = vsyncpa [#allocation7 + $0x1], 1 }
 0xbda   :  { %2309 = vsyncpa [#allocation10], 1 }
 0xbdb   :  { %2310 = vsyncpa [#allocation13], 1 }
 0xbdc   :  { %2311 = vsyncpa [#allocation16], 1 }
 0xbdd   :  { %2312 = vsyncpa [#allocation19], 1 }
 0xbde   :  { %2313 = vsyncpa [#allocation22], 1 }
 0xbdf   :  { %2314 = vsyncpa [#allocation25], 1 }
 0xbe0   :  { %2315 = vsyncpa [#allocation8], 1 }
 0xbe1   :  { %2317 = vsyncpa [#allocation8 + $0x1], 1 }
 0xbe2   :  { %2318 = vsyncpa [#allocation29], 1 }

</bundles_post_ra>
